<compile_context>
chip_gen: v6e
topology: v6e:2x2x1
jax: 0.10.0
libtpu: 0.0.40
codegen_flags: <defaults>
</compile_context>

<pallas_src>
import functools
import math

import jax
import jax.numpy as jnp
from jax.experimental import pallas as pl
from jax.experimental.pallas import tpu as pltpu

# ---------------- config (small, consistent with the module) ----------------
D_MODEL = 32
N_HEAD = 4
HEAD_DIM = D_MODEL // N_HEAD
DIM_FF = 64
NUM_LAYERS = 2
EMBED_DIM = 24          # self.embed.embedding_dim
VOCAB = 50              # self.embed.num_embeddings
VOCAB_PAD = ((VOCAB + 127) // 128) * 128   # lane-dense vocab output (padded)
MAX_POS = 64
NEG = -1e30             # stands in for masked_fill(-inf)


# ---------------- fused Pallas kernel (entire forward, one batch element) ----
def fused_decoder_kernel(
    we_ref,       # (1, T, D)   input_fc(embed_scale*embed(tokens)) + pos_embed + bias
    enc_ref,      # (1, S, D)   encoder output
    cmask_ref,    # (1, 1, S)   additive cross-attention mask (0 / NEG)
    w_attn_ref,   # (L, 2, D, 3D)  fused [Wq*scale | Wk | Wv] for [self, cross]
    w_o_ref,      # (L, 2, D, D)   attention output projections
    vec_ref,      # (12L+2, 1, 128) all LN / bias vectors, lane-padded to 128
    ffn_w1_ref,   # (L, D, F)
    ffn_w2_ref,   # (L, F, D)
    w_out_ref,    # (D, Vpad)   output_fc.W @ output_layer.W (pre-fused, vocab padded)
    b_out_ref,    # (1, Vpad)   output_fc.b @ output_layer.W (+ NEG on pad columns)
    dist_ref,     # out: (1, T, Vpad)
    attn_ref,     # out: (1, T, Spad)
    *, num_layers, n_head, head_dim,
):
    T, D = we_ref.shape[1], we_ref.shape[2]
    S = enc_ref.shape[1]
    F = ffn_w1_ref.shape[2]
    s_pad = attn_ref.shape[2]

    def vrow(i, width):                       # (1, width) slice of a padded row
        return vec_ref[i][:, :width]

    def layer_norm(x, wi, bi, eps=1e-5):      # PyTorch nn.LayerNorm (biased var)
        mu = jnp.mean(x, axis=-1, keepdims=True)
        var = jnp.mean((x - mu) ** 2, axis=-1, keepdims=True)
        return (x - mu) * jax.lax.rsqrt(var + eps) * vrow(wi, D) + vrow(bi, D)

    def split_heads(x2d, off):
        # (N, >=off+D) -> (H, N, hd) via lane slices + leading-dim stack (no transposes)
        return jnp.stack(
            [x2d[:, off + h * head_dim: off + (h + 1) * head_dim]
             for h in range(n_head)], axis=0)

    def merge_heads(ctx):                     # (H, N, hd) -> (N, D)
        return jnp.concatenate([ctx[h] for h in range(n_head)], axis=-1)

    def attention(q_src, kv_src, mask_add, w_o, b_o):
        # q_src / kv_src: fused projection outputs, q in cols [0,D), k in [D,2D), v in [2D,3D)
        q = split_heads(q_src, 0)             # (H, Tq, hd)  (scale pre-folded in Wq)
        k = split_heads(kv_src, D)            # (H, Skv, hd)
        v = split_heads(kv_src, 2 * D)        # (H, Skv, hd)
        s = jnp.einsum('htk,hsk->hts', q, k,
                       preferred_element_type=jnp.float32) + mask_add
        m = jnp.max(s, axis=-1, keepdims=True)
        e = jnp.exp(s - m)
        p = e * pl.reciprocal(jnp.sum(e, axis=-1, keepdims=True), approx=True)
        ctx = jnp.einsum('hts,hsk->htk', p, v, preferred_element_type=jnp.float32)
        out = jnp.dot(merge_heads(ctx), w_o, preferred_element_type=jnp.float32) + b_o
        return out, p

    x = we_ref[0]                             # (T, D)
    enc = enc_ref[0]                          # (S, D)
    cmask = cmask_ref[0]                      # (1, S) additive

    # triangular (causal) self-attention mask built in-kernel (saves a DMA input)
    row = jax.lax.broadcasted_iota(jnp.int32, (T, T), 0)
    col = jax.lax.broadcasted_iota(jnp.int32, (T, T), 1)
    smask = jnp.where(row >= col, 0.0, NEG).astype(jnp.float32)

    attn0 = jnp.zeros((T, S), jnp.float32)    # guard in case num_layers == 0
    for l in range(num_layers):
        base = 12 * l
        # --- self attention (pre-LN, residual) ---
        res = x
        h = layer_norm(x, base + 0, base + 1)
        qkv = jnp.dot(h, w_attn_ref[l, 0],
                      preferred_element_type=jnp.float32) + vrow(base + 6, 3 * D)
        sa, _ = attention(qkv, qkv, smask, w_o_ref[l, 0], vrow(base + 7, D))
        x = res + sa

        # --- encoder (cross) attention ---
        res = x
        h = layer_norm(x, base + 2, base + 3)
        q_full = jnp.dot(h, w_attn_ref[l, 1],
                         preferred_element_type=jnp.float32) + vrow(base + 8, 3 * D)
        kv_full = jnp.dot(enc, w_attn_ref[l, 1],
                          preferred_element_type=jnp.float32) + vrow(base + 8, 3 * D)
        ca, p = attention(q_full, kv_full, cmask, w_o_ref[l, 1], vrow(base + 9, D))
        x = res + ca
        attn0 = p[0]      # head-0 cross-attn of this (ultimately the last) layer

        # --- feed forward ---
        res = x
        h = layer_norm(x, base + 4, base + 5)
        h = jnp.maximum(
            jnp.dot(h, ffn_w1_ref[l], preferred_element_type=jnp.float32)
            + vrow(base + 10, F), 0.0)
        h = jnp.dot(h, ffn_w2_ref[l], preferred_element_type=jnp.float32) + vrow(base + 11, D)
        x = res + h

    # final LN -> fused (output_fc . output_layer) -> EXACT softmax (lane-dense Vpad)
    x = layer_norm(x, 12 * num_layers + 0, 12 * num_layers + 1)
    logits = jnp.dot(x, w_out_ref[...],
                     preferred_element_type=jnp.float32) + b_out_ref[...]
    m = jnp.max(logits, axis=-1, keepdims=True)
    e = jnp.exp(logits - m)
    dist_ref[0] = e / jnp.sum(e, axis=-1, keepdims=True)

    # lane-dense attention output: zero-pad S -> Spad so the store is unmasked
    attn_ref[0] = jnp.concatenate(
        [attn0, jnp.zeros((T, s_pad - S), jnp.float32)], axis=-1)


# ---------------- wrapper ----------------
def _const_spec(shape):
    nd = len(shape)
    return pl.BlockSpec(shape, lambda b, nd=nd: (0,) * nd)


@functools.partial(jax.jit, static_argnames=("decode_length",))
def transformer_decoder_forward(tokens, encoder_output, encoder_mask, packed,
                                decode_length=0):
    B, T = tokens.shape
    S = encoder_output.shape[1]
    D = D_MODEL
    s_pad = ((S + 127) // 128) * 128

    # Embedding gather (input_fc + embed_scale pre-folded) + positional add: JAX glue.
    position = jnp.arange(decode_length, decode_length + T)
    we = (jnp.take(packed["embed_fc"], tokens, axis=0)
          + jnp.take(packed["posb"], position, axis=0)[None]).astype(jnp.float32)

    # additive cross-attention mask (1 = attend in the original boolean form)
    cmask = (1.0 - encoder_mask.reshape(B, 1, S).astype(jnp.float32)) * NEG
    enc = encoder_output.astype(jnp.float32)

    in_specs = [
        pl.BlockSpec((1, T, D), lambda b: (b, 0, 0)),           # we
        pl.BlockSpec((1, S, D), lambda b: (b, 0, 0)),           # encoder output
        pl.BlockSpec((1, 1, S), lambda b: (b, 0, 0)),           # cross mask
        _const_spec(packed["w_attn"].shape),
        _const_spec(packed["w_o"].shape),
        _const_spec(packed["vec"].shape),
        _const_spec(packed["ffn_w1"].shape),
        _const_spec(packed["ffn_w2"].shape),
        _const_spec(packed["w_out"].shape),
        _const_spec(packed["b_out"].shape),
    ]

    kernel = functools.partial(fused_decoder_kernel, num_layers=NUM_LAYERS,
                               n_head=N_HEAD, head_dim=HEAD_DIM)
    dist_pad, attn_pad = pl.pallas_call(
        kernel,
        out_shape=(jax.ShapeDtypeStruct((B, T, VOCAB_PAD), jnp.float32),
                   jax.ShapeDtypeStruct((B, T, s_pad), jnp.float32)),
        grid=(B,),
        in_specs=in_specs,
        out_specs=(pl.BlockSpec((1, T, VOCAB_PAD), lambda b: (b, 0, 0)),
                   pl.BlockSpec((1, T, s_pad), lambda b: (b, 0, 0))),
        compiler_params=pltpu.CompilerParams(dimension_semantics=("parallel",)),
    )(we, enc, cmask, packed["w_attn"], packed["w_o"], packed["vec"],
      packed["ffn_w1"], packed["ffn_w2"], packed["w_out"], packed["b_out"])

    return dist_pad[..., :VOCAB], attn_pad[..., :S]


# ---------------- one-time parameter packing (host side) ----------------
def pack_params(params):
    D, hd = D_MODEL, HEAD_DIM
    scale = hd ** -0.5

    # Fold embed_scale + input_fc into the embedding table (exact: all linear).
    embed_fc = (math.sqrt(D) * params["embed"]) @ params["input_fc_w"]      # (V, D)
    posb = params["pos_embed"] + params["input_fc_b"]                       # (MAX_POS, D)

    def pad_row(v):                          # (1, w) -> (1, 128)
        v = v.reshape(1, -1)
        return jnp.pad(v, ((0, 0), (0, 128 - v.shape[1])))

    w_attn, w_o, f1, f2, vec = [], [], [], [], []
    for lp in params["layers"]:
        sa_w = jnp.concatenate([scale * lp["sa_wq"], lp["sa_wk"], lp["sa_wv"]], axis=1)
        ca_w = jnp.concatenate([scale * lp["ca_wq"], lp["ca_wk"], lp["ca_wv"]], axis=1)
        w_attn.append(jnp.stack([sa_w, ca_w]))                    # (2, D, 3D)
        w_o.append(jnp.stack([lp["sa_wo"], lp["ca_wo"]]))         # (2, D, D)
        sa_b = jnp.concatenate([scale * lp["sa_bq"], lp["sa_bk"], lp["sa_bv"]], axis=1)
        ca_b = jnp.concatenate([scale * lp["ca_bq"], lp["ca_bk"], lp["ca_bv"]], axis=1)
        vec += [pad_row(lp["ln1_w"]), pad_row(lp["ln1_b"]),
                pad_row(lp["ln2_w"]), pad_row(lp["ln2_b"]),
                pad_row(lp["ln3_w"]), pad_row(lp["ln3_b"]),
                pad_row(sa_b), pad_row(lp["sa_bo"]),
                pad_row(ca_b), pad_row(lp["ca_bo"]),
                pad_row(lp["ffn_b1"]), pad_row(lp["ffn_b2"])]
        f1.append(lp["ffn_w1"]); f2.append(lp["ffn_w2"])
    vec += [pad_row(params["final_ln_w"]), pad_row(params["final_ln_b"])]

    # Fuse output_fc -> output_layer (back-to-back linears), pad vocab to 128 lanes,
    # and bias the padding columns with NEG so softmax gives them zero mass.
    ov_pad = jnp.pad(params["output_layer_w"], ((0, 0), (0, VOCAB_PAD - VOCAB)))
    w_out = params["output_fc_w"] @ ov_pad                                   # (D, Vpad)
    pad_bias = jnp.concatenate(
        [jnp.zeros((1, VOCAB), jnp.float32),
         jnp.full((1, VOCAB_PAD - VOCAB), NEG, jnp.float32)], axis=1)
    b_out = params["output_fc_b"] @ ov_pad + pad_bias                        # (1, Vpad)

    return {
        "embed_fc": embed_fc, "posb": posb,
        "w_attn": jnp.stack(w_attn),          # (L, 2, D, 3D)
        "w_o": jnp.stack(w_o),                # (L, 2, D, D)
        "vec": jnp.stack(vec),                # (12L+2, 1, 128)
        "ffn_w1": jnp.stack(f1),              # (L, D, F)
        "ffn_w2": jnp.stack(f2),              # (L, F, D)
        "w_out": w_out, "b_out": b_out,       # (D, Vpad), (1, Vpad)
    }


# ---------------- deterministic parameter init ----------------
def init_params(key):
    keys = iter(jax.random.split(key, 256))

    def nrm(shape, scale=0.05):
        return scale * jax.random.normal(next(keys), shape, dtype=jnp.float32)

    def ones(shape):
        return jnp.ones(shape, jnp.float32)

    def zeros(shape):
        return jnp.zeros(shape, jnp.float32)

    params = {
        "embed": nrm((VOCAB, EMBED_DIM), 0.1),
        "pos_embed": nrm((MAX_POS, D_MODEL), 0.1),
        "input_fc_w": nrm((EMBED_DIM, D_MODEL)),
        "input_fc_b": nrm((1, D_MODEL), 0.02),
        "final_ln_w": ones((1, D_MODEL)),
        "final_ln_b": zeros((1, D_MODEL)),
        "output_fc_w": nrm((D_MODEL, EMBED_DIM)),
        "output_fc_b": nrm((1, EMBED_DIM), 0.02),
        "output_layer_w": nrm((EMBED_DIM, VOCAB)),   # no bias (bias=False)
        "layers": [],
    }
    for _ in range(NUM_LAYERS):
        lp = {
            "ln1_w": ones((1, D_MODEL)), "ln1_b": zeros((1, D_MODEL)),
            "sa_wq": nrm((D_MODEL, D_MODEL)), "sa_bq": nrm((1, D_MODEL), 0.02),
            "sa_wk": nrm((D_MODEL, D_MODEL)), "sa_bk": nrm((1, D_MODEL), 0.02),
            "sa_wv": nrm((D_MODEL, D_MODEL)), "sa_bv": nrm((1, D_MODEL), 0.02),
            "sa_wo": nrm((D_MODEL, D_MODEL)), "sa_bo": nrm((1, D_MODEL), 0.02),
            "ln2_w": ones((1, D_MODEL)), "ln2_b": zeros((1, D_MODEL)),
            "ca_wq": nrm((D_MODEL, D_MODEL)), "ca_bq": nrm((1, D_MODEL), 0.02),
            "ca_wk": nrm((D_MODEL, D_MODEL)), "ca_bk": nrm((1, D_MODEL), 0.02),
            "ca_wv": nrm((D_MODEL, D_MODEL)), "ca_bv": nrm((1, D_MODEL), 0.02),
            "ca_wo": nrm((D_MODEL, D_MODEL)), "ca_bo": nrm((1, D_MODEL), 0.02),
            "ln3_w": ones((1, D_MODEL)), "ln3_b": zeros((1, D_MODEL)),
            "ffn_w1": nrm((D_MODEL, DIM_FF)), "ffn_b1": nrm((1, DIM_FF), 0.02),
            "ffn_w2": nrm((DIM_FF, D_MODEL)), "ffn_b2": nrm((1, D_MODEL), 0.02),
        }
        params["layers"].append(lp)
    return params


# TODO(synk): copy_attn scatter_add path, incremental-decoding state cache and the
# fix_kp_num_len (set-prediction) mask path are not exercised (copy_attn=False,
# fix_kp_num_len=False, fresh state), matching the default training forward.
# Note: a fully-masked cross-attention row degenerates to uniform weights instead
# of the NaN produced by masked_fill(-inf) in the PyTorch reference.

if __name__ == "__main__":
    B, T, S = 2, 8, 16
    key = jax.random.PRNGKey(0)
    k_tok, k_enc, k_par = jax.random.split(key, 3)

    tokens = jax.random.randint(k_tok, (B, T), 0, VOCAB)
    encoder_output = jax.random.normal(k_enc, (B, S, D_MODEL), dtype=jnp.float32)
    encoder_mask = jnp.ones((B, S), dtype=jnp.float32).at[1, 12:].set(0.0)

    params = init_params(k_par)
    packed = pack_params(params)        # one-time host-side weight packing

    final_dist, attn_dist = transformer_decoder_forward(
        tokens, encoder_output, encoder_mask, packed)
    final_dist = jax.block_until_ready(final_dist)
    attn_dist = jax.block_until_ready(attn_dist)

    assert final_dist.shape == (B, T, VOCAB)
    assert attn_dist.shape == (B, T, S)
    assert bool(jnp.all(jnp.isfinite(final_dist)))
    # exact reciprocal in the final vocab softmax -> tight sum-to-one
    assert bool(jnp.allclose(jnp.sum(final_dist, -1), 1.0, atol=1e-4))
    # approx reciprocal inside attention -> slightly looser tolerance
    assert bool(jnp.allclose(jnp.sum(attn_dist, -1), 1.0, atol=5e-3))
    # masked encoder positions must receive zero cross-attention
    assert bool(jnp.all(attn_dist[1, :, 12:] < 1e-6))

    print("KERNEL_OK")
</pallas_src>

<mosaic_0001>
module attributes {stable_mosaic.version = 11 : i64} {
  func.func @fused_decoder_kernel(%arg0: i32, %arg1: memref<1x8x32xf32, #tpu.memory_space<vmem>>, %arg2: memref<1x16x32xf32, #tpu.memory_space<vmem>>, %arg3: memref<1x1x16xf32, #tpu.memory_space<vmem>>, %arg4: memref<2x2x32x96xf32, #tpu.memory_space<vmem>>, %arg5: memref<2x2x32x32xf32, #tpu.memory_space<vmem>>, %arg6: memref<26x1x128xf32, #tpu.memory_space<vmem>>, %arg7: memref<2x32x64xf32, #tpu.memory_space<vmem>>, %arg8: memref<2x64x32xf32, #tpu.memory_space<vmem>>, %arg9: memref<32x128xf32, #tpu.memory_space<vmem>>, %arg10: memref<1x128xf32, #tpu.memory_space<vmem>>, %arg11: memref<1x8x128xf32, #tpu.memory_space<vmem>>, %arg12: memref<1x8x128xf32, #tpu.memory_space<vmem>>) attributes {dimension_semantics = [#tpu.dimension_semantics<parallel>], iteration_bounds = array<i64: 2>, scalar_prefetch = 0 : i64, scratch_operands = 0 : i64, tpu.core_type = #tpu.core_type<tc>, window_params = [{transform_indices = @transform_0, window_bounds = array<i64: 1, 8, 32>}, {transform_indices = @transform_1, window_bounds = array<i64: 1, 16, 32>}, {transform_indices = @transform_2, window_bounds = array<i64: 1, 1, 16>}, {pipeline_mode = #tpu.pipeline_mode<synchronous>, transform_indices = @transform_3, window_bounds = array<i64: 2, 2, 32, 96>}, {pipeline_mode = #tpu.pipeline_mode<synchronous>, transform_indices = @transform_4, window_bounds = array<i64: 2, 2, 32, 32>}, {pipeline_mode = #tpu.pipeline_mode<synchronous>, transform_indices = @transform_5, window_bounds = array<i64: 26, 1, 128>}, {pipeline_mode = #tpu.pipeline_mode<synchronous>, transform_indices = @transform_6, window_bounds = array<i64: 2, 32, 64>}, {pipeline_mode = #tpu.pipeline_mode<synchronous>, transform_indices = @transform_7, window_bounds = array<i64: 2, 64, 32>}, {pipeline_mode = #tpu.pipeline_mode<synchronous>, transform_indices = @transform_8, window_bounds = array<i64: 32, 128>}, {pipeline_mode = #tpu.pipeline_mode<synchronous>, transform_indices = @transform_9, window_bounds = array<i64: 1, 128>}, {transform_indices = @transform_10, window_bounds = array<i64: 1, 8, 128>}, {transform_indices = @transform_11, window_bounds = array<i64: 1, 8, 128>}]} {
    %c0 = arith.constant 0 : index
    %c0_0 = arith.constant 0 : index
    %c0_1 = arith.constant 0 : index
    %0 = vector.load %arg1[%c0, %c0_0, %c0_1] : memref<1x8x32xf32, #tpu.memory_space<vmem>>, vector<1x8x32xf32>
    %1 = vector.shape_cast %0 : vector<1x8x32xf32> to vector<8x32xf32>
    %c0_2 = arith.constant 0 : index
    %c0_3 = arith.constant 0 : index
    %c0_4 = arith.constant 0 : index
    %2 = vector.load %arg2[%c0_2, %c0_3, %c0_4] : memref<1x16x32xf32, #tpu.memory_space<vmem>>, vector<1x16x32xf32>
    %3 = vector.shape_cast %2 : vector<1x16x32xf32> to vector<16x32xf32>
    %c0_5 = arith.constant 0 : index
    %c0_6 = arith.constant 0 : index
    %c0_7 = arith.constant 0 : index
    %4 = vector.load %arg3[%c0_5, %c0_6, %c0_7] : memref<1x1x16xf32, #tpu.memory_space<vmem>>, vector<1x1x16xf32>
    %5 = vector.shape_cast %4 : vector<1x1x16xf32> to vector<1x16xf32>
    %6 = tpu.iota {dimensions = array<i32: 0>} : vector<8x8xi32>
    %7 = tpu.iota {dimensions = array<i32: 1>} : vector<8x8xi32>
    %8 = arith.cmpi sge, %6, %7 : vector<8x8xi32>
    %cst = arith.constant 0.000000e+00 : f32
    %cst_8 = arith.constant -1.000000e+30 : f32
    %9 = vector.broadcast %cst : f32 to vector<8x8xf32>
    %10 = vector.broadcast %cst_8 : f32 to vector<8x8xf32>
    %11 = arith.select %8, %9, %10 : vector<8x8xi1>, vector<8x8xf32>
    %cst_9 = arith.constant dense<0.000000e+00> : vector<8xf32>
    %12 = vector.multi_reduction <add>, %1, %cst_9 [1] : vector<8x32xf32> to vector<8xf32>
    %13 = vector.shape_cast %12 : vector<8xf32> to vector<8x1xf32>
    %cst_10 = arith.constant 3.200000e+01 : f32
    %14 = vector.broadcast %cst_10 : f32 to vector<8x1xf32>
    %15 = arith.divf %13, %14 : vector<8x1xf32>
    %16 = vector.broadcast %15 : vector<8x1xf32> to vector<8x32xf32>
    %17 = arith.subf %1, %16 : vector<8x32xf32>
    %18 = arith.mulf %17, %17 : vector<8x32xf32>
    %cst_11 = arith.constant dense<0.000000e+00> : vector<8xf32>
    %19 = vector.multi_reduction <add>, %18, %cst_11 [1] : vector<8x32xf32> to vector<8xf32>
    %20 = vector.shape_cast %19 : vector<8xf32> to vector<8x1xf32>
    %cst_12 = arith.constant 3.200000e+01 : f32
    %21 = vector.broadcast %cst_12 : f32 to vector<8x1xf32>
    %22 = arith.divf %20, %21 : vector<8x1xf32>
    %23 = vector.broadcast %15 : vector<8x1xf32> to vector<8x32xf32>
    %24 = arith.subf %1, %23 : vector<8x32xf32>
    %cst_13 = arith.constant 9.99999974E-6 : f32
    %25 = vector.broadcast %cst_13 : f32 to vector<8x1xf32>
    %26 = arith.addf %22, %25 : vector<8x1xf32>
    %27 = math.rsqrt %26 : vector<8x1xf32>
    %28 = vector.broadcast %27 : vector<8x1xf32> to vector<8x32xf32>
    %29 = arith.mulf %24, %28 : vector<8x32xf32>
    %c0_14 = arith.constant 0 : index
    %c0_15 = arith.constant 0 : index
    %c0_16 = arith.constant 0 : index
    %30 = vector.load %arg6[%c0_14, %c0_15, %c0_16] : memref<26x1x128xf32, #tpu.memory_space<vmem>>, vector<1x1x128xf32>
    %31 = vector.shape_cast %30 : vector<1x1x128xf32> to vector<1x128xf32>
    %32 = vector.extract_strided_slice %31 {offsets = [0, 0], sizes = [1, 32], strides = [1, 1]} : vector<1x128xf32> to vector<1x32xf32>
    %33 = vector.broadcast %32 : vector<1x32xf32> to vector<8x32xf32>
    %34 = arith.mulf %29, %33 : vector<8x32xf32>
    %c1 = arith.constant 1 : index
    %c0_17 = arith.constant 0 : index
    %c0_18 = arith.constant 0 : index
    %35 = vector.load %arg6[%c1, %c0_17, %c0_18] : memref<26x1x128xf32, #tpu.memory_space<vmem>>, vector<1x1x128xf32>
    %36 = vector.shape_cast %35 : vector<1x1x128xf32> to vector<1x128xf32>
    %37 = vector.extract_strided_slice %36 {offsets = [0, 0], sizes = [1, 32], strides = [1, 1]} : vector<1x128xf32> to vector<1x32xf32>
    %38 = vector.broadcast %37 : vector<1x32xf32> to vector<8x32xf32>
    %39 = arith.addf %34, %38 : vector<8x32xf32>
    %c0_19 = arith.constant 0 : index
    %c0_20 = arith.constant 0 : index
    %c0_21 = arith.constant 0 : index
    %c0_22 = arith.constant 0 : index
    %40 = vector.load %arg4[%c0_19, %c0_20, %c0_21, %c0_22] : memref<2x2x32x96xf32, #tpu.memory_space<vmem>>, vector<1x1x32x96xf32>
    %41 = vector.shape_cast %40 : vector<1x1x32x96xf32> to vector<32x96xf32>
    %cst_23 = arith.constant dense<0.000000e+00> : vector<8x96xf32>
    %42 = tpu.matmul %39, %41, %cst_23 {dimension_numbers = #tpu.dot_dimension_numbers<[1], [0], [0], [1], [0, 0, 1, 1], [], []>} : vector<8x32xf32>, vector<32x96xf32>, vector<8x96xf32> -> vector<8x96xf32>
    %c6 = arith.constant 6 : index
    %c0_24 = arith.constant 0 : index
    %c0_25 = arith.constant 0 : index
    %43 = vector.load %arg6[%c6, %c0_24, %c0_25] : memref<26x1x128xf32, #tpu.memory_space<vmem>>, vector<1x1x128xf32>
    %44 = vector.shape_cast %43 : vector<1x1x128xf32> to vector<1x128xf32>
    %45 = vector.extract_strided_slice %44 {offsets = [0, 0], sizes = [1, 96], strides = [1, 1]} : vector<1x128xf32> to vector<1x96xf32>
    %46 = vector.broadcast %45 : vector<1x96xf32> to vector<8x96xf32>
    %47 = arith.addf %42, %46 : vector<8x96xf32>
    %c0_26 = arith.constant 0 : index
    %c0_27 = arith.constant 0 : index
    %c0_28 = arith.constant 0 : index
    %c0_29 = arith.constant 0 : index
    %48 = vector.load %arg5[%c0_26, %c0_27, %c0_28, %c0_29] : memref<2x2x32x32xf32, #tpu.memory_space<vmem>>, vector<1x1x32x32xf32>
    %49 = vector.shape_cast %48 : vector<1x1x32x32xf32> to vector<32x32xf32>
    %c7 = arith.constant 7 : index
    %c0_30 = arith.constant 0 : index
    %c0_31 = arith.constant 0 : index
    %50 = vector.load %arg6[%c7, %c0_30, %c0_31] : memref<26x1x128xf32, #tpu.memory_space<vmem>>, vector<1x1x128xf32>
    %51 = vector.shape_cast %50 : vector<1x1x128xf32> to vector<1x128xf32>
    %52 = vector.extract_strided_slice %51 {offsets = [0, 0], sizes = [1, 32], strides = [1, 1]} : vector<1x128xf32> to vector<1x32xf32>
    %53 = vector.extract_strided_slice %47 {offsets = [0, 0], sizes = [8, 8], strides = [1, 1]} : vector<8x96xf32> to vector<8x8xf32>
    %54 = vector.extract_strided_slice %47 {offsets = [0, 8], sizes = [8, 8], strides = [1, 1]} : vector<8x96xf32> to vector<8x8xf32>
    %55 = vector.extract_strided_slice %47 {offsets = [0, 16], sizes = [8, 8], strides = [1, 1]} : vector<8x96xf32> to vector<8x8xf32>
    %56 = vector.extract_strided_slice %47 {offsets = [0, 24], sizes = [8, 8], strides = [1, 1]} : vector<8x96xf32> to vector<8x8xf32>
    %57 = vector.shape_cast %53 : vector<8x8xf32> to vector<1x8x8xf32>
    %58 = vector.shape_cast %54 : vector<8x8xf32> to vector<1x8x8xf32>
    %59 = vector.shape_cast %55 : vector<8x8xf32> to vector<1x8x8xf32>
    %60 = vector.shape_cast %56 : vector<8x8xf32> to vector<1x8x8xf32>
    %61 = tpu.concatenate %57, %58, %59, %60 in 0 : vector<1x8x8xf32>, vector<1x8x8xf32>, vector<1x8x8xf32>, vector<1x8x8xf32> -> vector<4x8x8xf32>
    %62 = vector.extract_strided_slice %47 {offsets = [0, 32], sizes = [8, 8], strides = [1, 1]} : vector<8x96xf32> to vector<8x8xf32>
    %63 = vector.extract_strided_slice %47 {offsets = [0, 40], sizes = [8, 8], strides = [1, 1]} : vector<8x96xf32> to vector<8x8xf32>
    %64 = vector.extract_strided_slice %47 {offsets = [0, 48], sizes = [8, 8], strides = [1, 1]} : vector<8x96xf32> to vector<8x8xf32>
    %65 = vector.extract_strided_slice %47 {offsets = [0, 56], sizes = [8, 8], strides = [1, 1]} : vector<8x96xf32> to vector<8x8xf32>
    %66 = vector.shape_cast %62 : vector<8x8xf32> to vector<1x8x8xf32>
    %67 = vector.shape_cast %63 : vector<8x8xf32> to vector<1x8x8xf32>
    %68 = vector.shape_cast %64 : vector<8x8xf32> to vector<1x8x8xf32>
    %69 = vector.shape_cast %65 : vector<8x8xf32> to vector<1x8x8xf32>
    %70 = tpu.concatenate %66, %67, %68, %69 in 0 : vector<1x8x8xf32>, vector<1x8x8xf32>, vector<1x8x8xf32>, vector<1x8x8xf32> -> vector<4x8x8xf32>
    %71 = vector.extract_strided_slice %47 {offsets = [0, 64], sizes = [8, 8], strides = [1, 1]} : vector<8x96xf32> to vector<8x8xf32>
    %72 = vector.extract_strided_slice %47 {offsets = [0, 72], sizes = [8, 8], strides = [1, 1]} : vector<8x96xf32> to vector<8x8xf32>
    %73 = vector.extract_strided_slice %47 {offsets = [0, 80], sizes = [8, 8], strides = [1, 1]} : vector<8x96xf32> to vector<8x8xf32>
    %74 = vector.extract_strided_slice %47 {offsets = [0, 88], sizes = [8, 8], strides = [1, 1]} : vector<8x96xf32> to vector<8x8xf32>
    %75 = vector.shape_cast %71 : vector<8x8xf32> to vector<1x8x8xf32>
    %76 = vector.shape_cast %72 : vector<8x8xf32> to vector<1x8x8xf32>
    %77 = vector.shape_cast %73 : vector<8x8xf32> to vector<1x8x8xf32>
    %78 = vector.shape_cast %74 : vector<8x8xf32> to vector<1x8x8xf32>
    %79 = tpu.concatenate %75, %76, %77, %78 in 0 : vector<1x8x8xf32>, vector<1x8x8xf32>, vector<1x8x8xf32>, vector<1x8x8xf32> -> vector<4x8x8xf32>
    "tpu.trace_start"() <{level = 10 : i32, message = "htk,hsk->hts"}> : () -> ()
    %cst_32 = arith.constant dense<0.000000e+00> : vector<4x8x8xf32>
    %80 = tpu.matmul %61, %70, %cst_32 {dimension_numbers = #tpu.dot_dimension_numbers<[2], [2], [1], [1], [0, 0, 0, 1, 1, 1], [0], [0]>} : vector<4x8x8xf32>, vector<4x8x8xf32>, vector<4x8x8xf32> -> vector<4x8x8xf32>
    "tpu.trace_stop"() : () -> ()
    %81 = vector.shape_cast %11 : vector<8x8xf32> to vector<1x8x8xf32>
    %82 = vector.broadcast %81 : vector<1x8x8xf32> to vector<4x8x8xf32>
    %83 = arith.addf %80, %82 : vector<4x8x8xf32>
    %cst_33 = arith.constant dense<0xFF800000> : vector<4x8xf32>
    %84 = vector.multi_reduction <maximumf>, %83, %cst_33 [2] : vector<4x8x8xf32> to vector<4x8xf32>
    %85 = vector.shape_cast %84 : vector<4x8xf32> to vector<4x8x1xf32>
    %86 = vector.broadcast %85 : vector<4x8x1xf32> to vector<4x8x8xf32>
    %87 = arith.subf %83, %86 : vector<4x8x8xf32>
    %88 = math.exp %87 : vector<4x8x8xf32>
    %cst_34 = arith.constant dense<0.000000e+00> : vector<4x8xf32>
    %89 = vector.multi_reduction <add>, %88, %cst_34 [2] : vector<4x8x8xf32> to vector<4x8xf32>
    %90 = vector.shape_cast %89 : vector<4x8xf32> to vector<4x8x1xf32>
    %91 = tpu.reciprocal %90 {approx = true} : vector<4x8x1xf32> -> vector<4x8x1xf32>
    %92 = vector.broadcast %91 : vector<4x8x1xf32> to vector<4x8x8xf32>
    %93 = arith.mulf %88, %92 : vector<4x8x8xf32>
    "tpu.trace_start"() <{level = 10 : i32, message = "hts,hsk->htk"}> : () -> ()
    %cst_35 = arith.constant dense<0.000000e+00> : vector<4x8x8xf32>
    %94 = tpu.matmul %93, %79, %cst_35 {dimension_numbers = #tpu.dot_dimension_numbers<[2], [1], [1], [2], [0, 0, 0, 1, 1, 2], [0], [0]>} : vector<4x8x8xf32>, vector<4x8x8xf32>, vector<4x8x8xf32> -> vector<4x8x8xf32>
    "tpu.trace_stop"() : () -> ()
    %95 = vector.extract_strided_slice %94 {offsets = [0, 0, 0], sizes = [1, 8, 8], strides = [1, 1, 1]} : vector<4x8x8xf32> to vector<1x8x8xf32>
    %96 = vector.shape_cast %95 : vector<1x8x8xf32> to vector<8x8xf32>
    %97 = vector.extract_strided_slice %94 {offsets = [1, 0, 0], sizes = [1, 8, 8], strides = [1, 1, 1]} : vector<4x8x8xf32> to vector<1x8x8xf32>
    %98 = vector.shape_cast %97 : vector<1x8x8xf32> to vector<8x8xf32>
    %99 = vector.extract_strided_slice %94 {offsets = [2, 0, 0], sizes = [1, 8, 8], strides = [1, 1, 1]} : vector<4x8x8xf32> to vector<1x8x8xf32>
    %100 = vector.shape_cast %99 : vector<1x8x8xf32> to vector<8x8xf32>
    %101 = vector.extract_strided_slice %94 {offsets = [3, 0, 0], sizes = [1, 8, 8], strides = [1, 1, 1]} : vector<4x8x8xf32> to vector<1x8x8xf32>
    %102 = vector.shape_cast %101 : vector<1x8x8xf32> to vector<8x8xf32>
    %103 = tpu.concatenate %96, %98, %100, %102 in 1 : vector<8x8xf32>, vector<8x8xf32>, vector<8x8xf32>, vector<8x8xf32> -> vector<8x32xf32>
    %cst_36 = arith.constant dense<0.000000e+00> : vector<8x32xf32>
    %104 = tpu.matmul %103, %49, %cst_36 {dimension_numbers = #tpu.dot_dimension_numbers<[1], [0], [0], [1], [0, 0, 1, 1], [], []>} : vector<8x32xf32>, vector<32x32xf32>, vector<8x32xf32> -> vector<8x32xf32>
    %105 = vector.broadcast %52 : vector<1x32xf32> to vector<8x32xf32>
    %106 = arith.addf %104, %105 : vector<8x32xf32>
    %107 = arith.addf %1, %106 : vector<8x32xf32>
    %cst_37 = arith.constant dense<0.000000e+00> : vector<8xf32>
    %108 = vector.multi_reduction <add>, %107, %cst_37 [1] : vector<8x32xf32> to vector<8xf32>
    %109 = vector.shape_cast %108 : vector<8xf32> to vector<8x1xf32>
    %cst_38 = arith.constant 3.200000e+01 : f32
    %110 = vector.broadcast %cst_38 : f32 to vector<8x1xf32>
    %111 = arith.divf %109, %110 : vector<8x1xf32>
    %112 = vector.broadcast %111 : vector<8x1xf32> to vector<8x32xf32>
    %113 = arith.subf %107, %112 : vector<8x32xf32>
    %114 = arith.mulf %113, %113 : vector<8x32xf32>
    %cst_39 = arith.constant dense<0.000000e+00> : vector<8xf32>
    %115 = vector.multi_reduction <add>, %114, %cst_39 [1] : vector<8x32xf32> to vector<8xf32>
    %116 = vector.shape_cast %115 : vector<8xf32> to vector<8x1xf32>
    %cst_40 = arith.constant 3.200000e+01 : f32
    %117 = vector.broadcast %cst_40 : f32 to vector<8x1xf32>
    %118 = arith.divf %116, %117 : vector<8x1xf32>
    %119 = vector.broadcast %111 : vector<8x1xf32> to vector<8x32xf32>
    %120 = arith.subf %107, %119 : vector<8x32xf32>
    %cst_41 = arith.constant 9.99999974E-6 : f32
    %121 = vector.broadcast %cst_41 : f32 to vector<8x1xf32>
    %122 = arith.addf %118, %121 : vector<8x1xf32>
    %123 = math.rsqrt %122 : vector<8x1xf32>
    %124 = vector.broadcast %123 : vector<8x1xf32> to vector<8x32xf32>
    %125 = arith.mulf %120, %124 : vector<8x32xf32>
    %c2 = arith.constant 2 : index
    %c0_42 = arith.constant 0 : index
    %c0_43 = arith.constant 0 : index
    %126 = vector.load %arg6[%c2, %c0_42, %c0_43] : memref<26x1x128xf32, #tpu.memory_space<vmem>>, vector<1x1x128xf32>
    %127 = vector.shape_cast %126 : vector<1x1x128xf32> to vector<1x128xf32>
    %128 = vector.extract_strided_slice %127 {offsets = [0, 0], sizes = [1, 32], strides = [1, 1]} : vector<1x128xf32> to vector<1x32xf32>
    %129 = vector.broadcast %128 : vector<1x32xf32> to vector<8x32xf32>
    %130 = arith.mulf %125, %129 : vector<8x32xf32>
    %c3 = arith.constant 3 : index
    %c0_44 = arith.constant 0 : index
    %c0_45 = arith.constant 0 : index
    %131 = vector.load %arg6[%c3, %c0_44, %c0_45] : memref<26x1x128xf32, #tpu.memory_space<vmem>>, vector<1x1x128xf32>
    %132 = vector.shape_cast %131 : vector<1x1x128xf32> to vector<1x128xf32>
    %133 = vector.extract_strided_slice %132 {offsets = [0, 0], sizes = [1, 32], strides = [1, 1]} : vector<1x128xf32> to vector<1x32xf32>
    %134 = vector.broadcast %133 : vector<1x32xf32> to vector<8x32xf32>
    %135 = arith.addf %130, %134 : vector<8x32xf32>
    %c0_46 = arith.constant 0 : index
    %c1_47 = arith.constant 1 : index
    %c0_48 = arith.constant 0 : index
    %c0_49 = arith.constant 0 : index
    %136 = vector.load %arg4[%c0_46, %c1_47, %c0_48, %c0_49] : memref<2x2x32x96xf32, #tpu.memory_space<vmem>>, vector<1x1x32x96xf32>
    %137 = vector.shape_cast %136 : vector<1x1x32x96xf32> to vector<32x96xf32>
    %cst_50 = arith.constant dense<0.000000e+00> : vector<8x96xf32>
    %138 = tpu.matmul %135, %137, %cst_50 {dimension_numbers = #tpu.dot_dimension_numbers<[1], [0], [0], [1], [0, 0, 1, 1], [], []>} : vector<8x32xf32>, vector<32x96xf32>, vector<8x96xf32> -> vector<8x96xf32>
    %c8 = arith.constant 8 : index
    %c0_51 = arith.constant 0 : index
    %c0_52 = arith.constant 0 : index
    %139 = vector.load %arg6[%c8, %c0_51, %c0_52] : memref<26x1x128xf32, #tpu.memory_space<vmem>>, vector<1x1x128xf32>
    %140 = vector.shape_cast %139 : vector<1x1x128xf32> to vector<1x128xf32>
    %141 = vector.extract_strided_slice %140 {offsets = [0, 0], sizes = [1, 96], strides = [1, 1]} : vector<1x128xf32> to vector<1x96xf32>
    %142 = vector.broadcast %141 : vector<1x96xf32> to vector<8x96xf32>
    %143 = arith.addf %138, %142 : vector<8x96xf32>
    %c0_53 = arith.constant 0 : index
    %c1_54 = arith.constant 1 : index
    %c0_55 = arith.constant 0 : index
    %c0_56 = arith.constant 0 : index
    %144 = vector.load %arg4[%c0_53, %c1_54, %c0_55, %c0_56] : memref<2x2x32x96xf32, #tpu.memory_space<vmem>>, vector<1x1x32x96xf32>
    %145 = vector.shape_cast %144 : vector<1x1x32x96xf32> to vector<32x96xf32>
    %cst_57 = arith.constant dense<0.000000e+00> : vector<16x96xf32>
    %146 = tpu.matmul %3, %145, %cst_57 {dimension_numbers = #tpu.dot_dimension_numbers<[1], [0], [0], [1], [0, 0, 1, 1], [], []>} : vector<16x32xf32>, vector<32x96xf32>, vector<16x96xf32> -> vector<16x96xf32>
    %c8_58 = arith.constant 8 : index
    %c0_59 = arith.constant 0 : index
    %c0_60 = arith.constant 0 : index
    %147 = vector.load %arg6[%c8_58, %c0_59, %c0_60] : memref<26x1x128xf32, #tpu.memory_space<vmem>>, vector<1x1x128xf32>
    %148 = vector.shape_cast %147 : vector<1x1x128xf32> to vector<1x128xf32>
    %149 = vector.extract_strided_slice %148 {offsets = [0, 0], sizes = [1, 96], strides = [1, 1]} : vector<1x128xf32> to vector<1x96xf32>
    %150 = vector.broadcast %149 : vector<1x96xf32> to vector<16x96xf32>
    %151 = arith.addf %146, %150 : vector<16x96xf32>
    %c0_61 = arith.constant 0 : index
    %c1_62 = arith.constant 1 : index
    %c0_63 = arith.constant 0 : index
    %c0_64 = arith.constant 0 : index
    %152 = vector.load %arg5[%c0_61, %c1_62, %c0_63, %c0_64] : memref<2x2x32x32xf32, #tpu.memory_space<vmem>>, vector<1x1x32x32xf32>
    %153 = vector.shape_cast %152 : vector<1x1x32x32xf32> to vector<32x32xf32>
    %c9 = arith.constant 9 : index
    %c0_65 = arith.constant 0 : index
    %c0_66 = arith.constant 0 : index
    %154 = vector.load %arg6[%c9, %c0_65, %c0_66] : memref<26x1x128xf32, #tpu.memory_space<vmem>>, vector<1x1x128xf32>
    %155 = vector.shape_cast %154 : vector<1x1x128xf32> to vector<1x128xf32>
    %156 = vector.extract_strided_slice %155 {offsets = [0, 0], sizes = [1, 32], strides = [1, 1]} : vector<1x128xf32> to vector<1x32xf32>
    %157 = vector.extract_strided_slice %143 {offsets = [0, 0], sizes = [8, 8], strides = [1, 1]} : vector<8x96xf32> to vector<8x8xf32>
    %158 = vector.extract_strided_slice %143 {offsets = [0, 8], sizes = [8, 8], strides = [1, 1]} : vector<8x96xf32> to vector<8x8xf32>
    %159 = vector.extract_strided_slice %143 {offsets = [0, 16], sizes = [8, 8], strides = [1, 1]} : vector<8x96xf32> to vector<8x8xf32>
    %160 = vector.extract_strided_slice %143 {offsets = [0, 24], sizes = [8, 8], strides = [1, 1]} : vector<8x96xf32> to vector<8x8xf32>
    %161 = vector.shape_cast %157 : vector<8x8xf32> to vector<1x8x8xf32>
    %162 = vector.shape_cast %158 : vector<8x8xf32> to vector<1x8x8xf32>
    %163 = vector.shape_cast %159 : vector<8x8xf32> to vector<1x8x8xf32>
    %164 = vector.shape_cast %160 : vector<8x8xf32> to vector<1x8x8xf32>
    %165 = tpu.concatenate %161, %162, %163, %164 in 0 : vector<1x8x8xf32>, vector<1x8x8xf32>, vector<1x8x8xf32>, vector<1x8x8xf32> -> vector<4x8x8xf32>
    %166 = vector.extract_strided_slice %151 {offsets = [0, 32], sizes = [16, 8], strides = [1, 1]} : vector<16x96xf32> to vector<16x8xf32>
    %167 = vector.extract_strided_slice %151 {offsets = [0, 40], sizes = [16, 8], strides = [1, 1]} : vector<16x96xf32> to vector<16x8xf32>
    %168 = vector.extract_strided_slice %151 {offsets = [0, 48], sizes = [16, 8], strides = [1, 1]} : vector<16x96xf32> to vector<16x8xf32>
    %169 = vector.extract_strided_slice %151 {offsets = [0, 56], sizes = [16, 8], strides = [1, 1]} : vector<16x96xf32> to vector<16x8xf32>
    %170 = vector.shape_cast %166 : vector<16x8xf32> to vector<1x16x8xf32>
    %171 = vector.shape_cast %167 : vector<16x8xf32> to vector<1x16x8xf32>
    %172 = vector.shape_cast %168 : vector<16x8xf32> to vector<1x16x8xf32>
    %173 = vector.shape_cast %169 : vector<16x8xf32> to vector<1x16x8xf32>
    %174 = tpu.concatenate %170, %171, %172, %173 in 0 : vector<1x16x8xf32>, vector<1x16x8xf32>, vector<1x16x8xf32>, vector<1x16x8xf32> -> vector<4x16x8xf32>
    %175 = vector.extract_strided_slice %151 {offsets = [0, 64], sizes = [16, 8], strides = [1, 1]} : vector<16x96xf32> to vector<16x8xf32>
    %176 = vector.extract_strided_slice %151 {offsets = [0, 72], sizes = [16, 8], strides = [1, 1]} : vector<16x96xf32> to vector<16x8xf32>
    %177 = vector.extract_strided_slice %151 {offsets = [0, 80], sizes = [16, 8], strides = [1, 1]} : vector<16x96xf32> to vector<16x8xf32>
    %178 = vector.extract_strided_slice %151 {offsets = [0, 88], sizes = [16, 8], strides = [1, 1]} : vector<16x96xf32> to vector<16x8xf32>
    %179 = vector.shape_cast %175 : vector<16x8xf32> to vector<1x16x8xf32>
    %180 = vector.shape_cast %176 : vector<16x8xf32> to vector<1x16x8xf32>
    %181 = vector.shape_cast %177 : vector<16x8xf32> to vector<1x16x8xf32>
    %182 = vector.shape_cast %178 : vector<16x8xf32> to vector<1x16x8xf32>
    %183 = tpu.concatenate %179, %180, %181, %182 in 0 : vector<1x16x8xf32>, vector<1x16x8xf32>, vector<1x16x8xf32>, vector<1x16x8xf32> -> vector<4x16x8xf32>
    "tpu.trace_start"() <{level = 10 : i32, message = "htk,hsk->hts"}> : () -> ()
    %cst_67 = arith.constant dense<0.000000e+00> : vector<4x8x16xf32>
    %184 = tpu.matmul %165, %174, %cst_67 {dimension_numbers = #tpu.dot_dimension_numbers<[2], [2], [1], [1], [0, 0, 0, 1, 1, 1], [0], [0]>} : vector<4x8x8xf32>, vector<4x16x8xf32>, vector<4x8x16xf32> -> vector<4x8x16xf32>
    "tpu.trace_stop"() : () -> ()
    %185 = vector.shape_cast %5 : vector<1x16xf32> to vector<1x1x16xf32>
    %186 = vector.broadcast %185 : vector<1x1x16xf32> to vector<4x8x16xf32>
    %187 = arith.addf %184, %186 : vector<4x8x16xf32>
    %cst_68 = arith.constant dense<0xFF800000> : vector<4x8xf32>
    %188 = vector.multi_reduction <maximumf>, %187, %cst_68 [2] : vector<4x8x16xf32> to vector<4x8xf32>
    %189 = vector.shape_cast %188 : vector<4x8xf32> to vector<4x8x1xf32>
    %190 = vector.broadcast %189 : vector<4x8x1xf32> to vector<4x8x16xf32>
    %191 = arith.subf %187, %190 : vector<4x8x16xf32>
    %192 = math.exp %191 : vector<4x8x16xf32>
    %cst_69 = arith.constant dense<0.000000e+00> : vector<4x8xf32>
    %193 = vector.multi_reduction <add>, %192, %cst_69 [2] : vector<4x8x16xf32> to vector<4x8xf32>
    %194 = vector.shape_cast %193 : vector<4x8xf32> to vector<4x8x1xf32>
    %195 = tpu.reciprocal %194 {approx = true} : vector<4x8x1xf32> -> vector<4x8x1xf32>
    %196 = vector.broadcast %195 : vector<4x8x1xf32> to vector<4x8x16xf32>
    %197 = arith.mulf %192, %196 : vector<4x8x16xf32>
    "tpu.trace_start"() <{level = 10 : i32, message = "hts,hsk->htk"}> : () -> ()
    %cst_70 = arith.constant dense<0.000000e+00> : vector<4x8x8xf32>
    %198 = tpu.matmul %197, %183, %cst_70 {dimension_numbers = #tpu.dot_dimension_numbers<[2], [1], [1], [2], [0, 0, 0, 1, 1, 2], [0], [0]>} : vector<4x8x16xf32>, vector<4x16x8xf32>, vector<4x8x8xf32> -> vector<4x8x8xf32>
    "tpu.trace_stop"() : () -> ()
    %199 = vector.extract_strided_slice %198 {offsets = [0, 0, 0], sizes = [1, 8, 8], strides = [1, 1, 1]} : vector<4x8x8xf32> to vector<1x8x8xf32>
    %200 = vector.shape_cast %199 : vector<1x8x8xf32> to vector<8x8xf32>
    %201 = vector.extract_strided_slice %198 {offsets = [1, 0, 0], sizes = [1, 8, 8], strides = [1, 1, 1]} : vector<4x8x8xf32> to vector<1x8x8xf32>
    %202 = vector.shape_cast %201 : vector<1x8x8xf32> to vector<8x8xf32>
    %203 = vector.extract_strided_slice %198 {offsets = [2, 0, 0], sizes = [1, 8, 8], strides = [1, 1, 1]} : vector<4x8x8xf32> to vector<1x8x8xf32>
    %204 = vector.shape_cast %203 : vector<1x8x8xf32> to vector<8x8xf32>
    %205 = vector.extract_strided_slice %198 {offsets = [3, 0, 0], sizes = [1, 8, 8], strides = [1, 1, 1]} : vector<4x8x8xf32> to vector<1x8x8xf32>
    %206 = vector.shape_cast %205 : vector<1x8x8xf32> to vector<8x8xf32>
    %207 = tpu.concatenate %200, %202, %204, %206 in 1 : vector<8x8xf32>, vector<8x8xf32>, vector<8x8xf32>, vector<8x8xf32> -> vector<8x32xf32>
    %cst_71 = arith.constant dense<0.000000e+00> : vector<8x32xf32>
    %208 = tpu.matmul %207, %153, %cst_71 {dimension_numbers = #tpu.dot_dimension_numbers<[1], [0], [0], [1], [0, 0, 1, 1], [], []>} : vector<8x32xf32>, vector<32x32xf32>, vector<8x32xf32> -> vector<8x32xf32>
    %209 = vector.broadcast %156 : vector<1x32xf32> to vector<8x32xf32>
    %210 = arith.addf %208, %209 : vector<8x32xf32>
    %211 = arith.addf %107, %210 : vector<8x32xf32>
    %cst_72 = arith.constant dense<0.000000e+00> : vector<8xf32>
    %212 = vector.multi_reduction <add>, %211, %cst_72 [1] : vector<8x32xf32> to vector<8xf32>
    %213 = vector.shape_cast %212 : vector<8xf32> to vector<8x1xf32>
    %cst_73 = arith.constant 3.200000e+01 : f32
    %214 = vector.broadcast %cst_73 : f32 to vector<8x1xf32>
    %215 = arith.divf %213, %214 : vector<8x1xf32>
    %216 = vector.broadcast %215 : vector<8x1xf32> to vector<8x32xf32>
    %217 = arith.subf %211, %216 : vector<8x32xf32>
    %218 = arith.mulf %217, %217 : vector<8x32xf32>
    %cst_74 = arith.constant dense<0.000000e+00> : vector<8xf32>
    %219 = vector.multi_reduction <add>, %218, %cst_74 [1] : vector<8x32xf32> to vector<8xf32>
    %220 = vector.shape_cast %219 : vector<8xf32> to vector<8x1xf32>
    %cst_75 = arith.constant 3.200000e+01 : f32
    %221 = vector.broadcast %cst_75 : f32 to vector<8x1xf32>
    %222 = arith.divf %220, %221 : vector<8x1xf32>
    %223 = vector.broadcast %215 : vector<8x1xf32> to vector<8x32xf32>
    %224 = arith.subf %211, %223 : vector<8x32xf32>
    %cst_76 = arith.constant 9.99999974E-6 : f32
    %225 = vector.broadcast %cst_76 : f32 to vector<8x1xf32>
    %226 = arith.addf %222, %225 : vector<8x1xf32>
    %227 = math.rsqrt %226 : vector<8x1xf32>
    %228 = vector.broadcast %227 : vector<8x1xf32> to vector<8x32xf32>
    %229 = arith.mulf %224, %228 : vector<8x32xf32>
    %c4 = arith.constant 4 : index
    %c0_77 = arith.constant 0 : index
    %c0_78 = arith.constant 0 : index
    %230 = vector.load %arg6[%c4, %c0_77, %c0_78] : memref<26x1x128xf32, #tpu.memory_space<vmem>>, vector<1x1x128xf32>
    %231 = vector.shape_cast %230 : vector<1x1x128xf32> to vector<1x128xf32>
    %232 = vector.extract_strided_slice %231 {offsets = [0, 0], sizes = [1, 32], strides = [1, 1]} : vector<1x128xf32> to vector<1x32xf32>
    %233 = vector.broadcast %232 : vector<1x32xf32> to vector<8x32xf32>
    %234 = arith.mulf %229, %233 : vector<8x32xf32>
    %c5 = arith.constant 5 : index
    %c0_79 = arith.constant 0 : index
    %c0_80 = arith.constant 0 : index
    %235 = vector.load %arg6[%c5, %c0_79, %c0_80] : memref<26x1x128xf32, #tpu.memory_space<vmem>>, vector<1x1x128xf32>
    %236 = vector.shape_cast %235 : vector<1x1x128xf32> to vector<1x128xf32>
    %237 = vector.extract_strided_slice %236 {offsets = [0, 0], sizes = [1, 32], strides = [1, 1]} : vector<1x128xf32> to vector<1x32xf32>
    %238 = vector.broadcast %237 : vector<1x32xf32> to vector<8x32xf32>
    %239 = arith.addf %234, %238 : vector<8x32xf32>
    %c0_81 = arith.constant 0 : index
    %c0_82 = arith.constant 0 : index
    %c0_83 = arith.constant 0 : index
    %240 = vector.load %arg7[%c0_81, %c0_82, %c0_83] : memref<2x32x64xf32, #tpu.memory_space<vmem>>, vector<1x32x64xf32>
    %241 = vector.shape_cast %240 : vector<1x32x64xf32> to vector<32x64xf32>
    %cst_84 = arith.constant dense<0.000000e+00> : vector<8x64xf32>
    %242 = tpu.matmul %239, %241, %cst_84 {dimension_numbers = #tpu.dot_dimension_numbers<[1], [0], [0], [1], [0, 0, 1, 1], [], []>} : vector<8x32xf32>, vector<32x64xf32>, vector<8x64xf32> -> vector<8x64xf32>
    %c10 = arith.constant 10 : index
    %c0_85 = arith.constant 0 : index
    %c0_86 = arith.constant 0 : index
    %243 = vector.load %arg6[%c10, %c0_85, %c0_86] : memref<26x1x128xf32, #tpu.memory_space<vmem>>, vector<1x1x128xf32>
    %244 = vector.shape_cast %243 : vector<1x1x128xf32> to vector<1x128xf32>
    %245 = vector.extract_strided_slice %244 {offsets = [0, 0], sizes = [1, 64], strides = [1, 1]} : vector<1x128xf32> to vector<1x64xf32>
    %246 = vector.broadcast %245 : vector<1x64xf32> to vector<8x64xf32>
    %247 = arith.addf %242, %246 : vector<8x64xf32>
    %cst_87 = arith.constant 0.000000e+00 : f32
    %248 = vector.broadcast %cst_87 : f32 to vector<8x64xf32>
    %249 = arith.maximumf %247, %248 : vector<8x64xf32>
    %c0_88 = arith.constant 0 : index
    %c0_89 = arith.constant 0 : index
    %c0_90 = arith.constant 0 : index
    %250 = vector.load %arg8[%c0_88, %c0_89, %c0_90] : memref<2x64x32xf32, #tpu.memory_space<vmem>>, vector<1x64x32xf32>
    %251 = vector.shape_cast %250 : vector<1x64x32xf32> to vector<64x32xf32>
    %cst_91 = arith.constant dense<0.000000e+00> : vector<8x32xf32>
    %252 = tpu.matmul %249, %251, %cst_91 {dimension_numbers = #tpu.dot_dimension_numbers<[1], [0], [0], [1], [0, 0, 1, 1], [], []>} : vector<8x64xf32>, vector<64x32xf32>, vector<8x32xf32> -> vector<8x32xf32>
    %c11 = arith.constant 11 : index
    %c0_92 = arith.constant 0 : index
    %c0_93 = arith.constant 0 : index
    %253 = vector.load %arg6[%c11, %c0_92, %c0_93] : memref<26x1x128xf32, #tpu.memory_space<vmem>>, vector<1x1x128xf32>
    %254 = vector.shape_cast %253 : vector<1x1x128xf32> to vector<1x128xf32>
    %255 = vector.extract_strided_slice %254 {offsets = [0, 0], sizes = [1, 32], strides = [1, 1]} : vector<1x128xf32> to vector<1x32xf32>
    %256 = vector.broadcast %255 : vector<1x32xf32> to vector<8x32xf32>
    %257 = arith.addf %252, %256 : vector<8x32xf32>
    %258 = arith.addf %211, %257 : vector<8x32xf32>
    %cst_94 = arith.constant dense<0.000000e+00> : vector<8xf32>
    %259 = vector.multi_reduction <add>, %258, %cst_94 [1] : vector<8x32xf32> to vector<8xf32>
    %260 = vector.shape_cast %259 : vector<8xf32> to vector<8x1xf32>
    %cst_95 = arith.constant 3.200000e+01 : f32
    %261 = vector.broadcast %cst_95 : f32 to vector<8x1xf32>
    %262 = arith.divf %260, %261 : vector<8x1xf32>
    %263 = vector.broadcast %262 : vector<8x1xf32> to vector<8x32xf32>
    %264 = arith.subf %258, %263 : vector<8x32xf32>
    %265 = arith.mulf %264, %264 : vector<8x32xf32>
    %cst_96 = arith.constant dense<0.000000e+00> : vector<8xf32>
    %266 = vector.multi_reduction <add>, %265, %cst_96 [1] : vector<8x32xf32> to vector<8xf32>
    %267 = vector.shape_cast %266 : vector<8xf32> to vector<8x1xf32>
    %cst_97 = arith.constant 3.200000e+01 : f32
    %268 = vector.broadcast %cst_97 : f32 to vector<8x1xf32>
    %269 = arith.divf %267, %268 : vector<8x1xf32>
    %270 = vector.broadcast %262 : vector<8x1xf32> to vector<8x32xf32>
    %271 = arith.subf %258, %270 : vector<8x32xf32>
    %cst_98 = arith.constant 9.99999974E-6 : f32
    %272 = vector.broadcast %cst_98 : f32 to vector<8x1xf32>
    %273 = arith.addf %269, %272 : vector<8x1xf32>
    %274 = math.rsqrt %273 : vector<8x1xf32>
    %275 = vector.broadcast %274 : vector<8x1xf32> to vector<8x32xf32>
    %276 = arith.mulf %271, %275 : vector<8x32xf32>
    %c12 = arith.constant 12 : index
    %c0_99 = arith.constant 0 : index
    %c0_100 = arith.constant 0 : index
    %277 = vector.load %arg6[%c12, %c0_99, %c0_100] : memref<26x1x128xf32, #tpu.memory_space<vmem>>, vector<1x1x128xf32>
    %278 = vector.shape_cast %277 : vector<1x1x128xf32> to vector<1x128xf32>
    %279 = vector.extract_strided_slice %278 {offsets = [0, 0], sizes = [1, 32], strides = [1, 1]} : vector<1x128xf32> to vector<1x32xf32>
    %280 = vector.broadcast %279 : vector<1x32xf32> to vector<8x32xf32>
    %281 = arith.mulf %276, %280 : vector<8x32xf32>
    %c13 = arith.constant 13 : index
    %c0_101 = arith.constant 0 : index
    %c0_102 = arith.constant 0 : index
    %282 = vector.load %arg6[%c13, %c0_101, %c0_102] : memref<26x1x128xf32, #tpu.memory_space<vmem>>, vector<1x1x128xf32>
    %283 = vector.shape_cast %282 : vector<1x1x128xf32> to vector<1x128xf32>
    %284 = vector.extract_strided_slice %283 {offsets = [0, 0], sizes = [1, 32], strides = [1, 1]} : vector<1x128xf32> to vector<1x32xf32>
    %285 = vector.broadcast %284 : vector<1x32xf32> to vector<8x32xf32>
    %286 = arith.addf %281, %285 : vector<8x32xf32>
    %c1_103 = arith.constant 1 : index
    %c0_104 = arith.constant 0 : index
    %c0_105 = arith.constant 0 : index
    %c0_106 = arith.constant 0 : index
    %287 = vector.load %arg4[%c1_103, %c0_104, %c0_105, %c0_106] : memref<2x2x32x96xf32, #tpu.memory_space<vmem>>, vector<1x1x32x96xf32>
    %288 = vector.shape_cast %287 : vector<1x1x32x96xf32> to vector<32x96xf32>
    %cst_107 = arith.constant dense<0.000000e+00> : vector<8x96xf32>
    %289 = tpu.matmul %286, %288, %cst_107 {dimension_numbers = #tpu.dot_dimension_numbers<[1], [0], [0], [1], [0, 0, 1, 1], [], []>} : vector<8x32xf32>, vector<32x96xf32>, vector<8x96xf32> -> vector<8x96xf32>
    %c18 = arith.constant 18 : index
    %c0_108 = arith.constant 0 : index
    %c0_109 = arith.constant 0 : index
    %290 = vector.load %arg6[%c18, %c0_108, %c0_109] : memref<26x1x128xf32, #tpu.memory_space<vmem>>, vector<1x1x128xf32>
    %291 = vector.shape_cast %290 : vector<1x1x128xf32> to vector<1x128xf32>
    %292 = vector.extract_strided_slice %291 {offsets = [0, 0], sizes = [1, 96], strides = [1, 1]} : vector<1x128xf32> to vector<1x96xf32>
    %293 = vector.broadcast %292 : vector<1x96xf32> to vector<8x96xf32>
    %294 = arith.addf %289, %293 : vector<8x96xf32>
    %c1_110 = arith.constant 1 : index
    %c0_111 = arith.constant 0 : index
    %c0_112 = arith.constant 0 : index
    %c0_113 = arith.constant 0 : index
    %295 = vector.load %arg5[%c1_110, %c0_111, %c0_112, %c0_113] : memref<2x2x32x32xf32, #tpu.memory_space<vmem>>, vector<1x1x32x32xf32>
    %296 = vector.shape_cast %295 : vector<1x1x32x32xf32> to vector<32x32xf32>
    %c19 = arith.constant 19 : index
    %c0_114 = arith.constant 0 : index
    %c0_115 = arith.constant 0 : index
    %297 = vector.load %arg6[%c19, %c0_114, %c0_115] : memref<26x1x128xf32, #tpu.memory_space<vmem>>, vector<1x1x128xf32>
    %298 = vector.shape_cast %297 : vector<1x1x128xf32> to vector<1x128xf32>
    %299 = vector.extract_strided_slice %298 {offsets = [0, 0], sizes = [1, 32], strides = [1, 1]} : vector<1x128xf32> to vector<1x32xf32>
    %300 = vector.extract_strided_slice %294 {offsets = [0, 0], sizes = [8, 8], strides = [1, 1]} : vector<8x96xf32> to vector<8x8xf32>
    %301 = vector.extract_strided_slice %294 {offsets = [0, 8], sizes = [8, 8], strides = [1, 1]} : vector<8x96xf32> to vector<8x8xf32>
    %302 = vector.extract_strided_slice %294 {offsets = [0, 16], sizes = [8, 8], strides = [1, 1]} : vector<8x96xf32> to vector<8x8xf32>
    %303 = vector.extract_strided_slice %294 {offsets = [0, 24], sizes = [8, 8], strides = [1, 1]} : vector<8x96xf32> to vector<8x8xf32>
    %304 = vector.shape_cast %300 : vector<8x8xf32> to vector<1x8x8xf32>
    %305 = vector.shape_cast %301 : vector<8x8xf32> to vector<1x8x8xf32>
    %306 = vector.shape_cast %302 : vector<8x8xf32> to vector<1x8x8xf32>
    %307 = vector.shape_cast %303 : vector<8x8xf32> to vector<1x8x8xf32>
    %308 = tpu.concatenate %304, %305, %306, %307 in 0 : vector<1x8x8xf32>, vector<1x8x8xf32>, vector<1x8x8xf32>, vector<1x8x8xf32> -> vector<4x8x8xf32>
    %309 = vector.extract_strided_slice %294 {offsets = [0, 32], sizes = [8, 8], strides = [1, 1]} : vector<8x96xf32> to vector<8x8xf32>
    %310 = vector.extract_strided_slice %294 {offsets = [0, 40], sizes = [8, 8], strides = [1, 1]} : vector<8x96xf32> to vector<8x8xf32>
    %311 = vector.extract_strided_slice %294 {offsets = [0, 48], sizes = [8, 8], strides = [1, 1]} : vector<8x96xf32> to vector<8x8xf32>
    %312 = vector.extract_strided_slice %294 {offsets = [0, 56], sizes = [8, 8], strides = [1, 1]} : vector<8x96xf32> to vector<8x8xf32>
    %313 = vector.shape_cast %309 : vector<8x8xf32> to vector<1x8x8xf32>
    %314 = vector.shape_cast %310 : vector<8x8xf32> to vector<1x8x8xf32>
    %315 = vector.shape_cast %311 : vector<8x8xf32> to vector<1x8x8xf32>
    %316 = vector.shape_cast %312 : vector<8x8xf32> to vector<1x8x8xf32>
    %317 = tpu.concatenate %313, %314, %315, %316 in 0 : vector<1x8x8xf32>, vector<1x8x8xf32>, vector<1x8x8xf32>, vector<1x8x8xf32> -> vector<4x8x8xf32>
    %318 = vector.extract_strided_slice %294 {offsets = [0, 64], sizes = [8, 8], strides = [1, 1]} : vector<8x96xf32> to vector<8x8xf32>
    %319 = vector.extract_strided_slice %294 {offsets = [0, 72], sizes = [8, 8], strides = [1, 1]} : vector<8x96xf32> to vector<8x8xf32>
    %320 = vector.extract_strided_slice %294 {offsets = [0, 80], sizes = [8, 8], strides = [1, 1]} : vector<8x96xf32> to vector<8x8xf32>
    %321 = vector.extract_strided_slice %294 {offsets = [0, 88], sizes = [8, 8], strides = [1, 1]} : vector<8x96xf32> to vector<8x8xf32>
    %322 = vector.shape_cast %318 : vector<8x8xf32> to vector<1x8x8xf32>
    %323 = vector.shape_cast %319 : vector<8x8xf32> to vector<1x8x8xf32>
    %324 = vector.shape_cast %320 : vector<8x8xf32> to vector<1x8x8xf32>
    %325 = vector.shape_cast %321 : vector<8x8xf32> to vector<1x8x8xf32>
    %326 = tpu.concatenate %322, %323, %324, %325 in 0 : vector<1x8x8xf32>, vector<1x8x8xf32>, vector<1x8x8xf32>, vector<1x8x8xf32> -> vector<4x8x8xf32>
    "tpu.trace_start"() <{level = 10 : i32, message = "htk,hsk->hts"}> : () -> ()
    %cst_116 = arith.constant dense<0.000000e+00> : vector<4x8x8xf32>
    %327 = tpu.matmul %308, %317, %cst_116 {dimension_numbers = #tpu.dot_dimension_numbers<[2], [2], [1], [1], [0, 0, 0, 1, 1, 1], [0], [0]>} : vector<4x8x8xf32>, vector<4x8x8xf32>, vector<4x8x8xf32> -> vector<4x8x8xf32>
    "tpu.trace_stop"() : () -> ()
    %328 = vector.shape_cast %11 : vector<8x8xf32> to vector<1x8x8xf32>
    %329 = vector.broadcast %328 : vector<1x8x8xf32> to vector<4x8x8xf32>
    %330 = arith.addf %327, %329 : vector<4x8x8xf32>
    %cst_117 = arith.constant dense<0xFF800000> : vector<4x8xf32>
    %331 = vector.multi_reduction <maximumf>, %330, %cst_117 [2] : vector<4x8x8xf32> to vector<4x8xf32>
    %332 = vector.shape_cast %331 : vector<4x8xf32> to vector<4x8x1xf32>
    %333 = vector.broadcast %332 : vector<4x8x1xf32> to vector<4x8x8xf32>
    %334 = arith.subf %330, %333 : vector<4x8x8xf32>
    %335 = math.exp %334 : vector<4x8x8xf32>
    %cst_118 = arith.constant dense<0.000000e+00> : vector<4x8xf32>
    %336 = vector.multi_reduction <add>, %335, %cst_118 [2] : vector<4x8x8xf32> to vector<4x8xf32>
    %337 = vector.shape_cast %336 : vector<4x8xf32> to vector<4x8x1xf32>
    %338 = tpu.reciprocal %337 {approx = true} : vector<4x8x1xf32> -> vector<4x8x1xf32>
    %339 = vector.broadcast %338 : vector<4x8x1xf32> to vector<4x8x8xf32>
    %340 = arith.mulf %335, %339 : vector<4x8x8xf32>
    "tpu.trace_start"() <{level = 10 : i32, message = "hts,hsk->htk"}> : () -> ()
    %cst_119 = arith.constant dense<0.000000e+00> : vector<4x8x8xf32>
    %341 = tpu.matmul %340, %326, %cst_119 {dimension_numbers = #tpu.dot_dimension_numbers<[2], [1], [1], [2], [0, 0, 0, 1, 1, 2], [0], [0]>} : vector<4x8x8xf32>, vector<4x8x8xf32>, vector<4x8x8xf32> -> vector<4x8x8xf32>
    "tpu.trace_stop"() : () -> ()
    %342 = vector.extract_strided_slice %341 {offsets = [0, 0, 0], sizes = [1, 8, 8], strides = [1, 1, 1]} : vector<4x8x8xf32> to vector<1x8x8xf32>
    %343 = vector.shape_cast %342 : vector<1x8x8xf32> to vector<8x8xf32>
    %344 = vector.extract_strided_slice %341 {offsets = [1, 0, 0], sizes = [1, 8, 8], strides = [1, 1, 1]} : vector<4x8x8xf32> to vector<1x8x8xf32>
    %345 = vector.shape_cast %344 : vector<1x8x8xf32> to vector<8x8xf32>
    %346 = vector.extract_strided_slice %341 {offsets = [2, 0, 0], sizes = [1, 8, 8], strides = [1, 1, 1]} : vector<4x8x8xf32> to vector<1x8x8xf32>
    %347 = vector.shape_cast %346 : vector<1x8x8xf32> to vector<8x8xf32>
    %348 = vector.extract_strided_slice %341 {offsets = [3, 0, 0], sizes = [1, 8, 8], strides = [1, 1, 1]} : vector<4x8x8xf32> to vector<1x8x8xf32>
    %349 = vector.shape_cast %348 : vector<1x8x8xf32> to vector<8x8xf32>
    %350 = tpu.concatenate %343, %345, %347, %349 in 1 : vector<8x8xf32>, vector<8x8xf32>, vector<8x8xf32>, vector<8x8xf32> -> vector<8x32xf32>
    %cst_120 = arith.constant dense<0.000000e+00> : vector<8x32xf32>
    %351 = tpu.matmul %350, %296, %cst_120 {dimension_numbers = #tpu.dot_dimension_numbers<[1], [0], [0], [1], [0, 0, 1, 1], [], []>} : vector<8x32xf32>, vector<32x32xf32>, vector<8x32xf32> -> vector<8x32xf32>
    %352 = vector.broadcast %299 : vector<1x32xf32> to vector<8x32xf32>
    %353 = arith.addf %351, %352 : vector<8x32xf32>
    %354 = arith.addf %258, %353 : vector<8x32xf32>
    %cst_121 = arith.constant dense<0.000000e+00> : vector<8xf32>
    %355 = vector.multi_reduction <add>, %354, %cst_121 [1] : vector<8x32xf32> to vector<8xf32>
    %356 = vector.shape_cast %355 : vector<8xf32> to vector<8x1xf32>
    %cst_122 = arith.constant 3.200000e+01 : f32
    %357 = vector.broadcast %cst_122 : f32 to vector<8x1xf32>
    %358 = arith.divf %356, %357 : vector<8x1xf32>
    %359 = vector.broadcast %358 : vector<8x1xf32> to vector<8x32xf32>
    %360 = arith.subf %354, %359 : vector<8x32xf32>
    %361 = arith.mulf %360, %360 : vector<8x32xf32>
    %cst_123 = arith.constant dense<0.000000e+00> : vector<8xf32>
    %362 = vector.multi_reduction <add>, %361, %cst_123 [1] : vector<8x32xf32> to vector<8xf32>
    %363 = vector.shape_cast %362 : vector<8xf32> to vector<8x1xf32>
    %cst_124 = arith.constant 3.200000e+01 : f32
    %364 = vector.broadcast %cst_124 : f32 to vector<8x1xf32>
    %365 = arith.divf %363, %364 : vector<8x1xf32>
    %366 = vector.broadcast %358 : vector<8x1xf32> to vector<8x32xf32>
    %367 = arith.subf %354, %366 : vector<8x32xf32>
    %cst_125 = arith.constant 9.99999974E-6 : f32
    %368 = vector.broadcast %cst_125 : f32 to vector<8x1xf32>
    %369 = arith.addf %365, %368 : vector<8x1xf32>
    %370 = math.rsqrt %369 : vector<8x1xf32>
    %371 = vector.broadcast %370 : vector<8x1xf32> to vector<8x32xf32>
    %372 = arith.mulf %367, %371 : vector<8x32xf32>
    %c14 = arith.constant 14 : index
    %c0_126 = arith.constant 0 : index
    %c0_127 = arith.constant 0 : index
    %373 = vector.load %arg6[%c14, %c0_126, %c0_127] : memref<26x1x128xf32, #tpu.memory_space<vmem>>, vector<1x1x128xf32>
    %374 = vector.shape_cast %373 : vector<1x1x128xf32> to vector<1x128xf32>
    %375 = vector.extract_strided_slice %374 {offsets = [0, 0], sizes = [1, 32], strides = [1, 1]} : vector<1x128xf32> to vector<1x32xf32>
    %376 = vector.broadcast %375 : vector<1x32xf32> to vector<8x32xf32>
    %377 = arith.mulf %372, %376 : vector<8x32xf32>
    %c15 = arith.constant 15 : index
    %c0_128 = arith.constant 0 : index
    %c0_129 = arith.constant 0 : index
    %378 = vector.load %arg6[%c15, %c0_128, %c0_129] : memref<26x1x128xf32, #tpu.memory_space<vmem>>, vector<1x1x128xf32>
    %379 = vector.shape_cast %378 : vector<1x1x128xf32> to vector<1x128xf32>
    %380 = vector.extract_strided_slice %379 {offsets = [0, 0], sizes = [1, 32], strides = [1, 1]} : vector<1x128xf32> to vector<1x32xf32>
    %381 = vector.broadcast %380 : vector<1x32xf32> to vector<8x32xf32>
    %382 = arith.addf %377, %381 : vector<8x32xf32>
    %c1_130 = arith.constant 1 : index
    %c1_131 = arith.constant 1 : index
    %c0_132 = arith.constant 0 : index
    %c0_133 = arith.constant 0 : index
    %383 = vector.load %arg4[%c1_130, %c1_131, %c0_132, %c0_133] : memref<2x2x32x96xf32, #tpu.memory_space<vmem>>, vector<1x1x32x96xf32>
    %384 = vector.shape_cast %383 : vector<1x1x32x96xf32> to vector<32x96xf32>
    %cst_134 = arith.constant dense<0.000000e+00> : vector<8x96xf32>
    %385 = tpu.matmul %382, %384, %cst_134 {dimension_numbers = #tpu.dot_dimension_numbers<[1], [0], [0], [1], [0, 0, 1, 1], [], []>} : vector<8x32xf32>, vector<32x96xf32>, vector<8x96xf32> -> vector<8x96xf32>
    %c20 = arith.constant 20 : index
    %c0_135 = arith.constant 0 : index
    %c0_136 = arith.constant 0 : index
    %386 = vector.load %arg6[%c20, %c0_135, %c0_136] : memref<26x1x128xf32, #tpu.memory_space<vmem>>, vector<1x1x128xf32>
    %387 = vector.shape_cast %386 : vector<1x1x128xf32> to vector<1x128xf32>
    %388 = vector.extract_strided_slice %387 {offsets = [0, 0], sizes = [1, 96], strides = [1, 1]} : vector<1x128xf32> to vector<1x96xf32>
    %389 = vector.broadcast %388 : vector<1x96xf32> to vector<8x96xf32>
    %390 = arith.addf %385, %389 : vector<8x96xf32>
    %c1_137 = arith.constant 1 : index
    %c1_138 = arith.constant 1 : index
    %c0_139 = arith.constant 0 : index
    %c0_140 = arith.constant 0 : index
    %391 = vector.load %arg4[%c1_137, %c1_138, %c0_139, %c0_140] : memref<2x2x32x96xf32, #tpu.memory_space<vmem>>, vector<1x1x32x96xf32>
    %392 = vector.shape_cast %391 : vector<1x1x32x96xf32> to vector<32x96xf32>
    %cst_141 = arith.constant dense<0.000000e+00> : vector<16x96xf32>
    %393 = tpu.matmul %3, %392, %cst_141 {dimension_numbers = #tpu.dot_dimension_numbers<[1], [0], [0], [1], [0, 0, 1, 1], [], []>} : vector<16x32xf32>, vector<32x96xf32>, vector<16x96xf32> -> vector<16x96xf32>
    %c20_142 = arith.constant 20 : index
    %c0_143 = arith.constant 0 : index
    %c0_144 = arith.constant 0 : index
    %394 = vector.load %arg6[%c20_142, %c0_143, %c0_144] : memref<26x1x128xf32, #tpu.memory_space<vmem>>, vector<1x1x128xf32>
    %395 = vector.shape_cast %394 : vector<1x1x128xf32> to vector<1x128xf32>
    %396 = vector.extract_strided_slice %395 {offsets = [0, 0], sizes = [1, 96], strides = [1, 1]} : vector<1x128xf32> to vector<1x96xf32>
    %397 = vector.broadcast %396 : vector<1x96xf32> to vector<16x96xf32>
    %398 = arith.addf %393, %397 : vector<16x96xf32>
    %c1_145 = arith.constant 1 : index
    %c1_146 = arith.constant 1 : index
    %c0_147 = arith.constant 0 : index
    %c0_148 = arith.constant 0 : index
    %399 = vector.load %arg5[%c1_145, %c1_146, %c0_147, %c0_148] : memref<2x2x32x32xf32, #tpu.memory_space<vmem>>, vector<1x1x32x32xf32>
    %400 = vector.shape_cast %399 : vector<1x1x32x32xf32> to vector<32x32xf32>
    %c21 = arith.constant 21 : index
    %c0_149 = arith.constant 0 : index
    %c0_150 = arith.constant 0 : index
    %401 = vector.load %arg6[%c21, %c0_149, %c0_150] : memref<26x1x128xf32, #tpu.memory_space<vmem>>, vector<1x1x128xf32>
    %402 = vector.shape_cast %401 : vector<1x1x128xf32> to vector<1x128xf32>
    %403 = vector.extract_strided_slice %402 {offsets = [0, 0], sizes = [1, 32], strides = [1, 1]} : vector<1x128xf32> to vector<1x32xf32>
    %404 = vector.extract_strided_slice %390 {offsets = [0, 0], sizes = [8, 8], strides = [1, 1]} : vector<8x96xf32> to vector<8x8xf32>
    %405 = vector.extract_strided_slice %390 {offsets = [0, 8], sizes = [8, 8], strides = [1, 1]} : vector<8x96xf32> to vector<8x8xf32>
    %406 = vector.extract_strided_slice %390 {offsets = [0, 16], sizes = [8, 8], strides = [1, 1]} : vector<8x96xf32> to vector<8x8xf32>
    %407 = vector.extract_strided_slice %390 {offsets = [0, 24], sizes = [8, 8], strides = [1, 1]} : vector<8x96xf32> to vector<8x8xf32>
    %408 = vector.shape_cast %404 : vector<8x8xf32> to vector<1x8x8xf32>
    %409 = vector.shape_cast %405 : vector<8x8xf32> to vector<1x8x8xf32>
    %410 = vector.shape_cast %406 : vector<8x8xf32> to vector<1x8x8xf32>
    %411 = vector.shape_cast %407 : vector<8x8xf32> to vector<1x8x8xf32>
    %412 = tpu.concatenate %408, %409, %410, %411 in 0 : vector<1x8x8xf32>, vector<1x8x8xf32>, vector<1x8x8xf32>, vector<1x8x8xf32> -> vector<4x8x8xf32>
    %413 = vector.extract_strided_slice %398 {offsets = [0, 32], sizes = [16, 8], strides = [1, 1]} : vector<16x96xf32> to vector<16x8xf32>
    %414 = vector.extract_strided_slice %398 {offsets = [0, 40], sizes = [16, 8], strides = [1, 1]} : vector<16x96xf32> to vector<16x8xf32>
    %415 = vector.extract_strided_slice %398 {offsets = [0, 48], sizes = [16, 8], strides = [1, 1]} : vector<16x96xf32> to vector<16x8xf32>
    %416 = vector.extract_strided_slice %398 {offsets = [0, 56], sizes = [16, 8], strides = [1, 1]} : vector<16x96xf32> to vector<16x8xf32>
    %417 = vector.shape_cast %413 : vector<16x8xf32> to vector<1x16x8xf32>
    %418 = vector.shape_cast %414 : vector<16x8xf32> to vector<1x16x8xf32>
    %419 = vector.shape_cast %415 : vector<16x8xf32> to vector<1x16x8xf32>
    %420 = vector.shape_cast %416 : vector<16x8xf32> to vector<1x16x8xf32>
    %421 = tpu.concatenate %417, %418, %419, %420 in 0 : vector<1x16x8xf32>, vector<1x16x8xf32>, vector<1x16x8xf32>, vector<1x16x8xf32> -> vector<4x16x8xf32>
    %422 = vector.extract_strided_slice %398 {offsets = [0, 64], sizes = [16, 8], strides = [1, 1]} : vector<16x96xf32> to vector<16x8xf32>
    %423 = vector.extract_strided_slice %398 {offsets = [0, 72], sizes = [16, 8], strides = [1, 1]} : vector<16x96xf32> to vector<16x8xf32>
    %424 = vector.extract_strided_slice %398 {offsets = [0, 80], sizes = [16, 8], strides = [1, 1]} : vector<16x96xf32> to vector<16x8xf32>
    %425 = vector.extract_strided_slice %398 {offsets = [0, 88], sizes = [16, 8], strides = [1, 1]} : vector<16x96xf32> to vector<16x8xf32>
    %426 = vector.shape_cast %422 : vector<16x8xf32> to vector<1x16x8xf32>
    %427 = vector.shape_cast %423 : vector<16x8xf32> to vector<1x16x8xf32>
    %428 = vector.shape_cast %424 : vector<16x8xf32> to vector<1x16x8xf32>
    %429 = vector.shape_cast %425 : vector<16x8xf32> to vector<1x16x8xf32>
    %430 = tpu.concatenate %426, %427, %428, %429 in 0 : vector<1x16x8xf32>, vector<1x16x8xf32>, vector<1x16x8xf32>, vector<1x16x8xf32> -> vector<4x16x8xf32>
    "tpu.trace_start"() <{level = 10 : i32, message = "htk,hsk->hts"}> : () -> ()
    %cst_151 = arith.constant dense<0.000000e+00> : vector<4x8x16xf32>
    %431 = tpu.matmul %412, %421, %cst_151 {dimension_numbers = #tpu.dot_dimension_numbers<[2], [2], [1], [1], [0, 0, 0, 1, 1, 1], [0], [0]>} : vector<4x8x8xf32>, vector<4x16x8xf32>, vector<4x8x16xf32> -> vector<4x8x16xf32>
    "tpu.trace_stop"() : () -> ()
    %432 = vector.shape_cast %5 : vector<1x16xf32> to vector<1x1x16xf32>
    %433 = vector.broadcast %432 : vector<1x1x16xf32> to vector<4x8x16xf32>
    %434 = arith.addf %431, %433 : vector<4x8x16xf32>
    %cst_152 = arith.constant dense<0xFF800000> : vector<4x8xf32>
    %435 = vector.multi_reduction <maximumf>, %434, %cst_152 [2] : vector<4x8x16xf32> to vector<4x8xf32>
    %436 = vector.shape_cast %435 : vector<4x8xf32> to vector<4x8x1xf32>
    %437 = vector.broadcast %436 : vector<4x8x1xf32> to vector<4x8x16xf32>
    %438 = arith.subf %434, %437 : vector<4x8x16xf32>
    %439 = math.exp %438 : vector<4x8x16xf32>
    %cst_153 = arith.constant dense<0.000000e+00> : vector<4x8xf32>
    %440 = vector.multi_reduction <add>, %439, %cst_153 [2] : vector<4x8x16xf32> to vector<4x8xf32>
    %441 = vector.shape_cast %440 : vector<4x8xf32> to vector<4x8x1xf32>
    %442 = tpu.reciprocal %441 {approx = true} : vector<4x8x1xf32> -> vector<4x8x1xf32>
    %443 = vector.broadcast %442 : vector<4x8x1xf32> to vector<4x8x16xf32>
    %444 = arith.mulf %439, %443 : vector<4x8x16xf32>
    "tpu.trace_start"() <{level = 10 : i32, message = "hts,hsk->htk"}> : () -> ()
    %cst_154 = arith.constant dense<0.000000e+00> : vector<4x8x8xf32>
    %445 = tpu.matmul %444, %430, %cst_154 {dimension_numbers = #tpu.dot_dimension_numbers<[2], [1], [1], [2], [0, 0, 0, 1, 1, 2], [0], [0]>} : vector<4x8x16xf32>, vector<4x16x8xf32>, vector<4x8x8xf32> -> vector<4x8x8xf32>
    "tpu.trace_stop"() : () -> ()
    %446 = vector.extract_strided_slice %445 {offsets = [0, 0, 0], sizes = [1, 8, 8], strides = [1, 1, 1]} : vector<4x8x8xf32> to vector<1x8x8xf32>
    %447 = vector.shape_cast %446 : vector<1x8x8xf32> to vector<8x8xf32>
    %448 = vector.extract_strided_slice %445 {offsets = [1, 0, 0], sizes = [1, 8, 8], strides = [1, 1, 1]} : vector<4x8x8xf32> to vector<1x8x8xf32>
    %449 = vector.shape_cast %448 : vector<1x8x8xf32> to vector<8x8xf32>
    %450 = vector.extract_strided_slice %445 {offsets = [2, 0, 0], sizes = [1, 8, 8], strides = [1, 1, 1]} : vector<4x8x8xf32> to vector<1x8x8xf32>
    %451 = vector.shape_cast %450 : vector<1x8x8xf32> to vector<8x8xf32>
    %452 = vector.extract_strided_slice %445 {offsets = [3, 0, 0], sizes = [1, 8, 8], strides = [1, 1, 1]} : vector<4x8x8xf32> to vector<1x8x8xf32>
    %453 = vector.shape_cast %452 : vector<1x8x8xf32> to vector<8x8xf32>
    %454 = tpu.concatenate %447, %449, %451, %453 in 1 : vector<8x8xf32>, vector<8x8xf32>, vector<8x8xf32>, vector<8x8xf32> -> vector<8x32xf32>
    %cst_155 = arith.constant dense<0.000000e+00> : vector<8x32xf32>
    %455 = tpu.matmul %454, %400, %cst_155 {dimension_numbers = #tpu.dot_dimension_numbers<[1], [0], [0], [1], [0, 0, 1, 1], [], []>} : vector<8x32xf32>, vector<32x32xf32>, vector<8x32xf32> -> vector<8x32xf32>
    %456 = vector.broadcast %403 : vector<1x32xf32> to vector<8x32xf32>
    %457 = arith.addf %455, %456 : vector<8x32xf32>
    %458 = arith.addf %354, %457 : vector<8x32xf32>
    %459 = vector.extract_strided_slice %444 {offsets = [0, 0, 0], sizes = [1, 8, 16], strides = [1, 1, 1]} : vector<4x8x16xf32> to vector<1x8x16xf32>
    %460 = vector.shape_cast %459 : vector<1x8x16xf32> to vector<8x16xf32>
    %cst_156 = arith.constant dense<0.000000e+00> : vector<8xf32>
    %461 = vector.multi_reduction <add>, %458, %cst_156 [1] : vector<8x32xf32> to vector<8xf32>
    %462 = vector.shape_cast %461 : vector<8xf32> to vector<8x1xf32>
    %cst_157 = arith.constant 3.200000e+01 : f32
    %463 = vector.broadcast %cst_157 : f32 to vector<8x1xf32>
    %464 = arith.divf %462, %463 : vector<8x1xf32>
    %465 = vector.broadcast %464 : vector<8x1xf32> to vector<8x32xf32>
    %466 = arith.subf %458, %465 : vector<8x32xf32>
    %467 = arith.mulf %466, %466 : vector<8x32xf32>
    %cst_158 = arith.constant dense<0.000000e+00> : vector<8xf32>
    %468 = vector.multi_reduction <add>, %467, %cst_158 [1] : vector<8x32xf32> to vector<8xf32>
    %469 = vector.shape_cast %468 : vector<8xf32> to vector<8x1xf32>
    %cst_159 = arith.constant 3.200000e+01 : f32
    %470 = vector.broadcast %cst_159 : f32 to vector<8x1xf32>
    %471 = arith.divf %469, %470 : vector<8x1xf32>
    %472 = vector.broadcast %464 : vector<8x1xf32> to vector<8x32xf32>
    %473 = arith.subf %458, %472 : vector<8x32xf32>
    %cst_160 = arith.constant 9.99999974E-6 : f32
    %474 = vector.broadcast %cst_160 : f32 to vector<8x1xf32>
    %475 = arith.addf %471, %474 : vector<8x1xf32>
    %476 = math.rsqrt %475 : vector<8x1xf32>
    %477 = vector.broadcast %476 : vector<8x1xf32> to vector<8x32xf32>
    %478 = arith.mulf %473, %477 : vector<8x32xf32>
    %c16 = arith.constant 16 : index
    %c0_161 = arith.constant 0 : index
    %c0_162 = arith.constant 0 : index
    %479 = vector.load %arg6[%c16, %c0_161, %c0_162] : memref<26x1x128xf32, #tpu.memory_space<vmem>>, vector<1x1x128xf32>
    %480 = vector.shape_cast %479 : vector<1x1x128xf32> to vector<1x128xf32>
    %481 = vector.extract_strided_slice %480 {offsets = [0, 0], sizes = [1, 32], strides = [1, 1]} : vector<1x128xf32> to vector<1x32xf32>
    %482 = vector.broadcast %481 : vector<1x32xf32> to vector<8x32xf32>
    %483 = arith.mulf %478, %482 : vector<8x32xf32>
    %c17 = arith.constant 17 : index
    %c0_163 = arith.constant 0 : index
    %c0_164 = arith.constant 0 : index
    %484 = vector.load %arg6[%c17, %c0_163, %c0_164] : memref<26x1x128xf32, #tpu.memory_space<vmem>>, vector<1x1x128xf32>
    %485 = vector.shape_cast %484 : vector<1x1x128xf32> to vector<1x128xf32>
    %486 = vector.extract_strided_slice %485 {offsets = [0, 0], sizes = [1, 32], strides = [1, 1]} : vector<1x128xf32> to vector<1x32xf32>
    %487 = vector.broadcast %486 : vector<1x32xf32> to vector<8x32xf32>
    %488 = arith.addf %483, %487 : vector<8x32xf32>
    %c1_165 = arith.constant 1 : index
    %c0_166 = arith.constant 0 : index
    %c0_167 = arith.constant 0 : index
    %489 = vector.load %arg7[%c1_165, %c0_166, %c0_167] : memref<2x32x64xf32, #tpu.memory_space<vmem>>, vector<1x32x64xf32>
    %490 = vector.shape_cast %489 : vector<1x32x64xf32> to vector<32x64xf32>
    %cst_168 = arith.constant dense<0.000000e+00> : vector<8x64xf32>
    %491 = tpu.matmul %488, %490, %cst_168 {dimension_numbers = #tpu.dot_dimension_numbers<[1], [0], [0], [1], [0, 0, 1, 1], [], []>} : vector<8x32xf32>, vector<32x64xf32>, vector<8x64xf32> -> vector<8x64xf32>
    %c22 = arith.constant 22 : index
    %c0_169 = arith.constant 0 : index
    %c0_170 = arith.constant 0 : index
    %492 = vector.load %arg6[%c22, %c0_169, %c0_170] : memref<26x1x128xf32, #tpu.memory_space<vmem>>, vector<1x1x128xf32>
    %493 = vector.shape_cast %492 : vector<1x1x128xf32> to vector<1x128xf32>
    %494 = vector.extract_strided_slice %493 {offsets = [0, 0], sizes = [1, 64], strides = [1, 1]} : vector<1x128xf32> to vector<1x64xf32>
    %495 = vector.broadcast %494 : vector<1x64xf32> to vector<8x64xf32>
    %496 = arith.addf %491, %495 : vector<8x64xf32>
    %cst_171 = arith.constant 0.000000e+00 : f32
    %497 = vector.broadcast %cst_171 : f32 to vector<8x64xf32>
    %498 = arith.maximumf %496, %497 : vector<8x64xf32>
    %c1_172 = arith.constant 1 : index
    %c0_173 = arith.constant 0 : index
    %c0_174 = arith.constant 0 : index
    %499 = vector.load %arg8[%c1_172, %c0_173, %c0_174] : memref<2x64x32xf32, #tpu.memory_space<vmem>>, vector<1x64x32xf32>
    %500 = vector.shape_cast %499 : vector<1x64x32xf32> to vector<64x32xf32>
    %cst_175 = arith.constant dense<0.000000e+00> : vector<8x32xf32>
    %501 = tpu.matmul %498, %500, %cst_175 {dimension_numbers = #tpu.dot_dimension_numbers<[1], [0], [0], [1], [0, 0, 1, 1], [], []>} : vector<8x64xf32>, vector<64x32xf32>, vector<8x32xf32> -> vector<8x32xf32>
    %c23 = arith.constant 23 : index
    %c0_176 = arith.constant 0 : index
    %c0_177 = arith.constant 0 : index
    %502 = vector.load %arg6[%c23, %c0_176, %c0_177] : memref<26x1x128xf32, #tpu.memory_space<vmem>>, vector<1x1x128xf32>
    %503 = vector.shape_cast %502 : vector<1x1x128xf32> to vector<1x128xf32>
    %504 = vector.extract_strided_slice %503 {offsets = [0, 0], sizes = [1, 32], strides = [1, 1]} : vector<1x128xf32> to vector<1x32xf32>
    %505 = vector.broadcast %504 : vector<1x32xf32> to vector<8x32xf32>
    %506 = arith.addf %501, %505 : vector<8x32xf32>
    %507 = arith.addf %458, %506 : vector<8x32xf32>
    %cst_178 = arith.constant dense<0.000000e+00> : vector<8xf32>
    %508 = vector.multi_reduction <add>, %507, %cst_178 [1] : vector<8x32xf32> to vector<8xf32>
    %509 = vector.shape_cast %508 : vector<8xf32> to vector<8x1xf32>
    %cst_179 = arith.constant 3.200000e+01 : f32
    %510 = vector.broadcast %cst_179 : f32 to vector<8x1xf32>
    %511 = arith.divf %509, %510 : vector<8x1xf32>
    %512 = vector.broadcast %511 : vector<8x1xf32> to vector<8x32xf32>
    %513 = arith.subf %507, %512 : vector<8x32xf32>
    %514 = arith.mulf %513, %513 : vector<8x32xf32>
    %cst_180 = arith.constant dense<0.000000e+00> : vector<8xf32>
    %515 = vector.multi_reduction <add>, %514, %cst_180 [1] : vector<8x32xf32> to vector<8xf32>
    %516 = vector.shape_cast %515 : vector<8xf32> to vector<8x1xf32>
    %cst_181 = arith.constant 3.200000e+01 : f32
    %517 = vector.broadcast %cst_181 : f32 to vector<8x1xf32>
    %518 = arith.divf %516, %517 : vector<8x1xf32>
    %519 = vector.broadcast %511 : vector<8x1xf32> to vector<8x32xf32>
    %520 = arith.subf %507, %519 : vector<8x32xf32>
    %cst_182 = arith.constant 9.99999974E-6 : f32
    %521 = vector.broadcast %cst_182 : f32 to vector<8x1xf32>
    %522 = arith.addf %518, %521 : vector<8x1xf32>
    %523 = math.rsqrt %522 : vector<8x1xf32>
    %524 = vector.broadcast %523 : vector<8x1xf32> to vector<8x32xf32>
    %525 = arith.mulf %520, %524 : vector<8x32xf32>
    %c24 = arith.constant 24 : index
    %c0_183 = arith.constant 0 : index
    %c0_184 = arith.constant 0 : index
    %526 = vector.load %arg6[%c24, %c0_183, %c0_184] : memref<26x1x128xf32, #tpu.memory_space<vmem>>, vector<1x1x128xf32>
    %527 = vector.shape_cast %526 : vector<1x1x128xf32> to vector<1x128xf32>
    %528 = vector.extract_strided_slice %527 {offsets = [0, 0], sizes = [1, 32], strides = [1, 1]} : vector<1x128xf32> to vector<1x32xf32>
    %529 = vector.broadcast %528 : vector<1x32xf32> to vector<8x32xf32>
    %530 = arith.mulf %525, %529 : vector<8x32xf32>
    %c25 = arith.constant 25 : index
    %c0_185 = arith.constant 0 : index
    %c0_186 = arith.constant 0 : index
    %531 = vector.load %arg6[%c25, %c0_185, %c0_186] : memref<26x1x128xf32, #tpu.memory_space<vmem>>, vector<1x1x128xf32>
    %532 = vector.shape_cast %531 : vector<1x1x128xf32> to vector<1x128xf32>
    %533 = vector.extract_strided_slice %532 {offsets = [0, 0], sizes = [1, 32], strides = [1, 1]} : vector<1x128xf32> to vector<1x32xf32>
    %534 = vector.broadcast %533 : vector<1x32xf32> to vector<8x32xf32>
    %535 = arith.addf %530, %534 : vector<8x32xf32>
    %c0_187 = arith.constant 0 : index
    %c0_188 = arith.constant 0 : index
    %536 = vector.load %arg9[%c0_187, %c0_188] : memref<32x128xf32, #tpu.memory_space<vmem>>, vector<32x128xf32>
    %cst_189 = arith.constant dense<0.000000e+00> : vector<8x128xf32>
    %537 = tpu.matmul %535, %536, %cst_189 {dimension_numbers = #tpu.dot_dimension_numbers<[1], [0], [0], [1], [0, 0, 1, 1], [], []>} : vector<8x32xf32>, vector<32x128xf32>, vector<8x128xf32> -> vector<8x128xf32>
    %c0_190 = arith.constant 0 : index
    %c0_191 = arith.constant 0 : index
    %538 = vector.load %arg10[%c0_190, %c0_191] : memref<1x128xf32, #tpu.memory_space<vmem>>, vector<1x128xf32>
    %539 = vector.broadcast %538 : vector<1x128xf32> to vector<8x128xf32>
    %540 = arith.addf %537, %539 : vector<8x128xf32>
    %cst_192 = arith.constant dense<0xFF800000> : vector<8xf32>
    %541 = vector.multi_reduction <maximumf>, %540, %cst_192 [1] : vector<8x128xf32> to vector<8xf32>
    %542 = vector.shape_cast %541 : vector<8xf32> to vector<8x1xf32>
    %543 = vector.broadcast %542 : vector<8x1xf32> to vector<8x128xf32>
    %544 = arith.subf %540, %543 : vector<8x128xf32>
    %545 = math.exp %544 : vector<8x128xf32>
    %cst_193 = arith.constant dense<0.000000e+00> : vector<8xf32>
    %546 = vector.multi_reduction <add>, %545, %cst_193 [1] : vector<8x128xf32> to vector<8xf32>
    %547 = vector.shape_cast %546 : vector<8xf32> to vector<8x1xf32>
    %548 = vector.broadcast %547 : vector<8x1xf32> to vector<8x128xf32>
    %549 = arith.divf %545, %548 : vector<8x128xf32>
    %c0_194 = arith.constant 0 : index
    %c0_195 = arith.constant 0 : index
    %c0_196 = arith.constant 0 : index
    %550 = vector.load %arg11[%c0_194, %c0_195, %c0_196] : memref<1x8x128xf32, #tpu.memory_space<vmem>>, vector<1x8x128xf32>
    %551 = vector.shape_cast %550 : vector<1x8x128xf32> to vector<8x128xf32>
    %552 = vector.shape_cast %549 : vector<8x128xf32> to vector<1x8x128xf32>
    tpu.vector_store %arg11[%c0_194, %c0_195, %c0_196], %552 {strides = array<i32>} : memref<1x8x128xf32, #tpu.memory_space<vmem>>, vector<1x8x128xf32>,
    %cst_197 = arith.constant 0.000000e+00 : f32
    %553 = vector.broadcast %cst_197 : f32 to vector<8x112xf32>
    %554 = tpu.concatenate %460, %553 in 1 : vector<8x16xf32>, vector<8x112xf32> -> vector<8x128xf32>
    %c0_198 = arith.constant 0 : index
    %c0_199 = arith.constant 0 : index
    %c0_200 = arith.constant 0 : index
    %555 = vector.load %arg12[%c0_198, %c0_199, %c0_200] : memref<1x8x128xf32, #tpu.memory_space<vmem>>, vector<1x8x128xf32>
    %556 = vector.shape_cast %555 : vector<1x8x128xf32> to vector<8x128xf32>
    %557 = vector.shape_cast %554 : vector<8x128xf32> to vector<1x8x128xf32>
    tpu.vector_store %arg12[%c0_198, %c0_199, %c0_200], %557 {strides = array<i32>} : memref<1x8x128xf32, #tpu.memory_space<vmem>>, vector<1x8x128xf32>,
    return
  }
  func.func @transform_0(%arg0: i32) -> (i32, i32, i32) {
    %c0_i32 = arith.constant 0 : i32
    %c0_i32_0 = arith.constant 0 : i32
    %c0_i32_1 = arith.constant 0 : i32
    return %arg0, %c0_i32, %c0_i32_0 : i32, i32, i32
  }
  func.func @transform_1(%arg0: i32) -> (i32, i32, i32) {
    %c0_i32 = arith.constant 0 : i32
    %c0_i32_0 = arith.constant 0 : i32
    %c0_i32_1 = arith.constant 0 : i32
    return %arg0, %c0_i32, %c0_i32_0 : i32, i32, i32
  }
  func.func @transform_2(%arg0: i32) -> (i32, i32, i32) {
    %c0_i32 = arith.constant 0 : i32
    %c0_i32_0 = arith.constant 0 : i32
    %c0_i32_1 = arith.constant 0 : i32
    return %arg0, %c0_i32, %c0_i32_0 : i32, i32, i32
  }
  func.func @transform_3(%arg0: i32) -> (i32, i32, i32, i32) {
    %c0_i32 = arith.constant 0 : i32
    %c0_i32_0 = arith.constant 0 : i32
    %c0_i32_1 = arith.constant 0 : i32
    %c0_i32_2 = arith.constant 0 : i32
    %c0_i32_3 = arith.constant 0 : i32
    return %c0_i32, %c0_i32_0, %c0_i32_1, %c0_i32_2 : i32, i32, i32, i32
  }
  func.func @transform_4(%arg0: i32) -> (i32, i32, i32, i32) {
    %c0_i32 = arith.constant 0 : i32
    %c0_i32_0 = arith.constant 0 : i32
    %c0_i32_1 = arith.constant 0 : i32
    %c0_i32_2 = arith.constant 0 : i32
    %c0_i32_3 = arith.constant 0 : i32
    return %c0_i32, %c0_i32_0, %c0_i32_1, %c0_i32_2 : i32, i32, i32, i32
  }
  func.func @transform_5(%arg0: i32) -> (i32, i32, i32) {
    %c0_i32 = arith.constant 0 : i32
    %c0_i32_0 = arith.constant 0 : i32
    %c0_i32_1 = arith.constant 0 : i32
    %c0_i32_2 = arith.constant 0 : i32
    return %c0_i32, %c0_i32_0, %c0_i32_1 : i32, i32, i32
  }
  func.func @transform_6(%arg0: i32) -> (i32, i32, i32) {
    %c0_i32 = arith.constant 0 : i32
    %c0_i32_0 = arith.constant 0 : i32
    %c0_i32_1 = arith.constant 0 : i32
    %c0_i32_2 = arith.constant 0 : i32
    return %c0_i32, %c0_i32_0, %c0_i32_1 : i32, i32, i32
  }
  func.func @transform_7(%arg0: i32) -> (i32, i32, i32) {
    %c0_i32 = arith.constant 0 : i32
    %c0_i32_0 = arith.constant 0 : i32
    %c0_i32_1 = arith.constant 0 : i32
    %c0_i32_2 = arith.constant 0 : i32
    return %c0_i32, %c0_i32_0, %c0_i32_1 : i32, i32, i32
  }
  func.func @transform_8(%arg0: i32) -> (i32, i32) {
    %c0_i32 = arith.constant 0 : i32
    %c0_i32_0 = arith.constant 0 : i32
    %c0_i32_1 = arith.constant 0 : i32
    return %c0_i32, %c0_i32_0 : i32, i32
  }
  func.func @transform_9(%arg0: i32) -> (i32, i32) {
    %c0_i32 = arith.constant 0 : i32
    %c0_i32_0 = arith.constant 0 : i32
    %c0_i32_1 = arith.constant 0 : i32
    return %c0_i32, %c0_i32_0 : i32, i32
  }
  func.func @transform_10(%arg0: i32) -> (i32, i32, i32) {
    %c0_i32 = arith.constant 0 : i32
    %c0_i32_0 = arith.constant 0 : i32
    %c0_i32_1 = arith.constant 0 : i32
    return %arg0, %c0_i32, %c0_i32_0 : i32, i32, i32
  }
  func.func @transform_11(%arg0: i32) -> (i32, i32, i32) {
    %c0_i32 = arith.constant 0 : i32
    %c0_i32_0 = arith.constant 0 : i32
    %c0_i32_1 = arith.constant 0 : i32
    return %arg0, %c0_i32, %c0_i32_0 : i32, i32, i32
  }
}

</mosaic_0001>

<bundles_post_ra>
// kernel: transformer_decoder_forward.1
= control target key start
LH: loop header
LB: loop body
LE: loop exit
PB: predicated region body
PF: predicated region fallthrough
CT: control target
= control target key end

     0   :  { %s6884_s0 = inlined_call_operand.vmem [shape: f32[2,8,32], index: 0, kind: input, shape index: {}]   ;;  %s6885_s1 = inlined_call_operand.vmem [shape: f32[2,16,32], index: 1, kind: input, shape index: {}]   ;;  %s6886_s2 = inlined_call_operand.vmem [shape: f32[2,1,16], index: 2, kind: input, shape index: {}]   ;;  %s6887_s3 = inlined_call_operand.vmem [shape: f32[2,2,32,96], index: 3, kind: input, shape index: {}]   ;;  %s6888_s4 = inlined_call_operand.vmem [shape: f32[2,2,32,32], index: 4, kind: input, shape index: {}]   ;;  %s6889_s5 = inlined_call_operand.vmem [shape: f32[26,1,128], index: 5, kind: input, shape index: {}]   ;;  %s6890_s6 = inlined_call_operand.vmem [shape: f32[2,32,64], index: 6, kind: input, shape index: {}]   ;;  %s6891_s7 = inlined_call_operand.vmem [shape: f32[2,64,32], index: 7, kind: input, shape index: {}]   ;;  %s6892_s8 = inlined_call_operand.vmem [shape: f32[32,128], index: 8, kind: input, shape index: {}]   ;;  %s6893_s9 = inlined_call_operand.vmem [shape: f32[1,128], index: 9, kind: input, shape index: {}]   ;;  %s6894_s10 = inlined_call_operand.hbm [shape: f32[2,8,128], index: 10, kind: output, shape index: {0}]   ;;  %s6895_s11 = inlined_call_operand.hbm [shape: f32[2,8,128], index: 11, kind: output, shape index: {1}]  }
   0x1   :  { %6917 = sst [smem:[#allocation13_spill]] %s6884_s0 }
   0x2   :  { %6918 = sst [smem:[#allocation14_spill]] %s6885_s1 }
   0x3   :  { %6919 = sst [smem:[#allocation15_spill]] %s6886_s2 }
   0x4   :  { %17 = vsyncpa [#allocation3], 0 }
   0x5   :  { %19 = vsyncpa [#allocation3 + $0x1], 0 }
   0x6   :  { %20 = vsyncpa [#allocation5], 0 }
   0x7   :  { %22 = vsyncpa [#allocation5 + $0x1], 0  ;;  %s5905_s17 = smov 0   ;;  %s5907_s18 = smov 0  }
   0x8   :  { %s5909_s19 = smov 0   ;;  %s5911_s20 = smov 0  }
   0x9 LB: > { %6920 = sst [smem:[#allocation8_spill]] %s5818_s17  ;;  %s5926_s21 = sadd.s32 4294967295, %s5830_s20   ;;  %s5830_s20 = sphi %s5911_s20, %s6940_s20   ;;  %s5826_s19 = sphi %s5909_s19, %s6942_s19   ;;  %s5822_s18 = sphi %s5907_s18, %s6944_s18   ;;  %s5818_s17 = sphi %s5905_s17, %s6943_s17  }
   0xa   : > { %6921 = sst [smem:[#allocation9_spill]] %s5826_s19  ;;  %s4885_s22 = sadd.s32 4294967294, %s5830_s20  }
   0xb   : > { %s5930_s23 = sadd.s32 1, %s5830_s20   ;;  %s260_s24 = sadd.s32 1, %s5826_s19 }
   0xc   : > { %6922 = sst [smem:[#allocation10_spill]] %s5930_s23  ;;  %s257_s25 = ssub.s32 %s5830_s20, %s5930_s23 }
   0xd   : > { %p270_p0 = scmp.ne.s32.totalorder %s5826_s19, %s5822_s18  ;;  %p258_p1 = scmp.eq.s32.totalorder %s257_s25, 0 }
   0xe   : > { %p271_p2 = scmp.eq.s32.totalorder %s5926_s21, 1  ;;  %p276_p3 = scmp.ne.s32.totalorder %s5822_s18, %s5818_s17 }
   0xf   : > { %p277_p4 = scmp.eq.s32.totalorder %s4885_s22, 1  ;;  %p4888_p7 = scmp.ge.s32.totalorder %s5830_s20, 1 }
  0x10   : > { %s5941_s26 = scalar_select %p258_p1, %s5826_s19, %s260_s24  }
  0x11   : > { %p5943_p5 = por %p271_p2, %p270_p0  ;;  %p5947_p6 = por %p277_p4, %p276_p3 }
  0x12   : > { %6923 = sst [smem:[#allocation11_spill]] %s5941_s26  ;;  %p363_p8 = scmp.lt.s32.totalorder %s5830_s20, 3 }
  0x13   : > { %s6925_s28 = scalar_select %p5947_p6, 1, 0 }
  0x14   : > { %p364_p9 = pnand %p4888_p7, %p363_p8 }
  0x15   : > { %6926 = sst [smem:[#allocation12_spill]] %s6925_s28  ;;  %p415_p10 = scmp.lt.s32.totalorder (!%p364_p9), %s5926_s21, 1 }
  0x16   : > { %367 = sbr.rel (%p364_p9) target bundleno = 9058 (0x2362), region = 60  ;;  %s6927_s0 = sld [smem:[#allocation13_spill]] (!%p364_p9) }
  0x17   : > { %s6910_s12 = smov (!%p364_p9), 120   ;;  %s6900_s13 = smov (!%p364_p9), 112  }
  0x18   : > { %s6896_s15 = smov (!%p364_p9), 64   ;;  %s6906_s22 = smov (!%p364_p9), 8  }
  0x19   : > { %s6904_s24 = smov (!%p364_p9), 16   ;;  %s6928_s1 = sld [smem:[#allocation14_spill]] (!%p364_p9) }
  0x1a   : > { %s6930_s25 = smov (!%p364_p9), 104   ;;  %s6931_s16 = smov (!%p364_p9), 112  }
  0x1b   : > { %s5955_s29 = scalar_select %p415_p10, %s5926_s21, 1  ;;  %vm437_vm0 = vcmask 261120   ;;  %v472_v7 = vld [vmem:[%s6887_s3 + $0x18] sm:$0xff]  ;;  %v5832_v8 = vmov 0.0   ;;  %v471_v9 = vld [vmem:[%s6887_s3 + $0x10] sm:$0xff]  ;;  %vm5833_vm1 = vmmov 0   ;;  %v431_v32 = vlaneseq }
  0x1c   : > { %5228 = vmatprep.subr.mxu0 %v5832_v8  ;;  %5236 = vmatprep.mubr.msk.f32.mxu0 %vm5833_vm1, %v5832_v8  ;;  %v470_v10 = vld [vmem:[%s6887_s3 + $0x8] sm:$0xff]  ;;  %v469_v11 = vld [vmem:[%s6887_s3] sm:$0xff]  ;;  %vm569_vm2 = vcmask 64512   ;;  %v5838_v35 = vmov -1e+30   ;;  %vm1233_vm4 = vcmask 130048  }
  0x1d   : > { %s4891_s30 = sshll.u32 %s5955_s29, 3  ;;  %5229 = vmatpush3.msra.mxu0 %v472_v7  ;;  %5239 = vmatprep.subr.mxu1 %v5832_v8  ;;  %v4894_v16 = vld [vmem:[%s6889_s5] ss:$0 sm:$0xff]  ;;  %v4896_v18 = vld [vmem:[%s6889_s5 + $0x1] ss:$0 sm:$0xff]  ;;  %v432_v33 = vshrl.u32 %v431_v32, 7 }
  0x1e   : > { %s418_s14 = scalar_lea.vmem %s6927_s0, %s4891_s30  ;;  %5230 = vmatprep.subr.mxu0 %v5832_v8  ;;  %5241 = vmatprep.mubr.msk.f32.mxu1 %vm5833_vm1, %v5832_v8  ;;  %v4898_v21 = vld [vmem:[%s6889_s5 + $0x6] ss:$0 sm:$0xff]  ;;  %s6908_s30 = smov 104   ;;  %v434_v34 = vand.u32 127, %v431_v32  ;;  %vm1235_vm5 = vcmask 195584   ;;  %vm2457_vm6 = vcmask 523264  }
  0x1f   : > { %v5961_v0 = vld [vmem:[%s418_s14] sm:$0xff]  ;;  %5231 = vmatpush3.msra.mxu0 %v471_v9  ;;  %s6898_s14 = smov 96   ;;  %s6933_s2 = sld [smem:[#allocation15_spill]] }
  0x20   : > { %v438_v1 = vsel %vm437_vm0, %v5961_v0, 0.0  ;;  %5232 = vmatprep.subr.mxu0 %v5832_v8  ;;  %vm435_vm3 = vcmp.ge.s32.totalorder %v432_v33, %v434_v34  ;;  %v554_v32 = vld [vmem:[%s6888_s4] sm:$0xff]  ;;  %s6935_s26 = smov 8   ;;  %s5843_s17 = smov [#allocation4]  }
  0x21   : > { %439 = vadd.xlane.f32.xlu0 %v438_v1  ;;  %5233 = vmatpush3.msra.mxu0 %v470_v10  ;;  %v6047_v36 = vsel %vm435_vm3, 0.0, %v5838_v35  ;;  %s5744_s23 = sshll.u32 %s5843_s17, 4  ;;  %s5745_s23 = int_to_ptr.vmem [resolvable:$false] %s5744_s23 }
  0x22   : > { %5234 = vmatprep.subr.mxu0 %v5832_v8  ;;  %s5746_s28 = scalar_lea.vmem %s5745_s23, 256 }
  0x23   : > { %5235 = vmatpush3.msra.mxu0 %v469_v11 }
  0x24   : > { %5259 = vmatprep.subr.mxu0 %v5832_v8 }
  0xaa   : > { %v440_v2 = vpop.xlane.xlu0 %439 }
  0xab   : > { %v442_v3 = vmul.f32 0.03125, %v440_v2 }
  0xad   : > { %v443_v4 = vsub.f32 %v5961_v0, %v442_v3 }
  0xaf   : > { %v444_v5 = vmul.f32 %v443_v4, %v443_v4 }
  0xb1   : > { %v445_v6 = vsel %vm437_vm0, %v444_v5, 0.0 }
  0xb2   : > { %446 = vadd.xlane.f32.xlu0 %v445_v6 }
 0x13b   : > { %v447_v12 = vpop.xlane.xlu0 %446 }
 0x13c   : > { %v448_v13 = vmul.f32 0.03125, %v447_v12 }
 0x13e   : > { %v449_v14 = vadd.f32 1e-05, %v448_v13 }
 0x140   : > { %5656 = vrsqrt.f32 %v449_v14 }
 0x14d   : > { %v5657_v15 = vpop.eup %5656 }
 0x14e   : > { %v451_v17 = vmul.f32 %v5657_v15, %v443_v4 }
 0x150   : > { %v459_v19 = vmul.f32 %v4894_v16, %v451_v17 }
 0x152   : > { %v468_v20 = vadd.f32 %v4896_v18, %v459_v19 }
 0x154   : > { %5237 = vmatmul.mubr.msk.f32.vlgmr.msra.gmra.mxu0 %vm437_vm0, %v468_v20 }
 0x155   : > { %5261 = vmatprep.mubr.msk.f32.mxu0 %vm5833_vm1, %v5832_v8 }
 0x214   : > { %v550_v22 = vpop.f32.mrf.mxu0 }
 0x215   : > { %v6001_v23 = vadd.f32 %v4898_v21, %v550_v22 }
 0x216   : > { %v5238_v24 = vpop.f32.mrf.mxu0 }
 0x217   : > { %565 = vrot.lane.b32.xlu0 %v6001_v23, %s6908_s30  ;;  %561 = vrot.lane.b32.xlu1 %v6001_v23, %s6910_s12 }
 0x21b   : > { %563 = vrot.lane.b32.xlu1 %v6001_v23, %s6900_s13  ;;  %s5062_s13 = sshll.u32 %s5955_s29, 4 }
 0x21c   : > { %s6125_s30 = scalar_lea.vmem %s6928_s1, %s5062_s13  ;;  %s6932_s13 = smov 96  }
 0x21d   : > { %s6936_s1 = smov 16  }
 0x21f   : > { %567 = vrot.lane.b32.xlu1 %v6001_v23, %s6898_s14 }
 0x289   : > { %v6011_v25 = vpop.permute.xlu1 %561  ;;  %v6019_v27 = vpop.permute.xlu0 %565 }
 0x28a   : > { %644 = vrot.lane.b32.xlu1 %v6011_v25, %s6898_s14 }
 0x28d   : > { %v6015_v26 = vpop.permute.xlu1 %563 }
 0x28e   : > { %720 = vrot.lane.b32.xlu1 %v6015_v26, %s6898_s14 }
 0x291   : > { %v568_v28 = vpop.permute.xlu1 %567 }
 0x292   : > { %796 = vrot.lane.b32.xlu1 %v6019_v27, %s6898_s14  ;;  %5240 = vmatpush3.xpose.msk.msra.mxu1 %vm569_vm2, %v568_v28  ;;  %s6902_s14 = smov 24  }
 0x293   : > { %5244 = vmatprep.subr.mxu1 %v5832_v8 }
 0x295   : > { %5242 = vmatmul.mubr.msk.f32.vlgmr.msra.gmra.mxu1 %vm569_vm2, %v6001_v23 }
 0x296   : > { %5246 = vmatprep.mubr.msk.f32.mxu1 %vm5833_vm1, %v5832_v8 }
 0x2fc   : > { %v645_v29 = vpop.permute.xlu1 %644 }
 0x2fd   : > { %5245 = vmatpush3.xpose.msk.msra.mxu1 %vm569_vm2, %v645_v29  ;;  %v557_v29 = vld [vmem:[%s6888_s4 + $0x18] sm:$0xff] }
 0x2fe   : > { %5249 = vmatprep.subr.mxu1 %v5832_v8 }
 0x300   : > { %5247 = vmatmul.mubr.msk.f32.vlgmr.msra.gmra.mxu1 %vm569_vm2, %v6011_v25  ;;  %v721_v30 = vpop.permute.xlu1 %720 }
 0x301   : > { %5250 = vmatpush3.xpose.msk.msra.mxu1 %vm569_vm2, %v721_v30  ;;  %5251 = vmatprep.mubr.msk.f32.mxu1 %vm5833_vm1, %v5832_v8  ;;  %v556_v30 = vld [vmem:[%s6888_s4 + $0x10] sm:$0xff] }
 0x302   : > { %5254 = vmatprep.subr.mxu1 %v5832_v8 }
 0x304   : > { %5252 = vmatmul.mubr.msk.f32.vlgmr.msra.gmra.mxu1 %vm569_vm2, %v6015_v26  ;;  %v797_v31 = vpop.permute.xlu1 %796 }
 0x305   : > { %5255 = vmatpush3.xpose.msk.msra.mxu1 %vm569_vm2, %v797_v31  ;;  %5256 = vmatprep.mubr.msk.f32.mxu1 %vm5833_vm1, %v5832_v8  ;;  %v555_v31 = vld [vmem:[%s6888_s4 + $0x8] sm:$0xff] }
 0x306   : > { %5264 = vmatprep.subr.mxu1 %v5832_v8 }
 0x308   : > { %5257 = vmatmul.mubr.msk.f32.vlgmr.msra.gmra.mxu1 %vm569_vm2, %v6019_v27 }
 0x309   : > { %5266 = vmatprep.mubr.msk.f32.mxu1 %vm5833_vm1, %v5832_v8 }
 0x355   : > { %v640_v37 = vpop.f32.mrf.mxu1 }
 0x356   : > { %v641_v38 = vadd.f32 %v640_v37, %v6047_v36 }
 0x357   : > { %v5243_v39 = vpop.f32.mrf.mxu1 }
 0x358   : > { %v872_v40 = vsel %vm569_vm2, %v641_v38, -inf }
 0x359   : > { %873 = vmax.xlane.f32.xlu1 %v872_v40 }
 0x3c0   : > { %v716_v41 = vpop.f32.mrf.mxu1 }
 0x3c1   : > { %v717_v42 = vadd.f32 %v716_v41, %v6047_v36 }
 0x3c2   : > { %v5248_v43 = vpop.f32.mrf.mxu1 }
 0x3c3   : > { %v875_v44 = vsel %vm569_vm2, %v717_v42, -inf }
 0x3c4   : > { %876 = vmax.xlane.f32.xlu0 %v875_v44  ;;  %v792_v45 = vpop.f32.mrf.mxu1 }
 0x3c5   : > { %v793_v46 = vadd.f32 %v792_v45, %v6047_v36 }
 0x3c6   : > { %v5253_v47 = vpop.f32.mrf.mxu1 }
 0x3c7   : > { %v878_v48 = vsel %vm569_vm2, %v793_v46, -inf }
 0x3c8   : > { %879 = vmax.xlane.f32.xlu1 %v878_v48  ;;  %v868_v49 = vpop.f32.mrf.mxu1 }
 0x3c9   : > { %v869_v50 = vadd.f32 %v868_v49, %v6047_v36 }
 0x3ca   : > { %v5258_v51 = vpop.f32.mrf.mxu1 }
 0x3cb   : > { %v881_v52 = vsel %vm569_vm2, %v869_v50, -inf }
 0x3cc   : > { %882 = vmax.xlane.f32.xlu0 %v881_v52  ;;  %v4922_v52 = vld [vmem:[%s6887_s3 + $0x38] sm:$0xff] }
 0x3d9   : > { %916 = vrot.lane.b32.xlu1 %v6001_v23, %s6896_s15 }
 0x3e2   : > { %v874_v53 = vpop.xlane.xlu1 %873 }
 0x3e3   : > { %v884_v54 = vsub.f32 %v641_v38, %v874_v53  ;;  %v4921_v53 = vld [vmem:[%s6887_s3 + $0x30] sm:$0xff] }
 0x3e5   : > { %v888_v55 = vmul.f32 1.442695, %v884_v54  ;;  %v6131_v54 = vld [vmem:[%s6125_s30] sm:$0xff] }
 0x3e7   : > { %5658 = vpow2.f32 %v888_v55  ;;  %v4919_v55 = vld [vmem:[%s6887_s3 + $0x20] sm:$0xff] }
 0x3f4   : > { %v5659_v56 = vpop.eup %5658 }
 0x3f5   : > { %v896_v57 = vsel %vm569_vm2, %v5659_v56, 0.0 }
 0x3fd   : > { %897 = vadd.xlane.f32.xlu1 %v896_v57 }
 0x44d   : > { %v877_v58 = vpop.xlane.xlu0 %876 }
 0x44e   : > { %v885_v59 = vsub.f32 %v717_v42, %v877_v58 }
 0x450   : > { %v890_v60 = vmul.f32 1.442695, %v885_v59 }
 0x451   : > { %v880_v61 = vpop.xlane.xlu1 %879 }
 0x452   : > { %5660 = vpow2.f32 %v890_v60  ;;  %v886_v62 = vsub.f32 %v793_v46, %v880_v61  ;;  %v4913_v46 = vld [vmem:[%s6889_s5 + $0x7] ss:$0 sm:$0xff] }
 0x454   : > { %v892_v63 = vmul.f32 1.442695, %v886_v62 }
 0x455   : > { %v883_v1 = vpop.xlane.xlu0 %882  ;;  %v917_v2 = vpop.permute.xlu1 %916 }
 0x456   : > { %5662 = vpow2.f32 %v892_v63  ;;  %v887_v3 = vsub.f32 %v869_v50, %v883_v1  ;;  %5260 = vmatpush3.msra.mxu0 %v917_v2  ;;  %v4924_v63 = vld [vmem:[%s6889_s5 + $0x8] ss:$0 sm:$0xff] }
 0x457   : > { %5269 = vmatprep.subr.mxu0 %v5832_v8 }
 0x458   : > { %v894_v4 = vmul.f32 1.442695, %v887_v3 }
 0x45a   : > { %5664 = vpow2.f32 %v894_v4 }
 0x45f   : > { %v5661_v5 = vpop.eup %5660 }
 0x460   : > { %v899_v6 = vsel %vm569_vm2, %v5661_v5, 0.0 }
 0x461   : > { %900 = vadd.xlane.f32.xlu0 %v899_v6 }
 0x463   : > { %v5663_v7 = vpop.eup %5662 }
 0x464   : > { %v902_v9 = vsel %vm569_vm2, %v5663_v7, 0.0 }
 0x465   : > { %903 = vadd.xlane.f32.xlu1 %v902_v9  ;;  %v4916_v9 = vld [vmem:[%s6889_s5 + $0x2] ss:$0 sm:$0xff] }
 0x467   : > { %v5665_v10 = vpop.eup %5664 }
 0x468   : > { %v905_v11 = vsel %vm569_vm2, %v5665_v10, 0.0 }
 0x469   : > { %906 = vadd.xlane.f32.xlu0 %v905_v11  ;;  %v4918_v11 = vld [vmem:[%s6889_s5 + $0x3] ss:$0 sm:$0xff] }
 0x476   : > { %1068 = vrot.lane.b32.xlu1 %v6015_v26, %s6896_s15 }
 0x47a   : > { %1144 = vrot.lane.b32.xlu1 %v6019_v27, %s6896_s15 }
 0x47f   : > { %992 = vrot.lane.b32.xlu0 %v6011_v25, %s6896_s15 }
 0x486   : > { %v898_v12 = vpop.xlane.xlu1 %897 }
 0x487   : > { %5666 = vrcp.f32 %v898_v12 }
 0x494   : > { %v5667_v13 = vpop.eup %5666 }
 0x495   : > { %v912_v14 = vmul.f32 %v5667_v13, %v5659_v56  ;;  %v429_v56 = vld [vmem:[%s6125_s30 + $0x8] sm:$0xff] }
 0x497   : > { %5262 = vmatmul.mubr.msk.f32.vlgmr.msra.gmra.mxu0 %vm569_vm2, %v912_v14 }
 0x498   : > { %5271 = vmatprep.mubr.msk.f32.mxu0 %vm5833_vm1, %v5832_v8 }
 0x4ea   : > { %v901_v15 = vpop.xlane.xlu0 %900 }
 0x4eb   : > { %5668 = vrcp.f32 %v901_v15 }
 0x4ee   : > { %v904_v16 = vpop.xlane.xlu1 %903 }
 0x4ef   : > { %5670 = vrcp.f32 %v904_v16 }
 0x4f2   : > { %v907_v17 = vpop.xlane.xlu0 %906  ;;  %v1069_v18 = vpop.permute.xlu1 %1068 }
 0x4f3   : > { %5672 = vrcp.f32 %v907_v17  ;;  %5270 = vmatpush3.msra.mxu0 %v1069_v18 }
 0x4f4   : > { %5279 = vmatprep.subr.mxu0 %v5832_v8 }
 0x4f6   : > { %v993_v19 = vpop.permute.xlu0 %992  ;;  %v1145_v22 = vpop.permute.xlu1 %1144 }
 0x4f7   : > { %5265 = vmatpush3.msra.mxu1 %v993_v19 }
 0x4f8   : > { %v5669_v20 = vpop.eup %5668  ;;  %5274 = vmatprep.subr.mxu1 %v5832_v8 }
 0x4f9   : > { %v913_v21 = vmul.f32 %v5669_v20, %v5661_v5 }
 0x4fb   : > { %5267 = vmatmul.mubr.msk.f32.vlgmr.msra.gmra.mxu1 %vm569_vm2, %v913_v21 }
 0x4fc   : > { %v5671_v23 = vpop.eup %5670  ;;  %5275 = vmatpush3.msra.mxu1 %v1145_v22  ;;  %5276 = vmatprep.mubr.msk.f32.mxu1 %vm5833_vm1, %v5832_v8 }
 0x4fd   : > { %v914_v24 = vmul.f32 %v5671_v23, %v5663_v7  ;;  %5290 = vmatprep.subr.mxu1 %v5832_v8 }
 0x4ff   : > { %5272 = vmatmul.mubr.msk.f32.vlgmr.msra.gmra.mxu0 %vm569_vm2, %v914_v24 }
 0x500   : > { %v5673_v25 = vpop.eup %5672  ;;  %5287 = vmatprep.mubr.msk.f32.mxu0 %vm5833_vm1, %v5832_v8  ;;  %5280 = vmatpush3.msra.mxu0 %v557_v29 }
 0x501   : > { %v915_v26 = vmul.f32 %v5673_v25, %v5665_v10  ;;  %5281 = vmatprep.subr.mxu0 %v5832_v8 }
 0x502   : > { %5282 = vmatpush3.msra.mxu0 %v556_v30 }
 0x503   : > { %5277 = vmatmul.mubr.msk.f32.vlgmr.msra.gmra.mxu1 %vm569_vm2, %v915_v26  ;;  %5283 = vmatprep.subr.mxu0 %v5832_v8 }
 0x504   : > { %5298 = vmatprep.mubr.msk.f32.mxu1 %vm5833_vm1, %v5832_v8  ;;  %5284 = vmatpush3.msra.mxu0 %v555_v31 }
 0x505   : > { %5285 = vmatprep.subr.mxu0 %v5832_v8  ;;  %5291 = vmatpush3.msra.mxu1 %v4922_v52 }
 0x506   : > { %5286 = vmatpush3.msra.mxu0 %v554_v32  ;;  %5292 = vmatprep.subr.mxu1 %v5832_v8 }
 0x507   : > { %5301 = vmatprep.subr.mxu0 %v4922_v52  ;;  %5293 = vmatpush3.msra.mxu1 %v4921_v53 }
 0x508   : > { %5294 = vmatprep.subr.mxu1 %v5832_v8 }
 0x557   : > { %v988_v27 = vpop.f32.mrf.mxu0 }
 0x559   : > { %v5263_v28 = vpop.f32.mrf.mxu0 }
 0x5bb   : > { %v1064_v33 = vpop.f32.mrf.mxu1 }
 0x5bc   : > { %1221 = vrot.lane.b32.xlu0 %v1064_v33, %s6906_s22  ;;  %s6240_s22 = scalar_lea.vmem %s6933_s2, %s5955_s29  ;;  %s6934_s29 = smov 64  }
 0x5bd   : > { %v5268_v34 = vpop.f32.mrf.mxu1  ;;  %s6937_s2 = smov 24  }
 0x5be   : > { %v6243_v34 = vld [vmem:[%s6240_s22] ss:$0 sm:$0xff] }
 0x5bf   : > { %v1140_v35 = vpop.f32.mrf.mxu0 }
 0x5c0   : > { %1225 = vrot.lane.b32.xlu1 %v1140_v35, %s6904_s24 }
 0x5c1   : > { %v5273_v37 = vpop.f32.mrf.mxu0 }
 0x5c3   : > { %v1216_v38 = vpop.f32.mrf.mxu1 }
 0x5c4   : > { %1229 = vrot.lane.b32.xlu0 %v1216_v38, %s6902_s14  ;;  %s6929_s14 = smov 120  }
 0x5c5   : > { %v5278_v39 = vpop.f32.mrf.mxu1 }
 0x62e   : > { %v1222_v40 = vpop.permute.xlu0 %1221 }
 0x62f   : > { %v1232_v42 = vsel %vm569_vm2, %v988_v27, %v1222_v40 }
 0x632   : > { %v1226_v41 = vpop.permute.xlu1 %1225 }
 0x633   : > { %v1234_v43 = vsel %vm1233_vm4, %v1232_v42, %v1226_v41 }
 0x636   : > { %v1230_v44 = vpop.permute.xlu0 %1229 }
 0x637   : > { %v1236_v45 = vsel %vm1235_vm5, %v1234_v43, %v1230_v44 }
 0x638   : > { %5288 = vmatmul.mubr.msk.f32.vlgmr.msra.gmra.mxu0 %vm437_vm0, %v1236_v45 }
 0x639   : > { %5302 = vmatpush3.msra.mxu0 %v4922_v52  ;;  %5309 = vmatprep.mubr.msk.f32.mxu0 %vm437_vm0, %v6131_v54 }
 0x63a   : > { %5303 = vmatprep.subr.mxu0 %v4921_v53 }
 0x63b   : > { %5304 = vmatpush3.msra.mxu0 %v4921_v53 }
 0x6f8   : > { %v1312_v47 = vpop.f32.mrf.mxu0 }
 0x6f9   : > { %v1313_v48 = vadd.f32 %v4913_v46, %v1312_v47 }
 0x6fa   : > { %v5289_v49 = vpop.f32.mrf.mxu0 }
 0x6fb   : > { %v6111_v50 = vadd.f32 %v1313_v48, %v5961_v0  ;;  %v4920_v0 = vld [vmem:[%s6887_s3 + $0x28] sm:$0xff] }
 0x6fc   : > { %5305 = vmatprep.subr.mxu0 %v4920_v0  ;;  %5295 = vmatpush3.msra.mxu1 %v4920_v0 }
 0x6fd   : > { %v1317_v51 = vsel %vm437_vm0, %v6111_v50, 0.0  ;;  %5306 = vmatpush3.msra.mxu0 %v4920_v0  ;;  %5296 = vmatprep.subr.mxu1 %v5832_v8 }
 0x6fe   : > { %1318 = vadd.xlane.f32.xlu1 %v1317_v51  ;;  %5307 = vmatprep.subr.mxu0 %v4919_v55 }
 0x6ff   : > { %5308 = vmatpush3.msra.mxu0 %v4919_v55  ;;  %5297 = vmatpush3.msra.mxu1 %v4919_v55 }
 0x700   : > { %5310 = vmatmul.mubr.msk.f32.vlgmr.msra.gmra.mxu0 %vm437_vm0, %v429_v56  ;;  %5312 = vmatprep.subr.mxu1 %v5832_v8 }
 0x701   : > { %5319 = vmatprep.subr.mxu0 %v5832_v8  ;;  %5323 = vmatprep.mubr.msk.f32.mxu0 %vm5833_vm1, %v5832_v8 }
 0x787   : > { %v1319_v57 = vpop.xlane.xlu1 %1318 }
 0x788   : > { %v1320_v58 = vmul.f32 0.03125, %v1319_v57 }
 0x78a   : > { %v1321_v59 = vsub.f32 %v6111_v50, %v1320_v58 }
 0x78c   : > { %v1322_v60 = vmul.f32 %v1321_v59, %v1321_v59 }
 0x78e   : > { %v1323_v61 = vsel %vm437_vm0, %v1322_v60, 0.0 }
 0x78f   : > { %1324 = vadd.xlane.f32.xlu0 %v1323_v61 }
 0x7c0   : > { %v5311_v62 = vpop.f32.mrf.mxu0 }
 0x7c1   : > { %v6152_v1 = vadd.f32 %v5311_v62, %v4924_v63 }
 0x7c2   : > { %v1506_v2 = vpop.f32.mrf.mxu0 }
 0x7c3   : > { %v6154_v3 = vadd.f32 %v4924_v63, %v1506_v2  ;;  %1533 = vrot.lane.b32.xlu0 %v6152_v1, %s6929_s14 }
 0x7c5   : > { %1531 = vrot.lane.b32.xlu1 %v6154_v3, %s6929_s14 }
 0x7c7   : > { %1541 = vrot.lane.b32.xlu0 %v6152_v1, %s6930_s25 }
 0x7c9   : > { %1537 = vrot.lane.b32.xlu1 %v6152_v1, %s6931_s16 }
 0x7cb   : > { %1539 = vrot.lane.b32.xlu0 %v6154_v3, %s6930_s25 }
 0x7cd   : > { %1535 = vrot.lane.b32.xlu1 %v6154_v3, %s6931_s16 }
 0x7d1   : > { %1551 = vrot.lane.b32.xlu1 %v6152_v1, %s6932_s13 }
 0x7d5   : > { %1549 = vrot.lane.b32.xlu1 %v6154_v3, %s6932_s13 }
 0x818   : > { %v1325_v4 = vpop.xlane.xlu0 %1324 }
 0x819   : > { %v1326_v5 = vmul.f32 0.03125, %v1325_v4 }
 0x81b   : > { %v1327_v6 = vadd.f32 1e-05, %v1326_v5 }
 0x81d   : > { %5674 = vrsqrt.f32 %v1327_v6 }
 0x82a   : > { %v5675_v7 = vpop.eup %5674 }
 0x82b   : > { %v1329_v10 = vmul.f32 %v5675_v7, %v1321_v59 }
 0x82d   : > { %v1338_v12 = vmul.f32 %v4916_v9, %v1329_v10 }
 0x82f   : > { %v1347_v13 = vadd.f32 %v4918_v11, %v1338_v12 }
 0x831   : > { %5299 = vmatmul.mubr.msk.f32.vlgmr.msra.gmra.mxu1 %vm437_vm0, %v1347_v13 }
 0x832   : > { %5316 = vmatprep.mubr.msk.f32.mxu1 %vm5833_vm1, %v5832_v8 }
 0x835   : > { %v6181_v14 = vpop.permute.xlu0 %1533 }
 0x836   : > { %1631 = vrot.lane.b32.xlu0 %v6181_v14, %s6932_s13 }
 0x837   : > { %v6185_v15 = vpop.permute.xlu1 %1531 }
 0x839   : > { %v6191_v17 = vpop.permute.xlu0 %1541 }
 0x83a   : > { %1629 = vrot.lane.b32.xlu0 %v6185_v15, %s6932_s13 }
 0x83b   : > { %v6189_v16 = vpop.permute.xlu1 %1537 }
 0x83c   : > { %1711 = vrot.lane.b32.xlu1 %v6189_v16, %s6932_s13 }
 0x83d   : > { %v6199_v19 = vpop.permute.xlu0 %1539 }
 0x83f   : > { %v6195_v18 = vpop.permute.xlu1 %1535 }
 0x840   : > { %1791 = vrot.lane.b32.xlu1 %v6191_v17, %s6932_s13 }
 0x843   : > { %v1552_v20 = vpop.permute.xlu1 %1551 }
 0x844   : > { %5313 = vmatpush3.xpose.msk.msra.mxu1 %vm569_vm2, %v1552_v20  ;;  %1789 = vrot.lane.b32.xlu1 %v6199_v19, %s6932_s13 }
 0x845   : > { %5314 = vmatprep.subr.mxu1 %v5832_v8 }
 0x847   : > { %v1550_v21 = vpop.permute.xlu1 %1549 }
 0x848   : > { %5315 = vmatpush3.xpose.msk.msra.mxu1 %vm569_vm2, %v1550_v21 }
 0x849   : > { %5326 = vmatprep.subr.mxu1 %v5832_v8 }
 0x8a8   : > { %v1632_v22 = vpop.permute.xlu0 %1631 }
 0x8a9   : > { %5320 = vmatpush3.xpose.msk.msra.mxu0 %vm569_vm2, %v1632_v22 }
 0x8aa   : > { %5321 = vmatprep.subr.mxu0 %v5832_v8 }
 0x8ac   : > { %v1630_v23 = vpop.permute.xlu0 %1629 }
 0x8ad   : > { %5322 = vmatpush3.xpose.msk.msra.mxu0 %vm569_vm2, %v1630_v23 }
 0x8ae   : > { %5333 = vmatprep.subr.mxu0 %v5832_v8  ;;  %v1712_v27 = vpop.permute.xlu1 %1711 }
 0x8b2   : > { %v1792_v28 = vpop.permute.xlu1 %1791 }
 0x8b6   : > { %v1790_v30 = vpop.permute.xlu1 %1789 }
 0x8f1   : > { %v1430_v24 = vpop.f32.mrf.mxu1 }
 0x8f2   : > { %v1431_v25 = vadd.f32 %v4924_v63, %v1430_v24 }
 0x8f3   : > { %v5300_v26 = vpop.f32.mrf.mxu1 }
 0x8f4   : > { %1523 = vrot.lane.b32.xlu0 %v1431_v25, %s6929_s14  ;;  %1527 = vrot.lane.b32.xlu1 %v1431_v25, %s6930_s25 }
 0x8f5   : > { %5317 = vmatmul.mubr.msk.f32.vlgmr.msra.gmra.mxu1 %vm569_vm2, %v1431_v25 }
 0x8f6   : > { %5327 = vmatpush3.xpose.msk.msra.mxu1 %vm569_vm2, %v1712_v27  ;;  %5330 = vmatprep.mubr.msk.f32.mxu1 %vm5833_vm1, %v5832_v8 }
 0x8f7   : > { %5328 = vmatprep.subr.mxu1 %v5832_v8 }
 0x8f8   : > { %1709 = vrot.lane.b32.xlu0 %v6195_v18, %s6932_s13 }
 0x8fc   : > { %1525 = vrot.lane.b32.xlu0 %v1431_v25, %s6931_s16 }
 0x966   : > { %v1524_v29 = vpop.permute.xlu0 %1523  ;;  %v1528_v32 = vpop.permute.xlu1 %1527 }
 0x967   : > { %5324 = vmatmul.mubr.msk.f32.vlgmr.msra.gmra.mxu0 %vm569_vm2, %v1524_v29 }
 0x968   : > { %5334 = vmatpush3.xpose.msk.msra.mxu0 %vm569_vm2, %v1792_v28  ;;  %5337 = vmatprep.mubr.msk.f32.mxu0 %vm5833_vm1, %v5832_v8 }
 0x969   : > { %5335 = vmatprep.subr.mxu0 %v5832_v8 }
 0x96a   : > { %v1710_v31 = vpop.permute.xlu0 %1709 }
 0x96b   : > { %5329 = vmatpush3.xpose.msk.msra.mxu1 %vm569_vm2, %v1710_v31 }
 0x96c   : > { %5336 = vmatpush3.xpose.msk.msra.mxu0 %vm569_vm2, %v1790_v30  ;;  %5340 = vmatprep.subr.mxu1 %v5832_v8 }
 0x96d   : > { %5354 = vmatprep.subr.mxu0 %v5832_v8 }
 0x96e   : > { %v1526_v33 = vpop.permute.xlu0 %1525 }
 0x96f   : > { %5338 = vmatmul.mubr.msk.f32.vlgmr.msra.gmra.mxu0 %vm569_vm2, %v1528_v32  ;;  %5331 = vmatmul.mubr.msk.f32.vlgmr.msra.gmra.mxu1 %vm569_vm2, %v1526_v33  ;;  %v4931_v33 = vld [vmem:[%s6888_s4 + $0x38] sm:$0xff] }
 0x970   : > { %5344 = vmatprep.mubr.msk.f32.mxu1 %vm5833_vm1, %v5832_v8  ;;  %5358 = vmatprep.mubr.msk.f32.mxu0 %vm5833_vm1, %v5832_v8 }
 0x9b5   : > { %v1625_v35 = vpop.f32.mrf.mxu1 }
 0x9b6   : > { %v1626_v37 = vadd.f32 %v6243_v34, %v1625_v35  ;;  %v4930_v35 = vld [vmem:[%s6888_s4 + $0x30] sm:$0xff] }
 0x9b7   : > { %v5318_v38 = vpop.f32.mrf.mxu1 }
 0x9b8   : > { %v1869_v39 = vsel %vm1233_vm4, %v1626_v37, -inf }
 0x9b9   : > { %1870 = vmax.xlane.f32.xlu0 %v1869_v39  ;;  %v4928_v39 = vld [vmem:[%s6888_s4 + $0x20] sm:$0xff] }
 0xa27   : > { %v1705_v40 = vpop.f32.mrf.mxu0 }
 0xa28   : > { %v1706_v41 = vadd.f32 %v6243_v34, %v1705_v40 }
 0xa29   : > { %v5325_v42 = vpop.f32.mrf.mxu0 }
 0xa2a   : > { %v1872_v43 = vsel %vm1233_vm4, %v1706_v41, -inf }
 0xa2b   : > { %1873 = vmax.xlane.f32.xlu1 %v1872_v43 }
 0xa2f   : > { %v1865_v44 = vpop.f32.mrf.mxu0  ;;  %v1785_v45 = vpop.f32.mrf.mxu1 }
 0xa30   : > { %v1786_v46 = vadd.f32 %v6243_v34, %v1785_v45  ;;  %v1866_v49 = vadd.f32 %v6243_v34, %v1865_v44 }
 0xa31   : > { %v5339_v47 = vpop.f32.mrf.mxu0  ;;  %v5332_v48 = vpop.f32.mrf.mxu1 }
 0xa32   : > { %v1875_v51 = vsel %vm1233_vm4, %v1786_v46, -inf  ;;  %v1878_v52 = vsel %vm1233_vm4, %v1866_v49, -inf }
 0xa33   : > { %1876 = vmax.xlane.f32.xlu0 %v1875_v51 }
 0xa37   : > { %1879 = vmax.xlane.f32.xlu0 %v1878_v52  ;;  %v4950_v52 = vld [vmem:[%s6889_s5 + $0x9] ss:$0 sm:$0xff] }
 0xa3c   : > { %1915 = vrot.lane.b32.xlu1 %v6152_v1, %s6934_s29 }
 0xa40   : > { %1994 = vrot.lane.b32.xlu1 %v6181_v14, %s6934_s29 }
 0xa42   : > { %v1871_v53 = vpop.xlane.xlu0 %1870 }
 0xa43   : > { %v1881_v0 = vsub.f32 %v1626_v37, %v1871_v53  ;;  %v4929_v37 = vld [vmem:[%s6888_s4 + $0x28] sm:$0xff] }
 0xa44   : > { %1992 = vrot.lane.b32.xlu1 %v6185_v15, %s6934_s29 }
 0xa45   : > { %v1885_v55 = vmul.f32 1.442695, %v1881_v0 }
 0xa47   : > { %5676 = vpow2.f32 %v1885_v55 }
 0xa48   : > { %2152 = vrot.lane.b32.xlu1 %v6191_v17, %s6934_s29 }
 0xa4d   : > { %1913 = vrot.lane.b32.xlu0 %v6154_v3, %s6934_s29 }
 0xa51   : > { %2073 = vrot.lane.b32.xlu0 %v6189_v16, %s6934_s29 }
 0xa54   : > { %v5677_v56 = vpop.eup %5676 }
 0xa55   : > { %v1893_v57 = vsel %vm1233_vm4, %v5677_v56, 0.0 }
 0xa6c   : > { %1894 = vadd.xlane.f32.xlu1 %v1893_v57 }
 0xab4   : > { %v1874_v58 = vpop.xlane.xlu1 %1873 }
 0xab5   : > { %v1882_v59 = vsub.f32 %v1706_v41, %v1874_v58 }
 0xab7   : > { %v1887_v60 = vmul.f32 1.442695, %v1882_v59 }
 0xab8   : > { %v1916_v61 = vpop.permute.xlu1 %1915 }
 0xab9   : > { %5678 = vpow2.f32 %v1887_v60  ;;  %5341 = vmatpush3.msra.mxu1 %v1916_v61 }
 0xaba   : > { %5342 = vmatprep.subr.mxu1 %v5832_v8 }
 0xabc   : > { %v1877_v62 = vpop.xlane.xlu0 %1876  ;;  %v1995_v14 = vpop.permute.xlu1 %1994 }
 0xabd   : > { %v1883_v63 = vsub.f32 %v1786_v46, %v1877_v62 }
 0xabf   : > { %v1889_v1 = vmul.f32 1.442695, %v1883_v63  ;;  %v2358_v63 = vld [vmem:[%s6890_s6 + $0x18] sm:$0xff] }
 0xac0   : > { %v1880_v2 = vpop.xlane.xlu0 %1879  ;;  %v1993_v15 = vpop.permute.xlu1 %1992 }
 0xac1   : > { %5680 = vpow2.f32 %v1889_v1  ;;  %v1884_v3 = vsub.f32 %v1866_v49, %v1880_v2  ;;  %v2356_v1 = vld [vmem:[%s6890_s6 + $0x8] sm:$0xff]  ;;  %v2355_v2 = vld [vmem:[%s6890_s6] sm:$0xff] }
 0xac3   : > { %v1891_v4 = vmul.f32 1.442695, %v1884_v3  ;;  %v2448_v3 = vld [vmem:[%s6891_s7 + $0x38] sm:$0xff] }
 0xac4   : > { %v1914_v5 = vpop.permute.xlu0 %1913  ;;  %v2153_v16 = vpop.permute.xlu1 %2152 }
 0xac5   : > { %5682 = vpow2.f32 %v1891_v4  ;;  %5343 = vmatpush3.msra.mxu1 %v1914_v5  ;;  %v2447_v4 = vld [vmem:[%s6891_s7 + $0x30] sm:$0xff]  ;;  %v2446_v5 = vld [vmem:[%s6891_s7 + $0x28] sm:$0xff] }
 0xac6   : > { %v5679_v6 = vpop.eup %5678  ;;  %5347 = vmatprep.subr.mxu1 %v5832_v8 }
 0xac7   : > { %v1896_v7 = vsel %vm1233_vm4, %v5679_v6, 0.0 }
 0xac8   : > { %v2074_v9 = vpop.permute.xlu0 %2073  ;;  %1897 = vadd.xlane.f32.xlu0 %v1896_v7  ;;  %v2444_v7 = vld [vmem:[%s6891_s7 + $0x18] sm:$0xff] }
 0xac9   : > { %5355 = vmatpush3.msra.mxu0 %v2074_v9 }
 0xaca   : > { %5356 = vmatprep.subr.mxu0 %v5832_v8 }
 0xace   : > { %v5681_v10 = vpop.eup %5680 }
 0xacf   : > { %v1899_v11 = vsel %vm1233_vm4, %v5681_v10, 0.0 }
 0xad0   : > { %1900 = vadd.xlane.f32.xlu1 %v1899_v11 }
 0xad2   : > { %v5683_v12 = vpop.eup %5682 }
 0xad3   : > { %v1902_v13 = vsel %vm1233_vm4, %v5683_v12, 0.0 }
 0xad4   : > { %1903 = vadd.xlane.f32.xlu0 %v1902_v13  ;;  %v4953_v13 = vld [vmem:[%s6889_s5 + $0x4] ss:$0 sm:$0xff] }
 0xae1   : > { %2150 = vrot.lane.b32.xlu1 %v6199_v19, %s6934_s29 }
 0xaea   : > { %2071 = vrot.lane.b32.xlu0 %v6195_v18, %s6934_s29 }
 0xaf5   : > { %v1895_v17 = vpop.xlane.xlu1 %1894 }
 0xaf6   : > { %5684 = vrcp.f32 %v1895_v17 }
 0xb03   : > { %v5685_v20 = vpop.eup %5684 }
 0xb04   : > { %v1909_v21 = vmul.f32 %v5685_v20, %v5677_v56  ;;  %v2443_v20 = vld [vmem:[%s6891_s7 + $0x10] sm:$0xff] }
 0xb06   : > { %5345 = vmatmul.mubr.msk.f32.vlgmr.msra.gmra.mxu1 %vm1233_vm4, %v1909_v21  ;;  %v2442_v21 = vld [vmem:[%s6891_s7 + $0x8] sm:$0xff] }
 0xb07   : > { %5348 = vmatpush3.msra.mxu1 %v1995_v14  ;;  %5351 = vmatprep.mubr.msk.f32.mxu1 %vm5833_vm1, %v5832_v8 }
 0xb08   : > { %5349 = vmatprep.subr.mxu1 %v5832_v8 }
 0xb09   : > { %5350 = vmatpush3.msra.mxu1 %v1993_v15  ;;  %v4955_v15 = vld [vmem:[%s6889_s5 + $0x5] ss:$0 sm:$0xff] }
 0xb0a   : > { %5361 = vmatprep.subr.mxu1 %v5832_v8 }
 0xb51   : > { %v1898_v19 = vpop.xlane.xlu0 %1897 }
 0xb52   : > { %5686 = vrcp.f32 %v1898_v19  ;;  %v2441_v19 = vld [vmem:[%s6891_s7] sm:$0xff] }
 0xb59   : > { %v1901_v18 = vpop.xlane.xlu1 %1900 }
 0xb5a   : > { %5688 = vrcp.f32 %v1901_v18  ;;  %v4957_v18 = vld [vmem:[%s6889_s5 + $0xa] ss:$0 sm:$0xff] }
 0xb5d   : > { %v1904_v22 = vpop.xlane.xlu0 %1903  ;;  %v2151_v26 = vpop.permute.xlu1 %2150 }
 0xb5e   : > { %5690 = vrcp.f32 %v1904_v22 }
 0xb5f   : > { %v5687_v23 = vpop.eup %5686 }
 0xb60   : > { %v1910_v24 = vmul.f32 %v5687_v23, %v5679_v6  ;;  %v2445_v6 = vld [vmem:[%s6891_s7 + $0x20] sm:$0xff] }
 0xb61   : > { %v2072_v25 = vpop.permute.xlu0 %2071 }
 0xb62   : > { %5352 = vmatmul.mubr.msk.f32.vlgmr.msra.gmra.mxu1 %vm1233_vm4, %v1910_v24  ;;  %5357 = vmatpush3.msra.mxu0 %v2072_v25 }
 0xb63   : > { %5362 = vmatpush3.msra.mxu1 %v2153_v16  ;;  %5365 = vmatprep.mubr.msk.f32.mxu1 %vm5833_vm1, %v5832_v8 }
 0xb64   : > { %5363 = vmatprep.subr.mxu1 %v5832_v8  ;;  %5368 = vmatprep.subr.mxu0 %v5832_v8 }
 0xb65   : > { %5364 = vmatpush3.msra.mxu1 %v2151_v26  ;;  %v4960_v26 = vld [vmem:[%s6889_s5 + $0xb] ss:$0 sm:$0xff] }
 0xb66   : > { %5379 = vmatprep.subr.mxu1 %v5832_v8 }
 0xb67   : > { %v5689_v27 = vpop.eup %5688 }
 0xb68   : > { %v1911_v28 = vmul.f32 %v5689_v27, %v5681_v10 }
 0xb6a   : > { %5359 = vmatmul.mubr.msk.f32.vlgmr.msra.gmra.mxu0 %vm1233_vm4, %v1911_v28 }
 0xb6b   : > { %v5691_v29 = vpop.eup %5690  ;;  %5376 = vmatprep.mubr.msk.f32.mxu0 %vm5833_vm1, %v5832_v8  ;;  %5369 = vmatpush3.msra.mxu0 %v4931_v33 }
 0xb6c   : > { %v1912_v30 = vmul.f32 %v5691_v29, %v5683_v12  ;;  %5370 = vmatprep.subr.mxu0 %v5832_v8 }
 0xb6d   : > { %5371 = vmatpush3.msra.mxu0 %v4930_v35 }
 0xb6e   : > { %5366 = vmatmul.mubr.msk.f32.vlgmr.msra.gmra.mxu1 %vm1233_vm4, %v1912_v30  ;;  %5372 = vmatprep.subr.mxu0 %v5832_v8 }
 0xb6f   : > { %5387 = vmatprep.mubr.msk.f32.mxu1 %vm5833_vm1, %v5832_v8  ;;  %5373 = vmatpush3.msra.mxu0 %v4929_v37 }
 0xb70   : > { %5374 = vmatprep.subr.mxu0 %v5832_v8  ;;  %5380 = vmatpush3.msra.mxu1 %v2358_v63 }
 0xb71   : > { %5375 = vmatpush3.msra.mxu0 %v4928_v39  ;;  %5381 = vmatprep.subr.mxu1 %v5832_v8  ;;  %v4969_v39 = vld [vmem:[%s6887_s3 + $0x58] sm:$0xff] }
 0xb72   : > { %5390 = vmatprep.subr.mxu0 %v5832_v8 }
 0xbc6   : > { %v1988_v31 = vpop.f32.mrf.mxu1 }
 0xbc8   : > { %v5346_v32 = vpop.f32.mrf.mxu1 }
 0xc22   : > { %v2067_v38 = vpop.f32.mrf.mxu1 }
 0xc23   : > { %2230 = vrot.lane.b32.xlu0 %v2067_v38, %s6935_s26 }
 0xc24   : > { %v5353_v40 = vpop.f32.mrf.mxu1 }
 0xc25   : > { %v4968_v40 = vld [vmem:[%s6887_s3 + $0x50] sm:$0xff] }
 0xc2a   : > { %v2146_v41 = vpop.f32.mrf.mxu0 }
 0xc2b   : > { %2234 = vrot.lane.b32.xlu1 %v2146_v41, %s6936_s1  ;;  %v4967_v41 = vld [vmem:[%s6887_s3 + $0x48] sm:$0xff] }
 0xc2c   : > { %v5360_v42 = vpop.f32.mrf.mxu0 }
 0xc2d   : > { %v4966_v42 = vld [vmem:[%s6887_s3 + $0x40] sm:$0xff] }
 0xc2e   : > { %v2225_v43 = vpop.f32.mrf.mxu1 }
 0xc2f   : > { %2238 = vrot.lane.b32.xlu0 %v2225_v43, %s6937_s2 }
 0xc30   : > { %v5367_v44 = vpop.f32.mrf.mxu1 }
 0xc95   : > { %v2231_v45 = vpop.permute.xlu0 %2230 }
 0xc96   : > { %v2241_v47 = vsel %vm569_vm2, %v1988_v31, %v2231_v45 }
 0xc9d   : > { %v2235_v46 = vpop.permute.xlu1 %2234 }
 0xc9e   : > { %v2242_v48 = vsel %vm1233_vm4, %v2241_v47, %v2235_v46  ;;  %v4963_v47 = vld [vmem:[%s6889_s5 + $0xc] ss:$0 sm:$0xff] }
 0xca1   : > { %v2239_v49 = vpop.permute.xlu0 %2238 }
 0xca2   : > { %v2243_v51 = vsel %vm1235_vm5, %v2242_v48, %v2239_v49  ;;  %v4965_v49 = vld [vmem:[%s6889_s5 + $0xd] ss:$0 sm:$0xff] }
 0xca3   : > { %5377 = vmatmul.mubr.msk.f32.vlgmr.msra.gmra.mxu0 %vm437_vm0, %v2243_v51 }
 0xca4   : > { %5406 = vmatprep.mubr.msk.f32.mxu0 %vm5833_vm1, %v5832_v8  ;;  %5391 = vmatpush3.msra.mxu0 %v2448_v3 }
 0xca5   : > { %5392 = vmatprep.subr.mxu0 %v5832_v8 }
 0xca6   : > { %5393 = vmatpush3.msra.mxu0 %v2447_v4 }
 0xca7   : > { %5394 = vmatprep.subr.mxu0 %v5832_v8 }
 0xca8   : > { %5395 = vmatpush3.msra.mxu0 %v2446_v5 }
 0xca9   : > { %5396 = vmatprep.subr.mxu0 %v5832_v8 }
 0xcaa   : > { %5397 = vmatpush3.msra.mxu0 %v2445_v6 }
 0xcab   : > { %5398 = vmatprep.subr.mxu0 %v5832_v8 }
 0xcac   : > { %5399 = vmatpush3.msra.mxu0 %v2444_v7 }
 0xcad   : > { %5400 = vmatprep.subr.mxu0 %v5832_v8 }
 0xcae   : > { %5401 = vmatpush3.msra.mxu0 %v2443_v20 }
 0xcaf   : > { %5402 = vmatprep.subr.mxu0 %v5832_v8 }
 0xcb0   : > { %5403 = vmatpush3.msra.mxu0 %v2442_v21 }
 0xcb1   : > { %5404 = vmatprep.subr.mxu0 %v5832_v8 }
 0xcb2   : > { %5405 = vmatpush3.msra.mxu0 %v2441_v19 }
 0xcb3   : > { %5430 = vmatprep.subr.mxu0 %v5832_v8 }
 0xd63   : > { %v2319_v53 = vpop.f32.mrf.mxu0 }
 0xd64   : > { %v2320_v0 = vadd.f32 %v4950_v52, %v2319_v53  ;;  %v4971_v53 = vld [vmem:[%s6889_s5 + $0x12] ss:$0 sm:$0xff] }
 0xd65   : > { %v5378_v55 = vpop.f32.mrf.mxu0 }
 0xd66   : > { %v6322_v56 = vadd.f32 %v2320_v0, %v6111_v50  ;;  %v2357_v50 = vld [vmem:[%s6890_s6 + $0x10] sm:$0xff] }
 0xd67   : > { %5382 = vmatpush3.msra.mxu1 %v2357_v50 }
 0xd68   : > { %v2324_v57 = vsel %vm437_vm0, %v6322_v56, 0.0  ;;  %5383 = vmatprep.subr.mxu1 %v5832_v8 }
 0xd69   : > { %2325 = vadd.xlane.f32.xlu1 %v2324_v57  ;;  %5384 = vmatpush3.msra.mxu1 %v2356_v1 }
 0xd6a   : > { %5385 = vmatprep.subr.mxu1 %v5832_v8 }
 0xd6b   : > { %5386 = vmatpush3.msra.mxu1 %v2355_v2 }
 0xd6c   : > { %5409 = vmatprep.subr.mxu1 %v5832_v8 }
 0xdf2   : > { %v2326_v58 = vpop.xlane.xlu1 %2325 }
 0xdf3   : > { %v2327_v59 = vmul.f32 0.03125, %v2326_v58 }
 0xdf5   : > { %v2328_v60 = vsub.f32 %v6322_v56, %v2327_v59 }
 0xdf7   : > { %v2329_v61 = vmul.f32 %v2328_v60, %v2328_v60 }
 0xdf9   : > { %v2330_v62 = vsel %vm437_vm0, %v2329_v61, 0.0 }
 0xdfa   : > { %2331 = vadd.xlane.f32.xlu0 %v2330_v62 }
 0xe83   : > { %v2332_v9 = vpop.xlane.xlu0 %2331 }
 0xe84   : > { %v2333_v10 = vmul.f32 0.03125, %v2332_v9 }
 0xe86   : > { %v2334_v11 = vadd.f32 1e-05, %v2333_v10 }
 0xe88   : > { %5692 = vrsqrt.f32 %v2334_v11 }
 0xe95   : > { %v5693_v12 = vpop.eup %5692 }
 0xe96   : > { %v2336_v14 = vmul.f32 %v5693_v12, %v2328_v60 }
 0xe98   : > { %v2345_v16 = vmul.f32 %v4953_v13, %v2336_v14 }
 0xe9a   : > { %v2354_v17 = vadd.f32 %v4955_v15, %v2345_v16 }
 0xe9c   : > { %5388 = vmatmul.mubr.msk.f32.vlgmr.msra.gmra.mxu1 %vm437_vm0, %v2354_v17 }
 0xe9d   : > { %5417 = vmatprep.mubr.msk.f32.mxu1 %vm5833_vm1, %v5832_v8  ;;  %5410 = vmatpush3.msra.mxu1 %v4969_v39 }
 0xe9e   : > { %5411 = vmatprep.subr.mxu1 %v5832_v8 }
 0xe9f   : > { %5412 = vmatpush3.msra.mxu1 %v4968_v40 }
 0xea0   : > { %5413 = vmatprep.subr.mxu1 %v5832_v8 }
 0xea1   : > { %5414 = vmatpush3.msra.mxu1 %v4967_v41 }
 0xea2   : > { %5415 = vmatprep.subr.mxu1 %v5832_v8 }
 0xea3   : > { %5416 = vmatpush3.msra.mxu1 %v4966_v42 }
 0xea4   : > { %5420 = vmatprep.subr.mxu1 %v5832_v8 }
 0xf5c   : > { %v2436_v22 = vpop.f32.mrf.mxu1 }
 0xf5d   : > { %v2437_v23 = vadd.f32 %v4957_v18, %v2436_v22 }
 0xf5e   : > { %v5389_v24 = vpop.f32.mrf.mxu1 }
 0xf5f   : > { %v2440_v25 = vmax.f32 %v2437_v23, 0.0 }
 0xf61   : > { %5407 = vmatmul.mubr.msk.f32.vlgmr.msra.gmra.mxu0 %vm2457_vm6, %v2440_v25 }
 0xf62   : > { %5432 = vmatprep.mubr.msk.f32.mxu0 %vm5833_vm1, %v5832_v8 }
0x1021   : > { %v2527_v27 = vpop.f32.mrf.mxu0 }
0x1022   : > { %v2528_v28 = vadd.f32 %v4960_v26, %v2527_v27 }
0x1023   : > { %v5408_v29 = vpop.f32.mrf.mxu0 }
0x1024   : > { %v6395_v30 = vadd.f32 %v2528_v28, %v6322_v56 }
0x1026   : > { %v2532_v31 = vsel %vm437_vm0, %v6395_v30, 0.0 }
0x1027   : > { %2533 = vadd.xlane.f32.xlu0 %v2532_v31 }
0x10b0   : > { %v2534_v32 = vpop.xlane.xlu0 %2533 }
0x10b1   : > { %v2535_v33 = vmul.f32 0.03125, %v2534_v32 }
0x10b3   : > { %v2536_v35 = vsub.f32 %v6395_v30, %v2535_v33 }
0x10b5   : > { %v2537_v37 = vmul.f32 %v2536_v35, %v2536_v35 }
0x10b7   : > { %v2538_v38 = vsel %vm437_vm0, %v2537_v37, 0.0 }
0x10b8   : > { %2539 = vadd.xlane.f32.xlu1 %v2538_v38 }
0x1141   : > { %v2540_v43 = vpop.xlane.xlu1 %2539 }
0x1142   : > { %v2541_v44 = vmul.f32 0.03125, %v2540_v43 }
0x1144   : > { %v2542_v45 = vadd.f32 1e-05, %v2541_v44 }
0x1146   : > { %5694 = vrsqrt.f32 %v2542_v45 }
0x1153   : > { %v5695_v46 = vpop.eup %5694 }
0x1154   : > { %v2544_v48 = vmul.f32 %v5695_v46, %v2536_v35 }
0x1156   : > { %v2553_v51 = vmul.f32 %v4963_v47, %v2544_v48 }
0x1158   : > { %v2562_v52 = vadd.f32 %v4965_v49, %v2553_v51 }
0x115a   : > { %5418 = vmatmul.mubr.msk.f32.vlgmr.msra.gmra.mxu1 %vm437_vm0, %v2562_v52 }
0x115b   : > { %5422 = vmatprep.mubr.msk.f32.mxu1 %vm5833_vm1, %v5832_v8 }
0x121a   : > { %v2645_v0 = vpop.f32.mrf.mxu1 }
0x121b   : > { %v2646_v55 = vadd.f32 %v4971_v53, %v2645_v0 }
0x121c   : > { %v5419_v56 = vpop.f32.mrf.mxu1 }
0x121d   : > { %2659 = vrot.lane.b32.xlu1 %v2646_v55, %s6931_s16  ;;  %2657 = vrot.lane.b32.xlu0 %v2646_v55, %s6929_s14  ;;  %v4976_v56 = vld [vmem:[%s6888_s4 + $0x58] sm:$0xff] }
0x1221   : > { %2661 = vrot.lane.b32.xlu1 %v2646_v55, %s6930_s25  ;;  %2663 = vrot.lane.b32.xlu0 %v2646_v55, %s6932_s13 }
0x128f   : > { %v6433_v57 = vpop.permute.xlu1 %2659  ;;  %v6435_v58 = vpop.permute.xlu0 %2657 }
0x1290   : > { %2815 = vrot.lane.b32.xlu0 %v6433_v57, %s6932_s13  ;;  %2739 = vrot.lane.b32.xlu1 %v6435_v58, %s6932_s13 }
0x1293   : > { %v6441_v59 = vpop.permute.xlu1 %2661  ;;  %v2664_v60 = vpop.permute.xlu0 %2663 }
0x1294   : > { %2891 = vrot.lane.b32.xlu1 %v6441_v59, %s6932_s13  ;;  %5421 = vmatpush3.xpose.msk.msra.mxu1 %vm569_vm2, %v2664_v60  ;;  %v4974_v60 = vld [vmem:[%s6888_s4 + $0x48] sm:$0xff] }
0x1295   : > { %5425 = vmatprep.subr.mxu1 %v5832_v8 }
0x1297   : > { %5423 = vmatmul.mubr.msk.f32.vlgmr.msra.gmra.mxu1 %vm569_vm2, %v2646_v55 }
0x1298   : > { %5427 = vmatprep.mubr.msk.f32.mxu1 %vm5833_vm1, %v5832_v8 }
0x1302   : > { %v2740_v61 = vpop.permute.xlu1 %2739  ;;  %v2816_v62 = vpop.permute.xlu0 %2815 }
0x1303   : > { %5426 = vmatpush3.xpose.msk.msra.mxu1 %vm569_vm2, %v2740_v61  ;;  %5431 = vmatpush3.xpose.msk.msra.mxu0 %vm569_vm2, %v2816_v62  ;;  %v4973_v61 = vld [vmem:[%s6888_s4 + $0x40] sm:$0xff] }
0x1304   : > { %5435 = vmatprep.subr.mxu1 %v5832_v8  ;;  %5440 = vmatprep.subr.mxu0 %v5832_v8 }
0x1306   : > { %v2892_v63 = vpop.permute.xlu1 %2891  ;;  %5428 = vmatmul.mubr.msk.f32.vlgmr.msra.gmra.mxu1 %vm569_vm2, %v6435_v58  ;;  %5433 = vmatmul.mubr.msk.f32.vlgmr.msra.gmra.mxu0 %vm569_vm2, %v6433_v57 }
0x1307   : > { %5436 = vmatpush3.xpose.msk.msra.mxu1 %vm569_vm2, %v2892_v63  ;;  %5437 = vmatprep.mubr.msk.f32.mxu1 %vm5833_vm1, %v5832_v8 }
0x1308   : > { %5442 = vmatprep.mubr.msk.f32.mxu0 %vm5833_vm1, %v5832_v8  ;;  %5445 = vmatprep.subr.mxu1 %v5832_v8 }
0x130a   : > { %5438 = vmatmul.mubr.msk.f32.vlgmr.msra.gmra.mxu1 %vm569_vm2, %v6441_v59 }
0x130b   : > { %5447 = vmatprep.mubr.msk.f32.mxu1 %vm5833_vm1, %v5832_v8 }
0x1357   : > { %v2735_v50 = vpop.f32.mrf.mxu1 }
0x1358   : > { %v2736_v1 = vadd.f32 %v2735_v50, %v6047_v36 }
0x1359   : > { %v5424_v2 = vpop.f32.mrf.mxu1 }
0x135a   : > { %v2967_v3 = vsel %vm569_vm2, %v2736_v1, -inf }
0x135b   : > { %2968 = vmax.xlane.f32.xlu0 %v2967_v3 }
0x13c6   : > { %v2811_v4 = vpop.f32.mrf.mxu1  ;;  %v2887_v5 = vpop.f32.mrf.mxu0 }
0x13c7   : > { %v2812_v6 = vadd.f32 %v2811_v4, %v6047_v36  ;;  %v2888_v7 = vadd.f32 %v2887_v5, %v6047_v36 }
0x13c8   : > { %v5429_v9 = vpop.f32.mrf.mxu1  ;;  %v5434_v10 = vpop.f32.mrf.mxu0 }
0x13c9   : > { %v2970_v11 = vsel %vm569_vm2, %v2812_v6, -inf  ;;  %v2973_v12 = vsel %vm569_vm2, %v2888_v7, -inf }
0x13ca   : > { %2971 = vmax.xlane.f32.xlu1 %v2970_v11  ;;  %v2963_v13 = vpop.f32.mrf.mxu1  ;;  %2974 = vmax.xlane.f32.xlu0 %v2973_v12  ;;  %v4990_v11 = vld [vmem:[%s6889_s5 + $0x13] ss:$0 sm:$0xff] }
0x13cb   : > { %v2964_v14 = vadd.f32 %v2963_v13, %v6047_v36 }
0x13cc   : > { %v5439_v15 = vpop.f32.mrf.mxu1 }
0x13cd   : > { %v2976_v16 = vsel %vm569_vm2, %v2964_v14, -inf }
0x13ce   : > { %2977 = vmax.xlane.f32.xlu0 %v2976_v16 }
0x13db   : > { %3011 = vrot.lane.b32.xlu1 %v2646_v55, %s6934_s29 }
0x13e4   : > { %v2969_v17 = vpop.xlane.xlu0 %2968 }
0x13e5   : > { %v2979_v20 = vsub.f32 %v2736_v1, %v2969_v17  ;;  %v4999_v17 = vld [vmem:[%s6887_s3 + $0x78] sm:$0xff] }
0x13e7   : > { %v2983_v21 = vmul.f32 1.442695, %v2979_v20  ;;  %v4996_v20 = vld [vmem:[%s6887_s3 + $0x60] sm:$0xff] }
0x13e9   : > { %5696 = vpow2.f32 %v2983_v21  ;;  %v5738_v21 = vld [vmem:[%s6125_s30 + $0x8] sm:$0xff]  ;;  %s5058_s30 = sshll.u32 %s5926_s21, 7 }
0x13ea   : > { %s4771_s19 = scalar_lea.hbm %s6895_s11, %s5058_s30 }
0x13f6   : > { %v5697_v19 = vpop.eup %5696 }
0x13f7   : > { %v2991_v18 = vsel %vm569_vm2, %v5697_v19, 0.0 }
0x13ff   : > { %2992 = vadd.xlane.f32.xlu1 %v2991_v18 }
0x1453   : > { %v2972_v22 = vpop.xlane.xlu1 %2971  ;;  %v2975_v23 = vpop.xlane.xlu0 %2974 }
0x1454   : > { %v2980_v24 = vsub.f32 %v2812_v6, %v2972_v22  ;;  %v2981_v25 = vsub.f32 %v2888_v7, %v2975_v23 }
0x1456   : > { %v2985_v26 = vmul.f32 1.442695, %v2980_v24  ;;  %v2987_v36 = vmul.f32 1.442695, %v2981_v25 }
0x1457   : > { %v3012_v27 = vpop.permute.xlu1 %3011  ;;  %v2978_v28 = vpop.xlane.xlu0 %2977 }
0x1458   : > { %5698 = vpow2.f32 %v2985_v26  ;;  %v2982_v29 = vsub.f32 %v2964_v14, %v2978_v28  ;;  %5441 = vmatpush3.msra.mxu0 %v3012_v27  ;;  %v5001_v26 = vld [vmem:[%s6889_s5 + $0x14] ss:$0 sm:$0xff] }
0x1459   : > { %5700 = vpow2.f32 %v2987_v36  ;;  %5450 = vmatprep.subr.mxu0 %v5832_v8 }
0x145a   : > { %v2989_v31 = vmul.f32 1.442695, %v2982_v29 }
0x145c   : > { %5702 = vpow2.f32 %v2989_v31 }
0x1465   : > { %v5699_v32 = vpop.eup %5698 }
0x1466   : > { %v5701_v33 = vpop.eup %5700  ;;  %v2994_v35 = vsel %vm569_vm2, %v5699_v32, 0.0 }
0x1467   : > { %2995 = vadd.xlane.f32.xlu0 %v2994_v35  ;;  %v2997_v37 = vsel %vm569_vm2, %v5701_v33, 0.0  ;;  %v4993_v35 = vld [vmem:[%s6889_s5 + $0xe] ss:$0 sm:$0xff] }
0x1468   : > { %2998 = vadd.xlane.f32.xlu1 %v2997_v37 }
0x1469   : > { %v5703_v38 = vpop.eup %5702 }
0x146a   : > { %v3000_v39 = vsel %vm569_vm2, %v5703_v38, 0.0 }
0x146b   : > { %3001 = vadd.xlane.f32.xlu0 %v3000_v39 }
0x1479   : > { %3163 = vrot.lane.b32.xlu1 %v6433_v57, %s6934_s29 }
0x147d   : > { %3239 = vrot.lane.b32.xlu1 %v6441_v59, %s6934_s29  ;;  %v4975_v59 = vld [vmem:[%s6888_s4 + $0x50] sm:$0xff] }
0x1481   : > { %3087 = vrot.lane.b32.xlu0 %v6435_v58, %s6934_s29 }
0x1488   : > { %v2993_v40 = vpop.xlane.xlu1 %2992 }
0x1489   : > { %5704 = vrcp.f32 %v2993_v40 }
0x1496   : > { %v5705_v41 = vpop.eup %5704 }
0x1497   : > { %v3007_v42 = vmul.f32 %v5705_v41, %v5697_v19 }
0x1499   : > { %5443 = vmatmul.mubr.msk.f32.vlgmr.msra.gmra.mxu0 %vm569_vm2, %v3007_v42 }
0x149a   : > { %5452 = vmatprep.mubr.msk.f32.mxu0 %vm5833_vm1, %v5832_v8 }
0x14f0   : > { %v2996_v43 = vpop.xlane.xlu0 %2995 }
0x14f1   : > { %v2999_v44 = vpop.xlane.xlu1 %2998  ;;  %5706 = vrcp.f32 %v2996_v43 }
0x14f2   : > { %5708 = vrcp.f32 %v2999_v44 }
0x14f4   : > { %v3002_v45 = vpop.xlane.xlu0 %3001 }
0x14f5   : > { %v3164_v46 = vpop.permute.xlu1 %3163  ;;  %5710 = vrcp.f32 %v3002_v45 }
0x14f6   : > { %5451 = vmatpush3.msra.mxu0 %v3164_v46 }
0x14f7   : > { %5460 = vmatprep.subr.mxu0 %v5832_v8 }
0x14f8   : > { %v3088_v47 = vpop.permute.xlu0 %3087 }
0x14f9   : > { %5446 = vmatpush3.msra.mxu1 %v3088_v47  ;;  %v3240_v53 = vpop.permute.xlu1 %3239 }
0x14fa   : > { %5455 = vmatprep.subr.mxu1 %v5832_v8 }
0x14fe   : > { %v5707_v48 = vpop.eup %5706 }
0x14ff   : > { %v5709_v49 = vpop.eup %5708  ;;  %v3008_v51 = vmul.f32 %v5707_v48, %v5699_v32 }
0x1500   : > { %v3009_v52 = vmul.f32 %v5709_v49, %v5701_v33 }
0x1501   : > { %5448 = vmatmul.mubr.msk.f32.vlgmr.msra.gmra.mxu1 %vm569_vm2, %v3008_v51 }
0x1502   : > { %v5711_v0 = vpop.eup %5710  ;;  %5453 = vmatmul.mubr.msk.f32.vlgmr.msra.gmra.mxu0 %vm569_vm2, %v3009_v52  ;;  %5456 = vmatpush3.msra.mxu1 %v3240_v53 }
0x1503   : > { %5457 = vmatprep.mubr.msk.f32.mxu1 %vm5833_vm1, %v5832_v8  ;;  %v3010_v55 = vmul.f32 %v5711_v0, %v5703_v38  ;;  %5468 = vmatprep.mubr.msk.f32.mxu0 %vm5833_vm1, %v5832_v8  ;;  %v4995_v38 = vld [vmem:[%s6889_s5 + $0xf] ss:$0 sm:$0xff] }
0x1504   : > { %5471 = vmatprep.subr.mxu1 %v5832_v8  ;;  %5461 = vmatpush3.msra.mxu0 %v4976_v56 }
0x1505   : > { %5458 = vmatmul.mubr.msk.f32.vlgmr.msra.gmra.mxu1 %vm569_vm2, %v3010_v55  ;;  %5462 = vmatprep.subr.mxu0 %v5832_v8 }
0x1506   : > { %5479 = vmatprep.mubr.msk.f32.mxu1 %vm5833_vm1, %v5832_v8  ;;  %5463 = vmatpush3.msra.mxu0 %v4975_v59 }
0x1507   : > { %5464 = vmatprep.subr.mxu0 %v5832_v8  ;;  %5472 = vmatpush3.msra.mxu1 %v4999_v17 }
0x1508   : > { %5465 = vmatpush3.msra.mxu0 %v4974_v60  ;;  %5473 = vmatprep.subr.mxu1 %v5832_v8 }
0x1509   : > { %5466 = vmatprep.subr.mxu0 %v5832_v8 }
0x150a   : > { %5467 = vmatpush3.msra.mxu0 %v4973_v61 }
0x150b   : > { %5482 = vmatprep.subr.mxu0 %v4999_v17 }
0x1559   : > { %v3083_v57 = vpop.f32.mrf.mxu0 }
0x155b   : > { %v5444_v58 = vpop.f32.mrf.mxu0 }
0x15c1   : > { %v3159_v62 = vpop.f32.mrf.mxu1 }
0x15c2   : > { %v3235_v63 = vpop.f32.mrf.mxu0  ;;  %3316 = vrot.lane.b32.xlu0 %v3159_v62, %s6935_s26 }
0x15c3   : > { %3320 = vrot.lane.b32.xlu1 %v3235_v63, %s6936_s1  ;;  %v5449_v50 = vpop.f32.mrf.mxu1 }
0x15c4   : > { %v5454_v1 = vpop.f32.mrf.mxu0 }
0x15c5   : > { %v3311_v2 = vpop.f32.mrf.mxu1 }
0x15c6   : > { %3324 = vrot.lane.b32.xlu0 %v3311_v2, %s6937_s2 }
0x15c7   : > { %v5459_v3 = vpop.f32.mrf.mxu1 }
0x15c8   : > { %v5739_v3 = vld [vmem:[%s6240_s22] ss:$0 sm:$0xff] }
0x1634   : > { %v3317_v4 = vpop.permute.xlu0 %3316 }
0x1635   : > { %v3327_v5 = vsel %vm569_vm2, %v3083_v57, %v3317_v4  ;;  %v3321_v6 = vpop.permute.xlu1 %3320 }
0x1636   : > { %v3328_v7 = vsel %vm1233_vm4, %v3327_v5, %v3321_v6 }
0x1638   : > { %v3325_v9 = vpop.permute.xlu0 %3324 }
0x1639   : > { %v3329_v10 = vsel %vm1235_vm5, %v3328_v7, %v3325_v9 }
0x163a   : > { %5469 = vmatmul.mubr.msk.f32.vlgmr.msra.gmra.mxu0 %vm437_vm0, %v3329_v10 }
0x163b   : > { %5490 = vmatprep.mubr.msk.f32.mxu0 %vm437_vm0, %v6131_v54  ;;  %v4998_v54 = vld [vmem:[%s6887_s3 + $0x70] sm:$0xff]  ;;  %5483 = vmatpush3.msra.mxu0 %v4999_v17 }
0x163c   : > { %5484 = vmatprep.subr.mxu0 %v4998_v54  ;;  %5474 = vmatpush3.msra.mxu1 %v4998_v54 }
0x163d   : > { %5485 = vmatpush3.msra.mxu0 %v4998_v54  ;;  %5475 = vmatprep.subr.mxu1 %v5832_v8 }
0x16fa   : > { %v3405_v12 = vpop.f32.mrf.mxu0 }
0x16fb   : > { %v3406_v13 = vadd.f32 %v4990_v11, %v3405_v12 }
0x16fc   : > { %v5470_v14 = vpop.f32.mrf.mxu0 }
0x16fd   : > { %v6531_v15 = vadd.f32 %v3406_v13, %v6395_v30  ;;  %v4997_v30 = vld [vmem:[%s6887_s3 + $0x68] sm:$0xff] }
0x16fe   : > { %5486 = vmatprep.subr.mxu0 %v4997_v30  ;;  %5476 = vmatpush3.msra.mxu1 %v4997_v30 }
0x16ff   : > { %v3410_v16 = vsel %vm437_vm0, %v6531_v15, 0.0  ;;  %5487 = vmatpush3.msra.mxu0 %v4997_v30  ;;  %5477 = vmatprep.subr.mxu1 %v5832_v8 }
0x1700   : > { %3411 = vadd.xlane.f32.xlu1 %v3410_v16  ;;  %5488 = vmatprep.subr.mxu0 %v4996_v20 }
0x1701   : > { %5478 = vmatpush3.msra.mxu1 %v4996_v20  ;;  %5489 = vmatpush3.msra.mxu0 %v4996_v20 }
0x1702   : > { %5493 = vmatprep.subr.mxu1 %v5832_v8  ;;  %5491 = vmatmul.mubr.msk.f32.vlgmr.msra.gmra.mxu0 %vm437_vm0, %v5738_v21 }
0x1703   : > { %5500 = vmatprep.subr.mxu0 %v5832_v8  ;;  %5504 = vmatprep.mubr.msk.f32.mxu0 %vm5833_vm1, %v5832_v8 }
0x1789   : > { %v3412_v19 = vpop.xlane.xlu1 %3411 }
0x178a   : > { %v3413_v18 = vmul.f32 0.03125, %v3412_v19 }
0x178c   : > { %v3414_v22 = vsub.f32 %v6531_v15, %v3413_v18 }
0x178e   : > { %v3415_v23 = vmul.f32 %v3414_v22, %v3414_v22 }
0x1790   : > { %v3416_v24 = vsel %vm437_vm0, %v3415_v23, 0.0 }
0x1791   : > { %3417 = vadd.xlane.f32.xlu0 %v3416_v24 }
0x17c2   : > { %v5492_v25 = vpop.f32.mrf.mxu0 }
0x17c3   : > { %v6561_v36 = vadd.f32 %v5492_v25, %v5001_v26 }
0x17c4   : > { %v3593_v27 = vpop.f32.mrf.mxu0 }
0x17c5   : > { %v6563_v28 = vadd.f32 %v5001_v26, %v3593_v27  ;;  %3620 = vrot.lane.b32.xlu0 %v6561_v36, %s6929_s14 }
0x17c7   : > { %3618 = vrot.lane.b32.xlu1 %v6563_v28, %s6929_s14 }
0x17c9   : > { %3628 = vrot.lane.b32.xlu0 %v6561_v36, %s6930_s25 }
0x17cb   : > { %3624 = vrot.lane.b32.xlu1 %v6561_v36, %s6931_s16 }
0x17cd   : > { %3626 = vrot.lane.b32.xlu0 %v6563_v28, %s6930_s25 }
0x17cf   : > { %3622 = vrot.lane.b32.xlu1 %v6563_v28, %s6931_s16 }
0x17d3   : > { %3632 = vrot.lane.b32.xlu1 %v6561_v36, %s6932_s13 }
0x17d7   : > { %3630 = vrot.lane.b32.xlu1 %v6563_v28, %s6932_s13 }
0x181a   : > { %v3418_v29 = vpop.xlane.xlu0 %3417 }
0x181b   : > { %v3419_v31 = vmul.f32 0.03125, %v3418_v29 }
0x181d   : > { %v3420_v32 = vadd.f32 1e-05, %v3419_v31 }
0x181f   : > { %5712 = vrsqrt.f32 %v3420_v32 }
0x182c   : > { %v5713_v33 = vpop.eup %5712 }
0x182d   : > { %v3422_v37 = vmul.f32 %v5713_v33, %v3414_v22 }
0x182f   : > { %v3431_v39 = vmul.f32 %v4993_v35, %v3422_v37 }
0x1831   : > { %v3440_v40 = vadd.f32 %v4995_v38, %v3431_v39 }
0x1833   : > { %5480 = vmatmul.mubr.msk.f32.vlgmr.msra.gmra.mxu1 %vm437_vm0, %v3440_v40 }
0x1834   : > { %5497 = vmatprep.mubr.msk.f32.mxu1 %vm5833_vm1, %v5832_v8 }
0x1837   : > { %v6590_v41 = vpop.permute.xlu0 %3620 }
0x1838   : > { %3712 = vrot.lane.b32.xlu0 %v6590_v41, %s6932_s13 }
0x1839   : > { %v6594_v42 = vpop.permute.xlu1 %3618 }
0x183b   : > { %v6600_v44 = vpop.permute.xlu0 %3628 }
0x183c   : > { %3710 = vrot.lane.b32.xlu0 %v6594_v42, %s6932_s13 }
0x183d   : > { %v6598_v43 = vpop.permute.xlu1 %3624 }
0x183e   : > { %3792 = vrot.lane.b32.xlu1 %v6598_v43, %s6932_s13 }
0x183f   : > { %v6608_v46 = vpop.permute.xlu0 %3626 }
0x1841   : > { %v6604_v45 = vpop.permute.xlu1 %3622 }
0x1842   : > { %3872 = vrot.lane.b32.xlu1 %v6600_v44, %s6932_s13 }
0x1845   : > { %v3633_v47 = vpop.permute.xlu1 %3632 }
0x1846   : > { %5494 = vmatpush3.xpose.msk.msra.mxu1 %vm569_vm2, %v3633_v47  ;;  %3870 = vrot.lane.b32.xlu1 %v6608_v46, %s6932_s13 }
0x1847   : > { %5495 = vmatprep.subr.mxu1 %v5832_v8 }
0x1849   : > { %v3631_v48 = vpop.permute.xlu1 %3630 }
0x184a   : > { %5496 = vmatpush3.xpose.msk.msra.mxu1 %vm569_vm2, %v3631_v48 }
0x184b   : > { %5507 = vmatprep.subr.mxu1 %v5832_v8 }
0x18aa   : > { %v3713_v49 = vpop.permute.xlu0 %3712 }
0x18ab   : > { %5501 = vmatpush3.xpose.msk.msra.mxu0 %vm569_vm2, %v3713_v49 }
0x18ac   : > { %5502 = vmatprep.subr.mxu0 %v5832_v8 }
0x18ae   : > { %v3711_v51 = vpop.permute.xlu0 %3710 }
0x18af   : > { %5503 = vmatpush3.xpose.msk.msra.mxu0 %vm569_vm2, %v3711_v51 }
0x18b0   : > { %5514 = vmatprep.subr.mxu0 %v5832_v8  ;;  %v3793_v55 = vpop.permute.xlu1 %3792 }
0x18b4   : > { %v3873_v56 = vpop.permute.xlu1 %3872 }
0x18b8   : > { %v3871_v58 = vpop.permute.xlu1 %3870 }
0x18f3   : > { %v3523_v52 = vpop.f32.mrf.mxu1 }
0x18f4   : > { %v3524_v53 = vadd.f32 %v5001_v26, %v3523_v52 }
0x18f5   : > { %v5481_v0 = vpop.f32.mrf.mxu1 }
0x18f6   : > { %3610 = vrot.lane.b32.xlu0 %v3524_v53, %s6929_s14  ;;  %3614 = vrot.lane.b32.xlu1 %v3524_v53, %s6930_s25  ;;  %s6675_s14 = sand.u32 1, %s5822_s18  }
0x18f7   : > { %5498 = vmatmul.mubr.msk.f32.vlgmr.msra.gmra.mxu1 %vm569_vm2, %v3524_v53  ;;  %s4889_s25 = sshll.u32 %s6675_s14, 3  ;;  %s4747_s22 = scalar_lea.sflag [#allocation5], %s6675_s14 }
0x18f8   : > { %5508 = vmatpush3.xpose.msk.msra.mxu1 %vm569_vm2, %v3793_v55  ;;  %5511 = vmatprep.mubr.msk.f32.mxu1 %vm5833_vm1, %v5832_v8 }
0x18f9   : > { %5509 = vmatprep.subr.mxu1 %v5832_v8 }
0x18fa   : > { %3790 = vrot.lane.b32.xlu0 %v6604_v45, %s6932_s13 }
0x18fe   : > { %3612 = vrot.lane.b32.xlu0 %v3524_v53, %s6931_s16  ;;  %s6684_s16 = scalar_lea.vmem [#allocation4], %s4889_s25 }
0x18ff   : > { %s4773_s13 = sshll.u32 %s6684_s16, 4  ;;  %s4774_s13 = int_to_ptr.vmem [resolvable:$true] %s4773_s13 }
0x1900   : > { %p5747_p0 = scmp.lt.s32.totalorder %s4774_s13, %s5745_s23 }
0x1968   : > { %v3611_v57 = vpop.permute.xlu0 %3610  ;;  %v3615_v60 = vpop.permute.xlu1 %3614 }
0x1969   : > { %5505 = vmatmul.mubr.msk.f32.vlgmr.msra.gmra.mxu0 %vm569_vm2, %v3611_v57 }
0x196a   : > { %5515 = vmatpush3.xpose.msk.msra.mxu0 %vm569_vm2, %v3873_v56  ;;  %5518 = vmatprep.mubr.msk.f32.mxu0 %vm5833_vm1, %v5832_v8 }
0x196b   : > { %5516 = vmatprep.subr.mxu0 %v5832_v8 }
0x196c   : > { %v3791_v59 = vpop.permute.xlu0 %3790 }
0x196d   : > { %5510 = vmatpush3.xpose.msk.msra.mxu1 %vm569_vm2, %v3791_v59 }
0x196e   : > { %5517 = vmatpush3.xpose.msk.msra.mxu0 %vm569_vm2, %v3871_v58  ;;  %5521 = vmatprep.subr.mxu1 %v5832_v8 }
0x196f   : > { %5535 = vmatprep.subr.mxu0 %v5832_v8 }
0x1970   : > { %v3613_v61 = vpop.permute.xlu0 %3612 }
0x1971   : > { %5519 = vmatmul.mubr.msk.f32.vlgmr.msra.gmra.mxu0 %vm569_vm2, %v3615_v60  ;;  %5512 = vmatmul.mubr.msk.f32.vlgmr.msra.gmra.mxu1 %vm569_vm2, %v3613_v61  ;;  %v5008_v60 = vld [vmem:[%s6888_s4 + $0x78] sm:$0xff]  ;;  %v5007_v61 = vld [vmem:[%s6888_s4 + $0x70] sm:$0xff] }
0x1972   : > { %5525 = vmatprep.mubr.msk.f32.mxu1 %vm5833_vm1, %v5832_v8  ;;  %5539 = vmatprep.mubr.msk.f32.mxu0 %vm5833_vm1, %v5832_v8 }
0x19b7   : > { %v3706_v62 = vpop.f32.mrf.mxu1 }
0x19b8   : > { %v3707_v63 = vadd.f32 %v6243_v34, %v3706_v62  ;;  %v5006_v62 = vld [vmem:[%s6888_s4 + $0x68] sm:$0xff] }
0x19b9   : > { %v5499_v50 = vpop.f32.mrf.mxu1 }
0x19ba   : > { %v3950_v1 = vsel %vm1233_vm4, %v3707_v63, -inf  ;;  %v5005_v50 = vld [vmem:[%s6888_s4 + $0x60] sm:$0xff] }
0x19bb   : > { %3951 = vmax.xlane.f32.xlu0 %v3950_v1 }
0x1a29   : > { %v3786_v2 = vpop.f32.mrf.mxu0 }
0x1a2a   : > { %v3787_v4 = vadd.f32 %v5739_v3, %v3786_v2 }
0x1a2b   : > { %v5506_v5 = vpop.f32.mrf.mxu0 }
0x1a2c   : > { %v3953_v6 = vsel %vm1233_vm4, %v3787_v4, -inf }
0x1a2d   : > { %3954 = vmax.xlane.f32.xlu1 %v3953_v6 }
0x1a31   : > { %v3946_v7 = vpop.f32.mrf.mxu0  ;;  %v3866_v9 = vpop.f32.mrf.mxu1 }
0x1a32   : > { %v3867_v10 = vadd.f32 %v5739_v3, %v3866_v9  ;;  %v3947_v13 = vadd.f32 %v5739_v3, %v3946_v7 }
0x1a33   : > { %v5520_v11 = vpop.f32.mrf.mxu0  ;;  %v5513_v12 = vpop.f32.mrf.mxu1 }
0x1a34   : > { %v3956_v14 = vsel %vm1233_vm4, %v3867_v10, -inf  ;;  %v3959_v34 = vsel %vm1233_vm4, %v3947_v13, -inf }
0x1a35   : > { %3957 = vmax.xlane.f32.xlu0 %v3956_v14 }
0x1a39   : > { %3960 = vmax.xlane.f32.xlu0 %v3959_v34 }
0x1a3e   : > { %3996 = vrot.lane.b32.xlu1 %v6561_v36, %s6934_s29 }
0x1a42   : > { %4075 = vrot.lane.b32.xlu1 %v6590_v41, %s6934_s29 }
0x1a44   : > { %v3952_v16 = vpop.xlane.xlu0 %3951 }
0x1a45   : > { %v3962_v17 = vsub.f32 %v3707_v63, %v3952_v16 }
0x1a46   : > { %4073 = vrot.lane.b32.xlu1 %v6594_v42, %s6934_s29 }
0x1a47   : > { %v3966_v54 = vmul.f32 1.442695, %v3962_v17 }
0x1a49   : > { %5714 = vpow2.f32 %v3966_v54 }
0x1a4a   : > { %4233 = vrot.lane.b32.xlu1 %v6600_v44, %s6934_s29 }
0x1a4f   : > { %3994 = vrot.lane.b32.xlu0 %v6563_v28, %s6934_s29 }
0x1a53   : > { %4154 = vrot.lane.b32.xlu0 %v6598_v43, %s6934_s29 }
0x1a56   : > { %v5715_v30 = vpop.eup %5714 }
0x1a57   : > { %v3974_v20 = vsel %vm1233_vm4, %v5715_v30, 0.0 }
0x1a6e   : > { %3975 = vadd.xlane.f32.xlu1 %v3974_v20 }
0x1ab6   : > { %v3955_v21 = vpop.xlane.xlu1 %3954 }
0x1ab7   : > { %v3963_v19 = vsub.f32 %v3787_v4, %v3955_v21 }
0x1ab9   : > { %v3968_v18 = vmul.f32 1.442695, %v3963_v19 }
0x1aba   : > { %v3997_v22 = vpop.permute.xlu1 %3996 }
0x1abb   : > { %5716 = vpow2.f32 %v3968_v18  ;;  %5522 = vmatpush3.msra.mxu1 %v3997_v22  ;;  %v5035_v22 = vld [vmem:[%s6890_s6 + $0x38] sm:$0xff] }
0x1abc   : > { %5523 = vmatprep.subr.mxu1 %v5832_v8 }
0x1abe   : > { %v3958_v23 = vpop.xlane.xlu0 %3957  ;;  %v4076_v39 = vpop.permute.xlu1 %4075 }
0x1abf   : > { %v3964_v24 = vsub.f32 %v3867_v10, %v3958_v23  ;;  %v5033_v23 = vld [vmem:[%s6890_s6 + $0x28] sm:$0xff] }
0x1ac1   : > { %v3970_v25 = vmul.f32 1.442695, %v3964_v24  ;;  %v5032_v24 = vld [vmem:[%s6890_s6 + $0x20] sm:$0xff] }
0x1ac2   : > { %v3961_v26 = vpop.xlane.xlu0 %3960  ;;  %v4074_v40 = vpop.permute.xlu1 %4073 }
0x1ac3   : > { %5718 = vpow2.f32 %v3970_v25  ;;  %v3965_v36 = vsub.f32 %v3947_v13, %v3961_v26  ;;  %v5026_v13 = vld [vmem:[%s6889_s5 + $0x15] ss:$0 sm:$0xff]  ;;  %v5046_v25 = vld [vmem:[%s6891_s7 + $0x78] sm:$0xff] }
0x1ac4   : > { %v5045_v26 = vld [vmem:[%s6891_s7 + $0x70] sm:$0xff] }
0x1ac5   : > { %v3972_v27 = vmul.f32 1.442695, %v3965_v36  ;;  %v5044_v36 = vld [vmem:[%s6891_s7 + $0x68] sm:$0xff] }
0x1ac6   : > { %v3995_v28 = vpop.permute.xlu0 %3994  ;;  %v4234_v41 = vpop.permute.xlu1 %4233 }
0x1ac7   : > { %5720 = vpow2.f32 %v3972_v27  ;;  %5524 = vmatpush3.msra.mxu1 %v3995_v28  ;;  %v5043_v27 = vld [vmem:[%s6891_s7 + $0x60] sm:$0xff]  ;;  %v5042_v28 = vld [vmem:[%s6891_s7 + $0x58] sm:$0xff] }
0x1ac8   : > { %v5717_v29 = vpop.eup %5716  ;;  %5528 = vmatprep.subr.mxu1 %v5832_v8 }
0x1ac9   : > { %v3977_v31 = vsel %vm1233_vm4, %v5717_v29, 0.0 }
0x1aca   : > { %v4155_v32 = vpop.permute.xlu0 %4154  ;;  %3978 = vadd.xlane.f32.xlu0 %v3977_v31 }
0x1acb   : > { %5536 = vmatpush3.msra.mxu0 %v4155_v32 }
0x1acc   : > { %5537 = vmatprep.subr.mxu0 %v5832_v8 }
0x1ad0   : > { %v5719_v33 = vpop.eup %5718 }
0x1ad1   : > { %v3980_v35 = vsel %vm1233_vm4, %v5719_v33, 0.0 }
0x1ad2   : > { %3981 = vadd.xlane.f32.xlu1 %v3980_v35  ;;  %v5029_v35 = vld [vmem:[%s6889_s5 + $0x10] ss:$0 sm:$0xff] }
0x1ad4   : > { %v5721_v37 = vpop.eup %5720 }
0x1ad5   : > { %v3983_v38 = vsel %vm1233_vm4, %v5721_v37, 0.0 }
0x1ad6   : > { %3984 = vadd.xlane.f32.xlu0 %v3983_v38  ;;  %v5031_v38 = vld [vmem:[%s6889_s5 + $0x11] ss:$0 sm:$0xff] }
0x1ae3   : > { %4231 = vrot.lane.b32.xlu1 %v6608_v46, %s6934_s29 }
0x1aec   : > { %4152 = vrot.lane.b32.xlu0 %v6604_v45, %s6934_s29  ;;  %s5740_s29 = scalar_lea.vmem %s4774_s13, 128 }
0x1aed   : > { %p5741_p11 = scmp.ne.s32.totalorder %s4774_s13, %s5740_s29  ;;  %p5748_p1 = scmp.lt.s32.totalorder %s5746_s28, %s5740_s29 }
0x1aef   : > { %p5742_p12 = pnand %p5741_p11, %p5943_p5  ;;  %p5749_p2 = por %p5748_p1, %p5747_p0 }
0x1af1   : > { %p5743_p13 = pneg %p5742_p12 }
0x1af3   : > { %p5750_p3 = pnand %p5749_p2, %p5743_p13 }
0x1af7   : > { %v3976_v42 = vpop.xlane.xlu1 %3975 }
0x1af8   : > { %5722 = vrcp.f32 %v3976_v42  ;;  %v5040_v42 = vld [vmem:[%s6891_s7 + $0x48] sm:$0xff] }
0x1b05   : > { %v5723_v43 = vpop.eup %5722 }
0x1b06   : > { %v3990_v44 = vmul.f32 %v5723_v43, %v5715_v30  ;;  %v5039_v43 = vld [vmem:[%s6891_s7 + $0x40] sm:$0xff] }
0x1b08   : > { %5526 = vmatmul.mubr.msk.f32.vlgmr.msra.gmra.mxu1 %vm1233_vm4, %v3990_v44  ;;  %v4739_v47 = vsel %vm1233_vm4, %v3990_v44, 0.0  ;;  %v5037_v44 = vld [vmem:[%s6889_s5 + $0x16] ss:$0 sm:$0xff] }
0x1b09   : > { %5529 = vmatpush3.msra.mxu1 %v4076_v39  ;;  %5532 = vmatprep.mubr.msk.f32.mxu1 %vm5833_vm1, %v5832_v8  ;;  %4740 = vst [vmem:[%s6684_s16] sm:$0xff] %v4739_v47 }
0x1b0a   : > { %5530 = vmatprep.subr.mxu1 %v5832_v8 }
0x1b0b   : > { %5531 = vmatpush3.msra.mxu1 %v4074_v40 }
0x1b0c   : > { %5542 = vmatprep.subr.mxu1 %v5832_v8 }
0x1b53   : > { %v3979_v45 = vpop.xlane.xlu0 %3978 }
0x1b54   : > { %5724 = vrcp.f32 %v3979_v45 }
0x1b5b   : > { %v3982_v46 = vpop.xlane.xlu1 %3981 }
0x1b5c   : > { %5726 = vrcp.f32 %v3982_v46 }
0x1b5f   : > { %v3985_v48 = vpop.xlane.xlu0 %3984  ;;  %v4232_v53 = vpop.permute.xlu1 %4231 }
0x1b60   : > { %5728 = vrcp.f32 %v3985_v48 }
0x1b61   : > { %v5725_v49 = vpop.eup %5724 }
0x1b62   : > { %v3991_v51 = vmul.f32 %v5725_v49, %v5717_v29  ;;  %v5048_v49 = vld [vmem:[%s6889_s5 + $0x17] ss:$0 sm:$0xff] }
0x1b63   : > { %v4153_v52 = vpop.permute.xlu0 %4152 }
0x1b64   : > { %5533 = vmatmul.mubr.msk.f32.vlgmr.msra.gmra.mxu1 %vm1233_vm4, %v3991_v51  ;;  %5538 = vmatpush3.msra.mxu0 %v4153_v52 }
0x1b65   : > { %5543 = vmatpush3.msra.mxu1 %v4234_v41  ;;  %5546 = vmatprep.mubr.msk.f32.mxu1 %vm5833_vm1, %v5832_v8  ;;  %v5041_v41 = vld [vmem:[%s6891_s7 + $0x50] sm:$0xff] }
0x1b66   : > { %5544 = vmatprep.subr.mxu1 %v5832_v8  ;;  %5549 = vmatprep.subr.mxu0 %v5832_v8 }
0x1b67   : > { %5545 = vmatpush3.msra.mxu1 %v4232_v53 }
0x1b68   : > { %5560 = vmatprep.subr.mxu1 %v5832_v8 }
0x1b69   : > { %v5727_v0 = vpop.eup %5726 }
0x1b6a   : > { %v3992_v55 = vmul.f32 %v5727_v0, %v5719_v33 }
0x1b6c   : > { %5540 = vmatmul.mubr.msk.f32.vlgmr.msra.gmra.mxu0 %vm1233_vm4, %v3992_v55 }
0x1b6d   : > { %v5729_v56 = vpop.eup %5728  ;;  %5557 = vmatprep.mubr.msk.f32.mxu0 %vm5833_vm1, %v5832_v8  ;;  %5550 = vmatpush3.msra.mxu0 %v5008_v60 }
0x1b6e   : > { %v3993_v57 = vmul.f32 %v5729_v56, %v5721_v37  ;;  %5551 = vmatprep.subr.mxu0 %v5832_v8 }
0x1b6f   : > { %5552 = vmatpush3.msra.mxu0 %v5007_v61  ;;  %v4648_v61 = vld [vmem:[%s6892_s8 + $0x18] sm:$0xff] }
0x1b70   : > { %5547 = vmatmul.mubr.msk.f32.vlgmr.msra.gmra.mxu1 %vm1233_vm4, %v3993_v57  ;;  %5553 = vmatprep.subr.mxu0 %v5832_v8 }
0x1b71   : > { %5568 = vmatprep.mubr.msk.f32.mxu1 %vm5833_vm1, %v5832_v8  ;;  %5554 = vmatpush3.msra.mxu0 %v5006_v62  ;;  %v4647_v62 = vld [vmem:[%s6892_s8 + $0x10] sm:$0xff] }
0x1b72   : > { %5555 = vmatprep.subr.mxu0 %v5832_v8  ;;  %5561 = vmatpush3.msra.mxu1 %v5035_v22 }
0x1b73   : > { %5556 = vmatpush3.msra.mxu0 %v5005_v50  ;;  %5562 = vmatprep.subr.mxu1 %v5832_v8  ;;  %v4645_v50 = vld [vmem:[%s6892_s8] sm:$0xff] }
0x1b74   : > { %5571 = vmatprep.subr.mxu0 %v5832_v8 }
0x1bc8   : > { %v4069_v58 = vpop.f32.mrf.mxu1 }
0x1bca   : > { %v5527_v59 = vpop.f32.mrf.mxu1 }
0x1c24   : > { %v4148_v63 = vpop.f32.mrf.mxu1 }
0x1c25   : > { %4311 = vrot.lane.b32.xlu0 %v4148_v63, %s6935_s26  ;;  %v4646_v63 = vld [vmem:[%s6892_s8 + $0x8] sm:$0xff] }
0x1c26   : > { %v5534_v1 = vpop.f32.mrf.mxu1 }
0x1c2c   : > { %v4227_v2 = vpop.f32.mrf.mxu0 }
0x1c2d   : > { %4315 = vrot.lane.b32.xlu1 %v4227_v2, %s6936_s1 }
0x1c2e   : > { %v5541_v3 = vpop.f32.mrf.mxu0 }
0x1c30   : > { %v4306_v4 = vpop.f32.mrf.mxu1 }
0x1c31   : > { %4319 = vrot.lane.b32.xlu0 %v4306_v4, %s6937_s2 }
0x1c32   : > { %v5548_v5 = vpop.f32.mrf.mxu1 }
0x1c33   : > { %v5051_v5 = vld [vmem:[%s6889_s5 + $0x18] ss:$0 sm:$0xff] }
0x1c97   : > { %v4312_v6 = vpop.permute.xlu0 %4311 }
0x1c98   : > { %v4322_v9 = vsel %vm569_vm2, %v4069_v58, %v4312_v6 }
0x1c9f   : > { %v4316_v7 = vpop.permute.xlu1 %4315 }
0x1ca0   : > { %v4323_v10 = vsel %vm1233_vm4, %v4322_v9, %v4316_v7  ;;  %v5053_v7 = vld [vmem:[%s6889_s5 + $0x19] ss:$0 sm:$0xff] }
0x1ca3   : > { %v4320_v11 = vpop.permute.xlu0 %4319 }
0x1ca4   : > { %v4324_v12 = vsel %vm1235_vm5, %v4323_v10, %v4320_v11  ;;  %v5054_v10 = vld [vmem:[%s6893_s9] ss:$0 sm:$0xff] }
0x1ca5   : > { %5558 = vmatmul.mubr.msk.f32.vlgmr.msra.gmra.mxu0 %vm437_vm0, %v4324_v12 }
0x1ca6   : > { %5587 = vmatprep.mubr.msk.f32.mxu0 %vm5833_vm1, %v5832_v8  ;;  %5572 = vmatpush3.msra.mxu0 %v5046_v25 }
0x1ca7   : > { %5573 = vmatprep.subr.mxu0 %v5832_v8 }
0x1ca8   : > { %5574 = vmatpush3.msra.mxu0 %v5045_v26 }
0x1ca9   : > { %5575 = vmatprep.subr.mxu0 %v5832_v8 }
0x1caa   : > { %5576 = vmatpush3.msra.mxu0 %v5044_v36 }
0x1cab   : > { %5577 = vmatprep.subr.mxu0 %v5832_v8 }
0x1cac   : > { %5578 = vmatpush3.msra.mxu0 %v5043_v27 }
0x1cad   : > { %5579 = vmatprep.subr.mxu0 %v5832_v8 }
0x1cae   : > { %5580 = vmatpush3.msra.mxu0 %v5042_v28 }
0x1caf   : > { %5581 = vmatprep.subr.mxu0 %v5832_v8 }
0x1cb0   : > { %5582 = vmatpush3.msra.mxu0 %v5041_v41 }
0x1cb1   : > { %5583 = vmatprep.subr.mxu0 %v5832_v8 }
0x1cb2   : > { %5584 = vmatpush3.msra.mxu0 %v5040_v42 }
0x1cb3   : > { %5585 = vmatprep.subr.mxu0 %v5832_v8 }
0x1cb4   : > { %5586 = vmatpush3.msra.mxu0 %v5039_v43 }
0x1d65   : > { %v4400_v14 = vpop.f32.mrf.mxu0 }
0x1d66   : > { %v4401_v34 = vadd.f32 %v5026_v13, %v4400_v14 }
0x1d67   : > { %v5559_v16 = vpop.f32.mrf.mxu0 }
0x1d68   : > { %v6730_v17 = vadd.f32 %v4401_v34, %v6531_v15  ;;  %v5034_v15 = vld [vmem:[%s6890_s6 + $0x30] sm:$0xff] }
0x1d69   : > { %5563 = vmatpush3.msra.mxu1 %v5034_v15 }
0x1d6a   : > { %v4405_v54 = vsel %vm437_vm0, %v6730_v17, 0.0  ;;  %5564 = vmatprep.subr.mxu1 %v5832_v8 }
0x1d6b   : > { %4406 = vadd.xlane.f32.xlu1 %v4405_v54  ;;  %5565 = vmatpush3.msra.mxu1 %v5033_v23 }
0x1d6c   : > { %5566 = vmatprep.subr.mxu1 %v5832_v8 }
0x1d6d   : > { %5567 = vmatpush3.msra.mxu1 %v5032_v24 }
0x1d6e   : > { %5590 = vmatprep.subr.mxu1 %v5832_v8 }
0x1df4   : > { %v4407_v30 = vpop.xlane.xlu1 %4406 }
0x1df5   : > { %v4408_v20 = vmul.f32 0.03125, %v4407_v30 }
0x1df7   : > { %v4409_v21 = vsub.f32 %v6730_v17, %v4408_v20 }
0x1df9   : > { %v4410_v19 = vmul.f32 %v4409_v21, %v4409_v21 }
0x1dfb   : > { %v4411_v18 = vsel %vm437_vm0, %v4410_v19, 0.0 }
0x1dfc   : > { %4412 = vadd.xlane.f32.xlu0 %v4411_v18 }
0x1e85   : > { %v4413_v29 = vpop.xlane.xlu0 %4412 }
0x1e86   : > { %v4414_v31 = vmul.f32 0.03125, %v4413_v29 }
0x1e88   : > { %v4415_v32 = vadd.f32 1e-05, %v4414_v31 }
0x1e8a   : > { %5730 = vrsqrt.f32 %v4415_v32 }
0x1e97   : > { %v5731_v33 = vpop.eup %5730 }
0x1e98   : > { %v4417_v37 = vmul.f32 %v5731_v33, %v4409_v21 }
0x1e9a   : > { %v4426_v39 = vmul.f32 %v5029_v35, %v4417_v37 }
0x1e9c   : > { %v4435_v40 = vadd.f32 %v5031_v38, %v4426_v39 }
0x1e9e   : > { %5569 = vmatmul.mubr.msk.f32.vlgmr.msra.gmra.mxu1 %vm437_vm0, %v4435_v40 }
0x1e9f   : > { %5598 = vmatprep.mubr.msk.f32.mxu1 %vm5833_vm1, %v5832_v8  ;;  %5591 = vmatpush3.msra.mxu1 %v4648_v61 }
0x1ea0   : > { %5592 = vmatprep.subr.mxu1 %v5832_v8 }
0x1ea1   : > { %5593 = vmatpush3.msra.mxu1 %v4647_v62 }
0x1ea2   : > { %5594 = vmatprep.subr.mxu1 %v5832_v8 }
0x1ea3   : > { %5595 = vmatpush3.msra.mxu1 %v4646_v63 }
0x1ea4   : > { %5596 = vmatprep.subr.mxu1 %v5832_v8 }
0x1ea5   : > { %5597 = vmatpush3.msra.mxu1 %v4645_v50 }
0x1f5e   : > { %v4518_v47 = vpop.f32.mrf.mxu1 }
0x1f5f   : > { %v4519_v45 = vadd.f32 %v5037_v44, %v4518_v47 }
0x1f60   : > { %v5570_v46 = vpop.f32.mrf.mxu1 }
0x1f61   : > { %v4522_v48 = vmax.f32 %v4519_v45, 0.0 }
0x1f63   : > { %5588 = vmatmul.mubr.msk.f32.vlgmr.msra.gmra.mxu0 %vm2457_vm6, %v4522_v48 }
0x2023   : > { %v4609_v51 = vpop.f32.mrf.mxu0 }
0x2024   : > { %v4610_v52 = vadd.f32 %v5048_v49, %v4609_v51 }
0x2025   : > { %v5589_v53 = vpop.f32.mrf.mxu0 }
0x2026   : > { %v4613_v0 = vadd.f32 %v4610_v52, %v6730_v17 }
0x2028   : > { %v4614_v55 = vsel %vm437_vm0, %v4613_v0, 0.0 }
0x2029   : > { %4615 = vadd.xlane.f32.xlu0 %v4614_v55 }
0x20b2   : > { %v4616_v56 = vpop.xlane.xlu0 %4615 }
0x20b3   : > { %v4617_v57 = vmul.f32 0.03125, %v4616_v56 }
0x20b5   : > { %v4618_v58 = vsub.f32 %v4613_v0, %v4617_v57 }
0x20b7   : > { %v4619_v59 = vmul.f32 %v4618_v58, %v4618_v58 }
0x20b9   : > { %v4620_v60 = vsel %vm437_vm0, %v4619_v59, 0.0 }
0x20ba   : > { %4621 = vadd.xlane.f32.xlu1 %v4620_v60 }
0x2143   : > { %v4622_v1 = vpop.xlane.xlu1 %4621 }
0x2144   : > { %v4623_v2 = vmul.f32 0.03125, %v4622_v1 }
0x2146   : > { %v4624_v3 = vadd.f32 1e-05, %v4623_v2 }
0x2148   : > { %5732 = vrsqrt.f32 %v4624_v3 }
0x2155   : > { %v5733_v4 = vpop.eup %5732 }
0x2156   : > { %v4626_v6 = vmul.f32 %v5733_v4, %v4618_v58 }
0x2158   : > { %v4635_v9 = vmul.f32 %v5051_v5, %v4626_v6 }
0x215a   : > { %v4644_v8 = vadd.f32 %v5053_v7, %v4635_v9 }
0x215c   : > { %5599 = vmatmul.mubr.msk.f32.vlgmr.msra.gmra.mxu1 %vm437_vm0, %v4644_v8 }
0x221c   : > { %v4725_v11 = vpop.f32.mrf.mxu1 }
0x221d   : > { %v4726_v12 = vadd.f32 %v5054_v10, %v4725_v11 }
0x221e   : > { %v5600_v13 = vpop.f32.mrf.mxu1 }
0x221f   : > { %4729 = vmax.xlane.f32.xlu0 %v4726_v12 }
0x22a8   : > { %v4730_v14 = vpop.xlane.xlu0 %4729 }
0x22a9   : > { %v4731_v34 = vsub.f32 %v4726_v12, %v4730_v14 }
0x22ab   : > { %v4732_v16 = vmul.f32 1.442695, %v4731_v34 }
0x22ad   : > { %5734 = vpow2.f32 %v4732_v16 }
0x22ba   : > { %v5735_v17 = vpop.eup %5734 }
0x22bb   : > { %4734 = vadd.xlane.f32.xlu1 %v5735_v17 }
0x22bc   : > { %5753 = shalt.err (!%p5750_p3)
}
0x22bd   : > { %s5754_s24 = scalar_lea.hbm %s4771_s19, 128  ;;  %s5758_s26 = scalar_lea.hbm %s6895_s11, 256 }
0x22be   : > { %p5755_p4 = scmp.ne.s32.totalorder %s4771_s19, %s5754_s24  ;;  %p5759_p9 = scmp.lt.s32.totalorder %s4771_s19, %s6895_s11 }
0x22bf   : > { %p5760_p10 = scmp.lt.s32.totalorder %s5758_s26, %s5754_s24 }
0x22c0   : > { %p5756_p7 = pnand %p5755_p4, %p5943_p5 }
0x22c1   : > { %p5761_p11 = por %p5760_p10, %p5759_p9 }
0x22c2   : > { %p5757_p8 = pneg %p5756_p7 }
0x22c4   : > { %p5762_p12 = pnand %p5761_p11, %p5757_p8 }
0x22c6   : > { %5765 = shalt.err (!%p5762_p12)
}
0x22c7   : > { %5602 = dma.vmem_to_hbm [thread:$0]  (%p5943_p5), %s4774_s13, 128, %s4771_s19, %s4747_s22  }
0x22c8   : > { %s407_s12 = scalar_lea.vmem [#allocation2], %s4889_s25  ;;  %s4758_s23 = scalar_lea.hbm %s6894_s10, %s5058_s30 }
0x22c9   : > { %s4760_s15 = sshll.u32 %s407_s12, 4  ;;  %s4742_s28 = scalar_lea.sflag [#allocation3], %s6675_s14  ;;  %s4761_s15 = int_to_ptr.vmem [resolvable:$true] %s4760_s15 }
0x22ca   : > { %s5766_s24 = scalar_lea.vmem %s4761_s15, 128  ;;  %s5844_s19 = smov [#allocation2]  }
0x22cb   : > { %p5767_p13 = scmp.ne.s32.totalorder %s4761_s15, %s5766_s24  ;;  %s5770_s13 = sshll.u32 %s5844_s19, 4  ;;  %s5771_s13 = int_to_ptr.vmem [resolvable:$false] %s5770_s13 }
0x22cc   : > { %s5772_s25 = scalar_lea.vmem %s5771_s13, 256  ;;  %p5773_p2 = scmp.lt.s32.totalorder %s4761_s15, %s5771_s13 }
0x22cd   : > { %p5768_p0 = pnand %p5767_p13, %p5943_p5  ;;  %p5774_p3 = scmp.lt.s32.totalorder %s5772_s25, %s5766_s24 }
0x22cf   : > { %p5769_p1 = pneg %p5768_p0  ;;  %p5775_p4 = por %p5774_p3, %p5773_p2 }
0x22d1   : > { %p5776_p7 = pnand %p5775_p4, %p5769_p1 }
0x2344   : > { %v4735_v54 = vpop.xlane.xlu1 %4734 }
0x2345   : > { %5736 = vrcp.f32 %v4735_v54 }
0x2352   : > { %v5737_v30 = vpop.eup %5736 }
0x2353   : > { %v4737_v20 = vmul.f32 %v5737_v30, %v5735_v17 }
0x2355   : > { %4738 = vst [vmem:[%s407_s12] sm:$0xff] %v4737_v20 }
0x2356   : > { %5779 = shalt.err (!%p5776_p7)
}
0x2357   : > { %s5780_s21 = scalar_lea.hbm %s4758_s23, 128  ;;  %s5784_s22 = scalar_lea.hbm %s6894_s10, 256 }
0x2358   : > { %p5781_p8 = scmp.ne.s32.totalorder %s4758_s23, %s5780_s21  ;;  %p5785_p11 = scmp.lt.s32.totalorder %s4758_s23, %s6894_s10 }
0x2359   : > { %p5786_p12 = scmp.lt.s32.totalorder %s5784_s22, %s5780_s21 }
0x235a   : > { %p5782_p9 = pnand %p5781_p8, %p5943_p5 }
0x235b   : > { %p5787_p13 = por %p5786_p12, %p5785_p11 }
0x235c   : > { %p5783_p10 = pneg %p5782_p9 }
0x235e   : > { %p5788_p0 = pnand %p5787_p13, %p5783_p10 }
0x2360   : > { %5791 = shalt.err (!%p5788_p0)
}
0x2361   : > { %5601 = dma.vmem_to_hbm [thread:$0]  (%p5943_p5), %s4761_s15, 128, %s4758_s23, %s4742_s28  }
0x2362 PF: > { %s6938_s26 = sld [smem:[#allocation8_spill]]  ;;  %p5612_p1 = scmp.ge.s32.totalorder %s5830_s20, 2 }
0x2364   : > { %p5606_p2 = pnand %p5612_p1, %p5947_p6 }
0x2366   : > { %p5607_p3 = pneg %p5606_p2 }
0x2368   : > { %s4785_s2 = sand.u32 1, %s6938_s26  }
0x2369   : > { %s4786_s12 = scalar_lea.sflag [#allocation3], %s4785_s2 }
0x236a   : > { %5809 = dma.done.wait (%p5607_p3), %s4786_s12, 128  }
0x236b   : > { %5811 = vsyncadd (%p5607_p3), %s4786_s12, 4294967168  ;;  %s4795_s29 = scalar_lea.sflag [#allocation5], %s4785_s2 }
0x236c   : > { %5813 = dma.done.wait (%p5607_p3), %s4795_s29, 128  }
0x236d   : > { %5815 = vsyncadd (%p5607_p3), %s4795_s29, 4294967168  ;;  %s6940_s20 = sld [smem:[#allocation10_spill]]  ;;  %s6943_s17 = smov %s5822_s18 }
0x236e   : > { %s6941_s24 = sld [smem:[#allocation9_spill]] }
0x236f   : > { %s6942_s19 = sld [smem:[#allocation11_spill]] }
0x2373   : > { %p25_p5 = scmp.ge.s32.totalorder %s6940_s20, 4  }
0x2374   : > { %s6944_s18 = smov %s6941_s24 }
0x2375   :  { %27 = sbr.rel (!%p25_p5) target bundleno = 9 (0x9), region = 151 }
0x237a   :  { %4800 = vsyncpa [#allocation3], 1 }
0x237b   :  { %4802 = vsyncpa [#allocation3 + $0x1], 1 }
0x237c   :  { %4803 = vsyncpa [#allocation5], 1 }
0x237d   :  { %4805 = vsyncpa [#allocation5 + $0x1], 1 }

</bundles_post_ra>
